<compile_context>
chip_gen: v5e
topology: v5e:2x2
jax: 0.10.0
libtpu: 0.0.40
codegen_flags: <defaults>
</compile_context>

<pallas_src>
import functools
import math

import jax
import jax.numpy as jnp
from jax.experimental import pallas as pl
from jax.experimental.pallas import tpu as pltpu

EPS = 1e-5  # torch.nn.InstanceNorm2d default eps


def _band_weights(w_hwio, W, padded_width_input):
    """Fold the 3 kx taps + width zero-padding of a 3x3 conv into one matrix.

    Returns (3, Wi*Cin, W*Cout) with Wi = W+2 if the activation slab carries
    the width padding in its lane dim, else W (padding handled by omitting
    out-of-range taps).  big[ky, wi*Cin+ci, w*Cout+co] = w[ky, kx, ci, co]
    for the unique kx with wi == w + kx (+offset), else 0.
    """
    KH, KW, Cin, Cout = w_hwio.shape
    Wi = W + 2 if padded_width_input else W
    off = 0 if padded_width_input else -1
    kx = jnp.arange(KW)[:, None, None]
    wi = jnp.arange(Wi)[None, :, None]
    w = jnp.arange(W)[None, None, :]
    sel = (wi == w + kx + off).astype(w_hwio.dtype)          # (KW, Wi, W)
    big = jnp.einsum("kpw,ykio->ypiwo", sel, w_hwio)         # (KH, Wi, Cin, W, Cout)
    return big.reshape(KH, Wi * Cin, W * Cout)


def _conv_block_kernel(*refs, B, H, W, Cin, Cout, use_norm):
    if use_norm:
        xp_ref, bw1_ref, bw2_ref, o_ref, h_scr = refs
        b1_ref = b2_ref = None
    else:
        xp_ref, bw1_ref, b1_ref, bw2_ref, b2_ref, o_ref, h_scr = refs

    WC = W * Cout
    inv_hw = 1.0 / (H * W)

    def channel_sum(v):
        """(B, H, W*Cout) f32 -> (B, W*Cout): per-(sample, channel) sum over
        (h, w), already broadcast across the w-fused lane dim (each lane j
        holds the total of channel j % Cout).  Row reduce + lane roll-adds;
        stays in the lane-dense layout (no lane-splitting reshapes)."""
        s = jnp.sum(v, axis=1)                               # (B, WC)
        if W & (W - 1) == 0:                                 # power-of-two W
            shift = Cout
            while shift < WC:
                s = s + pltpu.roll(s, shift, axis=1)
                shift *= 2
        else:                                                # general fallback
            acc = s
            for k in range(1, W):
                acc = acc + pltpu.roll(s, k * Cout, axis=1)
            s = acc
        return s

    def epilogue(acc, b_ref):
        # acc: (B, H, WC) f32 conv output (bias-free).  InstanceNorm2d + ReLU.
        if use_norm:
            mean = channel_sum(acc) * inv_hw                 # (B, WC)
            cen = acc - mean[:, None, :]
            var = channel_sum(cen * cen) * inv_hw            # centered (2-pass)
            y = cen * jax.lax.rsqrt(var + EPS)[:, None, :]
        else:
            y = acc + b_ref[...][None, :, :]                 # (1,1,WC) broadcast
        return jnp.maximum(y, 0.0)

    def conv(lhs_rows, bw_ref, k):
        # 3 accumulating MXU matmuls, one per kernel row ky.
        acc = None
        for ky in range(3):
            lhs = lhs_rows(ky).reshape(B * H, k)             # (B*H, k) bf16
            p = jnp.dot(lhs, bw_ref[ky], preferred_element_type=jnp.float32)
            acc = p if acc is None else acc + p
        return acc.reshape(B, H, WC)

    # Zero only the 2 border rows of the intermediate scratch (~2 KiB/step);
    # the interior rows 1..H are fully overwritten below before being read.
    zrow = jnp.zeros((B, 1, WC), h_scr.dtype)
    h_scr[:, pl.ds(0, 1), :] = zrow
    h_scr[:, pl.ds(H + 1, 1), :] = zrow

    # ---- conv1 + InstanceNorm + ReLU --------------------------------------
    k1 = (W + 2) * Cin
    y1 = epilogue(conv(lambda ky: xp_ref[:, pl.ds(ky, H), :], bw1_ref, k1),
                  b1_ref)
    # Intermediate never touches HBM; lanes (W*Cout) stay fully aligned.
    h_scr[:, pl.ds(1, H), :] = y1.astype(h_scr.dtype)

    # ---- conv2 + InstanceNorm + ReLU --------------------------------------
    y2 = epilogue(conv(lambda ky: h_scr[:, pl.ds(ky, H), :], bw2_ref, WC),
                  b2_ref)
    o_ref[...] = y2.astype(o_ref.dtype)


def _pick_block_batch(n, max_b=8):
    """Largest divisor of n <= max_b that still leaves >= 2 grid steps."""
    best = 1
    for b in range(2, min(max_b, n) + 1):
        if n % b == 0 and n // b >= 2:
            best = b
    return best


def conv_block(x_nchw, w1, b1, w2, b2, use_norm=True, block_batch=None):
    """ConvBlock forward.  x: (N, Cin, H, W) f32; weights HWIO; returns NCHW f32."""
    N, Cin, H, W = x_nchw.shape
    Cout = w1.shape[-1]
    B = block_batch if block_batch is not None else _pick_block_batch(N)
    assert N % B == 0, (N, B)
    WC = W * Cout

    # NCHW -> NHWC, zero-pad spatially by 1, fold (W+2, Cin) into the lane dim,
    # cast matmul operands to bf16 (f32 accumulation inside the kernel).
    x = jnp.transpose(x_nchw, (0, 2, 3, 1))
    xp = jnp.pad(x, ((0, 0), (1, 1), (1, 1), (0, 0)))
    xp = xp.reshape(N, H + 2, (W + 2) * Cin).astype(jnp.bfloat16)

    bw1 = _band_weights(w1.astype(jnp.float32), W, True).astype(jnp.bfloat16)
    bw2 = _band_weights(w2.astype(jnp.float32), W, False).astype(jnp.bfloat16)

    inputs = [xp, bw1]
    in_specs = [
        pl.BlockSpec((B, H + 2, (W + 2) * Cin), lambda n: (n, 0, 0)),
        pl.BlockSpec((3, (W + 2) * Cin, WC), lambda n: (0, 0, 0)),
    ]
    if not use_norm:
        # Bias only matters without InstanceNorm (mean subtraction cancels it);
        # tile across w so the in-kernel add is lane-aligned.
        inputs.append(jnp.tile(b1.astype(jnp.float32), W).reshape(1, WC))
        in_specs.append(pl.BlockSpec((1, WC), lambda n: (0, 0)))
    inputs.append(bw2)
    in_specs.append(pl.BlockSpec((3, WC, WC), lambda n: (0, 0, 0)))
    if not use_norm:
        inputs.append(jnp.tile(b2.astype(jnp.float32), W).reshape(1, WC))
        in_specs.append(pl.BlockSpec((1, WC), lambda n: (0, 0)))

    kernel = functools.partial(_conv_block_kernel, B=B, H=H, W=W, Cin=Cin,
                               Cout=Cout, use_norm=use_norm)
    out = pl.pallas_call(
        kernel,
        out_shape=jax.ShapeDtypeStruct((N, H, WC), jnp.float32),
        grid=(N // B,),
        in_specs=in_specs,
        out_specs=pl.BlockSpec((B, H, WC), lambda n: (n, 0, 0)),
        scratch_shapes=[pltpu.VMEM((B, H + 2, WC), jnp.bfloat16)],
        compiler_params=pltpu.CompilerParams(
            dimension_semantics=("parallel",),   # batch blocks -> megacore/2 TC
            vmem_limit_bytes=16 << 20,           # valid on v5e/v6e/v7x
        ),
    )(*inputs)

    # Lane-dense (N, H, W*Cout) -> NCHW in the XLA wrapper.
    return jnp.transpose(out.reshape(N, H, W, Cout), (0, 3, 1, 2))


def _reference(x_nchw, w1, b1, w2, b2):
    """Pure-JAX reference with the same bf16 input/weight quantization."""
    q = lambda t: t.astype(jnp.bfloat16).astype(jnp.float32)

    def conv(x, w, b):
        y = jax.lax.conv_general_dilated(
            q(x), q(w), window_strides=(1, 1), padding="SAME",
            dimension_numbers=("NHWC", "HWIO", "NHWC"),
            precision=jax.lax.Precision.HIGHEST)
        return y + b[None, None, None, :]

    def in_relu(y):
        mean = jnp.mean(y, axis=(1, 2), keepdims=True)
        var = jnp.mean((y - mean) ** 2, axis=(1, 2), keepdims=True)
        return jnp.maximum((y - mean) * jax.lax.rsqrt(var + EPS), 0.0)

    x = jnp.transpose(x_nchw, (0, 2, 3, 1))
    y = in_relu(conv(x, w1, b1))
    y = in_relu(conv(y, w2, b2))
    return jnp.transpose(y, (0, 3, 1, 2))


if __name__ == "__main__":
    key = jax.random.PRNGKey(0)
    kp1, kp2, kp3, kp4, kx1, kx2 = jax.random.split(key, 6)

    Cin, H, W, Cout = 4, 16, 16, 32          # ConvBlock(4, 32)
    s1 = 1.0 / math.sqrt(Cin * 9)            # PyTorch Conv2d default init scale
    s2 = 1.0 / math.sqrt(Cout * 9)
    w1 = jax.random.uniform(kp1, (3, 3, Cin, Cout), jnp.float32, -s1, s1)
    b1 = jax.random.uniform(kp2, (Cout,), jnp.float32, -s1, s1)
    w2 = jax.random.uniform(kp3, (3, 3, Cout, Cout), jnp.float32, -s2, s2)
    b2 = jax.random.uniform(kp4, (Cout,), jnp.float32, -s2, s2)

    fwd = jax.jit(conv_block, static_argnames=("use_norm", "block_batch"))

    # batch=2 (B=1 per step -> 2 grid steps, keeps both TCs busy on v7x).
    x2 = jax.random.normal(kx1, (2, Cin, H, W), jnp.float32)
    out2 = jax.block_until_ready(fwd(x2, w1, b1, w2, b2))
    assert out2.shape == (2, Cout, H, W), out2.shape
    assert bool(jnp.all(jnp.isfinite(out2)))
    assert bool(jnp.all(out2 >= 0.0))                    # ReLU output
    err2 = float(jnp.max(jnp.abs(out2 - _reference(x2, w1, b1, w2, b2))))
    assert err2 < 2e-2, f"batch=2 max abs err vs reference: {err2}"

    # Also exercise the multi-sample-per-step path (batch=8 -> B=4, 2 steps).
    x8 = jax.random.normal(kx2, (8, Cin, H, W), jnp.float32)
    out8 = jax.block_until_ready(fwd(x8, w1, b1, w2, b2))
    err8 = float(jnp.max(jnp.abs(out8 - _reference(x8, w1, b1, w2, b2))))
    assert err8 < 2e-2, f"batch=8 max abs err vs reference: {err8}"

    print("KERNEL_OK")
</pallas_src>

<mosaic_0001>
module attributes {stable_mosaic.version = 11 : i64} {
  func.func @_conv_block_kernel(%arg0: i32, %arg1: memref<1x18x72xbf16, #tpu.memory_space<vmem>>, %arg2: memref<3x72x512xbf16, #tpu.memory_space<vmem>>, %arg3: memref<3x512x512xbf16, #tpu.memory_space<vmem>>, %arg4: memref<1x16x512xf32, #tpu.memory_space<vmem>>, %arg5: memref<1x18x512xbf16, #tpu.memory_space<vmem>>) attributes {dimension_semantics = [#tpu.dimension_semantics<parallel>], iteration_bounds = array<i64: 2>, scalar_prefetch = 0 : i64, scratch_operands = 1 : i64, tpu.core_type = #tpu.core_type<tc>, window_params = [{transform_indices = @transform_0, window_bounds = array<i64: 1, 18, 72>}, {pipeline_mode = #tpu.pipeline_mode<synchronous>, transform_indices = @transform_1, window_bounds = array<i64: 3, 72, 512>}, {pipeline_mode = #tpu.pipeline_mode<synchronous>, transform_indices = @transform_2, window_bounds = array<i64: 3, 512, 512>}, {transform_indices = @transform_3, window_bounds = array<i64: 1, 16, 512>}]} {
    %cst = arith.constant 0.000000e+00 : bf16
    %0 = vector.broadcast %cst : bf16 to vector<1x1x512xbf16>
    %c0 = arith.constant 0 : index
    %c0_0 = arith.constant 0 : index
    %c0_1 = arith.constant 0 : index
    %1 = vector.load %arg5[%c0, %c0_0, %c0_1] : memref<1x18x512xbf16, #tpu.memory_space<vmem>>, vector<1x1x512xbf16>
    tpu.vector_store %arg5[%c0, %c0_0, %c0_1], %0 {strides = array<i32>} : memref<1x18x512xbf16, #tpu.memory_space<vmem>>, vector<1x1x512xbf16>,
    %c0_2 = arith.constant 0 : index
    %c17 = arith.constant 17 : index
    %c0_3 = arith.constant 0 : index
    %2 = vector.load %arg5[%c0_2, %c17, %c0_3] : memref<1x18x512xbf16, #tpu.memory_space<vmem>>, vector<1x1x512xbf16>
    tpu.vector_store %arg5[%c0_2, %c17, %c0_3], %0 {strides = array<i32>} : memref<1x18x512xbf16, #tpu.memory_space<vmem>>, vector<1x1x512xbf16>,
    %c0_4 = arith.constant 0 : index
    %c0_5 = arith.constant 0 : index
    %c0_6 = arith.constant 0 : index
    %3 = vector.load %arg1[%c0_4, %c0_5, %c0_6] : memref<1x18x72xbf16, #tpu.memory_space<vmem>>, vector<1x16x72xbf16>
    %4 = vector.shape_cast %3 : vector<1x16x72xbf16> to vector<16x72xbf16>
    %c0_7 = arith.constant 0 : index
    %c0_8 = arith.constant 0 : index
    %c0_9 = arith.constant 0 : index
    %5 = vector.load %arg2[%c0_7, %c0_8, %c0_9] : memref<3x72x512xbf16, #tpu.memory_space<vmem>>, vector<1x72x512xbf16>
    %6 = vector.shape_cast %5 : vector<1x72x512xbf16> to vector<72x512xbf16>
    %cst_10 = arith.constant dense<0.000000e+00> : vector<16x512xf32>
    %7 = tpu.matmul %4, %6, %cst_10 {dimension_numbers = #tpu.dot_dimension_numbers<[1], [0], [0], [1], [0, 0, 1, 1], [], []>} : vector<16x72xbf16>, vector<72x512xbf16>, vector<16x512xf32> -> vector<16x512xf32>
    %c0_11 = arith.constant 0 : index
    %c1 = arith.constant 1 : index
    %c0_12 = arith.constant 0 : index
    %8 = vector.load %arg1[%c0_11, %c1, %c0_12] : memref<1x18x72xbf16, #tpu.memory_space<vmem>>, vector<1x16x72xbf16>
    %9 = vector.shape_cast %8 : vector<1x16x72xbf16> to vector<16x72xbf16>
    %c1_13 = arith.constant 1 : index
    %c0_14 = arith.constant 0 : index
    %c0_15 = arith.constant 0 : index
    %10 = vector.load %arg2[%c1_13, %c0_14, %c0_15] : memref<3x72x512xbf16, #tpu.memory_space<vmem>>, vector<1x72x512xbf16>
    %11 = vector.shape_cast %10 : vector<1x72x512xbf16> to vector<72x512xbf16>
    %cst_16 = arith.constant dense<0.000000e+00> : vector<16x512xf32>
    %12 = tpu.matmul %9, %11, %cst_16 {dimension_numbers = #tpu.dot_dimension_numbers<[1], [0], [0], [1], [0, 0, 1, 1], [], []>} : vector<16x72xbf16>, vector<72x512xbf16>, vector<16x512xf32> -> vector<16x512xf32>
    %13 = arith.addf %7, %12 : vector<16x512xf32>
    %c0_17 = arith.constant 0 : index
    %c2 = arith.constant 2 : index
    %c0_18 = arith.constant 0 : index
    %14 = vector.load %arg1[%c0_17, %c2, %c0_18] : memref<1x18x72xbf16, #tpu.memory_space<vmem>>, vector<1x16x72xbf16>
    %15 = vector.shape_cast %14 : vector<1x16x72xbf16> to vector<16x72xbf16>
    %c2_19 = arith.constant 2 : index
    %c0_20 = arith.constant 0 : index
    %c0_21 = arith.constant 0 : index
    %16 = vector.load %arg2[%c2_19, %c0_20, %c0_21] : memref<3x72x512xbf16, #tpu.memory_space<vmem>>, vector<1x72x512xbf16>
    %17 = vector.shape_cast %16 : vector<1x72x512xbf16> to vector<72x512xbf16>
    %cst_22 = arith.constant dense<0.000000e+00> : vector<16x512xf32>
    %18 = tpu.matmul %15, %17, %cst_22 {dimension_numbers = #tpu.dot_dimension_numbers<[1], [0], [0], [1], [0, 0, 1, 1], [], []>} : vector<16x72xbf16>, vector<72x512xbf16>, vector<16x512xf32> -> vector<16x512xf32>
    %19 = arith.addf %13, %18 : vector<16x512xf32>
    %20 = vector.shape_cast %19 : vector<16x512xf32> to vector<1x16x512xf32>
    %cst_23 = arith.constant dense<0.000000e+00> : vector<1x512xf32>
    %21 = vector.multi_reduction <add>, %20, %cst_23 [1] : vector<1x16x512xf32> to vector<1x512xf32>
    %c32_i32 = arith.constant 32 : i32
    %22 = tpu.dynamic_rotate %21 by %c32_i32 dim 1 : vector<1x512xf32>, i32 -> vector<1x512xf32>
    %23 = arith.addf %21, %22 : vector<1x512xf32>
    %c64_i32 = arith.constant 64 : i32
    %24 = tpu.dynamic_rotate %23 by %c64_i32 dim 1 : vector<1x512xf32>, i32 -> vector<1x512xf32>
    %25 = arith.addf %23, %24 : vector<1x512xf32>
    %c128_i32 = arith.constant 128 : i32
    %26 = tpu.dynamic_rotate %25 by %c128_i32 dim 1 : vector<1x512xf32>, i32 -> vector<1x512xf32>
    %27 = arith.addf %25, %26 : vector<1x512xf32>
    %c256_i32 = arith.constant 256 : i32
    %28 = tpu.dynamic_rotate %27 by %c256_i32 dim 1 : vector<1x512xf32>, i32 -> vector<1x512xf32>
    %29 = arith.addf %27, %28 : vector<1x512xf32>
    %cst_24 = arith.constant 3.906250e-03 : f32
    %30 = vector.broadcast %cst_24 : f32 to vector<1x512xf32>
    %31 = arith.mulf %29, %30 : vector<1x512xf32>
    %32 = vector.shape_cast %31 : vector<1x512xf32> to vector<1x1x512xf32>
    %33 = vector.broadcast %32 : vector<1x1x512xf32> to vector<1x16x512xf32>
    %34 = arith.subf %20, %33 : vector<1x16x512xf32>
    %35 = arith.mulf %34, %34 : vector<1x16x512xf32>
    %cst_25 = arith.constant dense<0.000000e+00> : vector<1x512xf32>
    %36 = vector.multi_reduction <add>, %35, %cst_25 [1] : vector<1x16x512xf32> to vector<1x512xf32>
    %c32_i32_26 = arith.constant 32 : i32
    %37 = tpu.dynamic_rotate %36 by %c32_i32_26 dim 1 : vector<1x512xf32>, i32 -> vector<1x512xf32>
    %38 = arith.addf %36, %37 : vector<1x512xf32>
    %c64_i32_27 = arith.constant 64 : i32
    %39 = tpu.dynamic_rotate %38 by %c64_i32_27 dim 1 : vector<1x512xf32>, i32 -> vector<1x512xf32>
    %40 = arith.addf %38, %39 : vector<1x512xf32>
    %c128_i32_28 = arith.constant 128 : i32
    %41 = tpu.dynamic_rotate %40 by %c128_i32_28 dim 1 : vector<1x512xf32>, i32 -> vector<1x512xf32>
    %42 = arith.addf %40, %41 : vector<1x512xf32>
    %c256_i32_29 = arith.constant 256 : i32
    %43 = tpu.dynamic_rotate %42 by %c256_i32_29 dim 1 : vector<1x512xf32>, i32 -> vector<1x512xf32>
    %44 = arith.addf %42, %43 : vector<1x512xf32>
    %cst_30 = arith.constant 3.906250e-03 : f32
    %45 = vector.broadcast %cst_30 : f32 to vector<1x512xf32>
    %46 = arith.mulf %44, %45 : vector<1x512xf32>
    %cst_31 = arith.constant 9.99999974E-6 : f32
    %47 = vector.broadcast %cst_31 : f32 to vector<1x512xf32>
    %48 = arith.addf %46, %47 : vector<1x512xf32>
    %49 = math.rsqrt %48 : vector<1x512xf32>
    %50 = vector.shape_cast %49 : vector<1x512xf32> to vector<1x1x512xf32>
    %51 = vector.broadcast %50 : vector<1x1x512xf32> to vector<1x16x512xf32>
    %52 = arith.mulf %34, %51 : vector<1x16x512xf32>
    %cst_32 = arith.constant 0.000000e+00 : f32
    %53 = vector.broadcast %cst_32 : f32 to vector<1x16x512xf32>
    %54 = arith.maximumf %52, %53 : vector<1x16x512xf32>
    %55 = arith.truncf %54 : vector<1x16x512xf32> to vector<1x16x512xbf16>
    %c0_33 = arith.constant 0 : index
    %c1_34 = arith.constant 1 : index
    %c0_35 = arith.constant 0 : index
    %56 = vector.load %arg5[%c0_33, %c1_34, %c0_35] : memref<1x18x512xbf16, #tpu.memory_space<vmem>>, vector<1x16x512xbf16>
    tpu.vector_store %arg5[%c0_33, %c1_34, %c0_35], %55 {strides = array<i32>} : memref<1x18x512xbf16, #tpu.memory_space<vmem>>, vector<1x16x512xbf16>,
    %c0_36 = arith.constant 0 : index
    %c0_37 = arith.constant 0 : index
    %c0_38 = arith.constant 0 : index
    %57 = vector.load %arg5[%c0_36, %c0_37, %c0_38] : memref<1x18x512xbf16, #tpu.memory_space<vmem>>, vector<1x16x512xbf16>
    %58 = vector.shape_cast %57 : vector<1x16x512xbf16> to vector<16x512xbf16>
    %c0_39 = arith.constant 0 : index
    %c0_40 = arith.constant 0 : index
    %c0_41 = arith.constant 0 : index
    %59 = vector.load %arg3[%c0_39, %c0_40, %c0_41] : memref<3x512x512xbf16, #tpu.memory_space<vmem>>, vector<1x512x512xbf16>
    %60 = vector.shape_cast %59 : vector<1x512x512xbf16> to vector<512x512xbf16>
    %cst_42 = arith.constant dense<0.000000e+00> : vector<16x512xf32>
    %61 = tpu.matmul %58, %60, %cst_42 {dimension_numbers = #tpu.dot_dimension_numbers<[1], [0], [0], [1], [0, 0, 1, 1], [], []>} : vector<16x512xbf16>, vector<512x512xbf16>, vector<16x512xf32> -> vector<16x512xf32>
    %c0_43 = arith.constant 0 : index
    %c1_44 = arith.constant 1 : index
    %c0_45 = arith.constant 0 : index
    %62 = vector.load %arg5[%c0_43, %c1_44, %c0_45] : memref<1x18x512xbf16, #tpu.memory_space<vmem>>, vector<1x16x512xbf16>
    %63 = vector.shape_cast %62 : vector<1x16x512xbf16> to vector<16x512xbf16>
    %c1_46 = arith.constant 1 : index
    %c0_47 = arith.constant 0 : index
    %c0_48 = arith.constant 0 : index
    %64 = vector.load %arg3[%c1_46, %c0_47, %c0_48] : memref<3x512x512xbf16, #tpu.memory_space<vmem>>, vector<1x512x512xbf16>
    %65 = vector.shape_cast %64 : vector<1x512x512xbf16> to vector<512x512xbf16>
    %cst_49 = arith.constant dense<0.000000e+00> : vector<16x512xf32>
    %66 = tpu.matmul %63, %65, %cst_49 {dimension_numbers = #tpu.dot_dimension_numbers<[1], [0], [0], [1], [0, 0, 1, 1], [], []>} : vector<16x512xbf16>, vector<512x512xbf16>, vector<16x512xf32> -> vector<16x512xf32>
    %67 = arith.addf %61, %66 : vector<16x512xf32>
    %c0_50 = arith.constant 0 : index
    %c2_51 = arith.constant 2 : index
    %c0_52 = arith.constant 0 : index
    %68 = vector.load %arg5[%c0_50, %c2_51, %c0_52] : memref<1x18x512xbf16, #tpu.memory_space<vmem>>, vector<1x16x512xbf16>
    %69 = vector.shape_cast %68 : vector<1x16x512xbf16> to vector<16x512xbf16>
    %c2_53 = arith.constant 2 : index
    %c0_54 = arith.constant 0 : index
    %c0_55 = arith.constant 0 : index
    %70 = vector.load %arg3[%c2_53, %c0_54, %c0_55] : memref<3x512x512xbf16, #tpu.memory_space<vmem>>, vector<1x512x512xbf16>
    %71 = vector.shape_cast %70 : vector<1x512x512xbf16> to vector<512x512xbf16>
    %cst_56 = arith.constant dense<0.000000e+00> : vector<16x512xf32>
    %72 = tpu.matmul %69, %71, %cst_56 {dimension_numbers = #tpu.dot_dimension_numbers<[1], [0], [0], [1], [0, 0, 1, 1], [], []>} : vector<16x512xbf16>, vector<512x512xbf16>, vector<16x512xf32> -> vector<16x512xf32>
    %73 = arith.addf %67, %72 : vector<16x512xf32>
    %74 = vector.shape_cast %73 : vector<16x512xf32> to vector<1x16x512xf32>
    %cst_57 = arith.constant dense<0.000000e+00> : vector<1x512xf32>
    %75 = vector.multi_reduction <add>, %74, %cst_57 [1] : vector<1x16x512xf32> to vector<1x512xf32>
    %c32_i32_58 = arith.constant 32 : i32
    %76 = tpu.dynamic_rotate %75 by %c32_i32_58 dim 1 : vector<1x512xf32>, i32 -> vector<1x512xf32>
    %77 = arith.addf %75, %76 : vector<1x512xf32>
    %c64_i32_59 = arith.constant 64 : i32
    %78 = tpu.dynamic_rotate %77 by %c64_i32_59 dim 1 : vector<1x512xf32>, i32 -> vector<1x512xf32>
    %79 = arith.addf %77, %78 : vector<1x512xf32>
    %c128_i32_60 = arith.constant 128 : i32
    %80 = tpu.dynamic_rotate %79 by %c128_i32_60 dim 1 : vector<1x512xf32>, i32 -> vector<1x512xf32>
    %81 = arith.addf %79, %80 : vector<1x512xf32>
    %c256_i32_61 = arith.constant 256 : i32
    %82 = tpu.dynamic_rotate %81 by %c256_i32_61 dim 1 : vector<1x512xf32>, i32 -> vector<1x512xf32>
    %83 = arith.addf %81, %82 : vector<1x512xf32>
    %cst_62 = arith.constant 3.906250e-03 : f32
    %84 = vector.broadcast %cst_62 : f32 to vector<1x512xf32>
    %85 = arith.mulf %83, %84 : vector<1x512xf32>
    %86 = vector.shape_cast %85 : vector<1x512xf32> to vector<1x1x512xf32>
    %87 = vector.broadcast %86 : vector<1x1x512xf32> to vector<1x16x512xf32>
    %88 = arith.subf %74, %87 : vector<1x16x512xf32>
    %89 = arith.mulf %88, %88 : vector<1x16x512xf32>
    %cst_63 = arith.constant dense<0.000000e+00> : vector<1x512xf32>
    %90 = vector.multi_reduction <add>, %89, %cst_63 [1] : vector<1x16x512xf32> to vector<1x512xf32>
    %c32_i32_64 = arith.constant 32 : i32
    %91 = tpu.dynamic_rotate %90 by %c32_i32_64 dim 1 : vector<1x512xf32>, i32 -> vector<1x512xf32>
    %92 = arith.addf %90, %91 : vector<1x512xf32>
    %c64_i32_65 = arith.constant 64 : i32
    %93 = tpu.dynamic_rotate %92 by %c64_i32_65 dim 1 : vector<1x512xf32>, i32 -> vector<1x512xf32>
    %94 = arith.addf %92, %93 : vector<1x512xf32>
    %c128_i32_66 = arith.constant 128 : i32
    %95 = tpu.dynamic_rotate %94 by %c128_i32_66 dim 1 : vector<1x512xf32>, i32 -> vector<1x512xf32>
    %96 = arith.addf %94, %95 : vector<1x512xf32>
    %c256_i32_67 = arith.constant 256 : i32
    %97 = tpu.dynamic_rotate %96 by %c256_i32_67 dim 1 : vector<1x512xf32>, i32 -> vector<1x512xf32>
    %98 = arith.addf %96, %97 : vector<1x512xf32>
    %cst_68 = arith.constant 3.906250e-03 : f32
    %99 = vector.broadcast %cst_68 : f32 to vector<1x512xf32>
    %100 = arith.mulf %98, %99 : vector<1x512xf32>
    %cst_69 = arith.constant 9.99999974E-6 : f32
    %101 = vector.broadcast %cst_69 : f32 to vector<1x512xf32>
    %102 = arith.addf %100, %101 : vector<1x512xf32>
    %103 = math.rsqrt %102 : vector<1x512xf32>
    %104 = vector.shape_cast %103 : vector<1x512xf32> to vector<1x1x512xf32>
    %105 = vector.broadcast %104 : vector<1x1x512xf32> to vector<1x16x512xf32>
    %106 = arith.mulf %88, %105 : vector<1x16x512xf32>
    %cst_70 = arith.constant 0.000000e+00 : f32
    %107 = vector.broadcast %cst_70 : f32 to vector<1x16x512xf32>
    %108 = arith.maximumf %106, %107 : vector<1x16x512xf32>
    %c0_71 = arith.constant 0 : index
    %c0_72 = arith.constant 0 : index
    %c0_73 = arith.constant 0 : index
    %109 = vector.load %arg4[%c0_71, %c0_72, %c0_73] : memref<1x16x512xf32, #tpu.memory_space<vmem>>, vector<1x16x512xf32>
    tpu.vector_store %arg4[%c0_71, %c0_72, %c0_73], %108 {strides = array<i32>} : memref<1x16x512xf32, #tpu.memory_space<vmem>>, vector<1x16x512xf32>,
    return
  }
  func.func @transform_0(%arg0: i32) -> (i32, i32, i32) {
    %c0_i32 = arith.constant 0 : i32
    %c0_i32_0 = arith.constant 0 : i32
    %c0_i32_1 = arith.constant 0 : i32
    return %arg0, %c0_i32, %c0_i32_0 : i32, i32, i32
  }
  func.func @transform_1(%arg0: i32) -> (i32, i32, i32) {
    %c0_i32 = arith.constant 0 : i32
    %c0_i32_0 = arith.constant 0 : i32
    %c0_i32_1 = arith.constant 0 : i32
    %c0_i32_2 = arith.constant 0 : i32
    return %c0_i32, %c0_i32_0, %c0_i32_1 : i32, i32, i32
  }
  func.func @transform_2(%arg0: i32) -> (i32, i32, i32) {
    %c0_i32 = arith.constant 0 : i32
    %c0_i32_0 = arith.constant 0 : i32
    %c0_i32_1 = arith.constant 0 : i32
    %c0_i32_2 = arith.constant 0 : i32
    return %c0_i32, %c0_i32_0, %c0_i32_1 : i32, i32, i32
  }
  func.func @transform_3(%arg0: i32) -> (i32, i32, i32) {
    %c0_i32 = arith.constant 0 : i32
    %c0_i32_0 = arith.constant 0 : i32
    %c0_i32_1 = arith.constant 0 : i32
    return %arg0, %c0_i32, %c0_i32_0 : i32, i32, i32
  }
}

</mosaic_0001>

<bundles_post_ra>
// kernel: conv_block.1
= control target key start
LH: loop header
LB: loop body
LE: loop exit
PB: predicated region body
PF: predicated region fallthrough
CT: control target
= control target key end

     0   :  { %s6929_s12 = smov 0   ;;  %s10135_s0 = inlined_call_operand.vmem [shape: bf16[2,18,72], index: 0, kind: input, shape index: {}]   ;;  %s10136_s1 = inlined_call_operand.vmem [shape: bf16[3,72,512], index: 1, kind: input, shape index: {}]   ;;  %s10137_s2 = inlined_call_operand.vmem [shape: bf16[3,512,512], index: 2, kind: input, shape index: {}]   ;;  %s10138_s3 = inlined_call_operand.vmem [shape: f32[2,16,512], index: 3, kind: output, shape index: {}]  }
   0x1 LB: > { %s4398_s13 = sadd.s32 4294967295, %s6905_s12   ;;  %p4402_p0 = scmp.ge.s32.totalorder %s6905_s12, 1  ;;  %s6905_s12 = sphi %s6929_s12, %s13_s12  }
   0x2   : > { %p137_p1 = scmp.lt.s32.totalorder %s6905_s12, 3 }
   0x4   : > { %p138_p2 = pnand %p4402_p0, %p137_p1 }
   0x5   : > { %p6979_p3 = scmp.lt.s32.totalorder (!%p138_p2), %s4398_s13, 1  ;;  %s6907_s27 = smov (!%p138_p2), 32  }
   0x6   : > { %141 = sbr.rel (%p138_p2) target bundleno = 1822 (0x71e), region = 32  ;;  %s6908_s28 = smov (!%p138_p2), 64  }
   0xb   : > { %v4422_v0 = vld [vmem:[%s10136_s1 + $0x110] sm:$0xff]  ;;  %v4423_v1 = vld [vmem:[%s10136_s1 + $0x118] sm:$0xff]  ;;  %vm351_vm0 = vcmask 1043456   ;;  %v6471_v7 = vld [vmem:[%s10136_s1 + $0xfc] sm:$0xf0]  ;;  %s10151_s13 = smov (!%p6979_p3, %s4398_s13), 1 }
   0xc   : > { %v307_v2 = vunpack.c.l.b16 %v4422_v0  ;;  %v308_v3 = vunpack.c.h.b16 %v4422_v0  ;;  %v309_v4 = vunpack.c.l.b16 %v4423_v1  ;;  %v310_v5 = vunpack.c.h.b16 %v4423_v1  ;;  %v4474_v6 = vld [vmem:[%s10136_s1 + $0xf0] sm:$0xf]  ;;  %v6469_v12 = vld [vmem:[%s10136_s1 + $0xf4] sm:$0xf]  ;;  %v4476_v13 = vld [vmem:[%s10136_s1 + $0x100] sm:$0xf0] }
   0xd   : > { %v4482_v14 = vld [vmem:[%s10136_s1 + $0xf8] sm:$0xf]  ;;  %v6472_v15 = vld [vmem:[%s10136_s1 + $0x104] sm:$0xf0]  ;;  %v6470_v16 = vld [vmem:[%s10136_s1 + $0xfc] sm:$0xf]  ;;  %v4475_v22 = vor.u32 %v6471_v7, %v4474_v6  ;;  %v4479_v23 = vor.u32 %v6469_v12, %v4476_v13 }
   0xe   : > { %v327_v8 = vpack.c.b16 %v307_v2, %v307_v2  ;;  %v328_v9 = vpack.c.b16 %v308_v3, %v308_v3  ;;  %v329_v10 = vpack.c.b16 %v309_v4, %v309_v4  ;;  %v330_v11 = vpack.c.b16 %v310_v5, %v310_v5  ;;  %v4484_v17 = vld [vmem:[%s10136_s1 + $0x108] sm:$0xf0]  ;;  %v4458_v24 = vld [vmem:[%s10136_s1 + $0xd0] sm:$0xf]  ;;  %v6467_v25 = vld [vmem:[%s10136_s1 + $0xdc] sm:$0xf0] }
   0xf   : > { %v4483_v26 = vor.u32 %v6472_v15, %v4482_v14  ;;  %v4487_v27 = vor.u32 %v6470_v16, %v4484_v17  ;;  %v6465_v28 = vld [vmem:[%s10136_s1 + $0xd4] sm:$0xf]  ;;  %v4460_v29 = vld [vmem:[%s10136_s1 + $0xe0] sm:$0xf0]  ;;  %v4466_v30 = vld [vmem:[%s10136_s1 + $0xd8] sm:$0xf]  ;;  %v4459_v35 = vor.u32 %v6467_v25, %v4458_v24 }
  0x10   : > { %v353_v18 = vsel %vm351_vm0, %v327_v8, 0  ;;  %v356_v19 = vsel %vm351_vm0, %v328_v9, 0  ;;  %v359_v20 = vsel %vm351_vm0, %v329_v10, 0  ;;  %v362_v21 = vsel %vm351_vm0, %v330_v11, 0  ;;  %v6468_v31 = vld [vmem:[%s10136_s1 + $0xe4] sm:$0xf0] }
  0x11   : > { %367 = vmatpush.bf16.msra.mxu0 %v353_v18  ;;  %381 = vmatpush.bf16.msra.mxu1 %v356_v19  ;;  %v6466_v32 = vld [vmem:[%s10136_s1 + $0xdc] sm:$0xf]  ;;  %v4468_v33 = vld [vmem:[%s10136_s1 + $0xe8] sm:$0xf0]  ;;  %v4442_v34 = vld [vmem:[%s10136_s1 + $0xb0] sm:$0xf]  ;;  %v4463_v36 = vor.u32 %v6465_v28, %v4460_v29  ;;  %v4467_v40 = vor.u32 %v6468_v31, %v4466_v30 }
  0x12   : > { %395 = vmatpush.bf16.msra.mxu2 %v359_v20  ;;  %409 = vmatpush.bf16.msra.mxu3 %v362_v21  ;;  %v6463_v37 = vld [vmem:[%s10136_s1 + $0xbc] sm:$0xf0]  ;;  %v6461_v38 = vld [vmem:[%s10136_s1 + $0xb4] sm:$0xf]  ;;  %v4444_v39 = vld [vmem:[%s10136_s1 + $0xc0] sm:$0xf0]  ;;  %v4471_v41 = vor.u32 %v6466_v32, %v4468_v33 }
  0x13   : > { %v4450_v42 = vld [vmem:[%s10136_s1 + $0xb8] sm:$0xf]  ;;  %v6464_v43 = vld [vmem:[%s10136_s1 + $0xc4] sm:$0xf0]  ;;  %v6462_v44 = vld [vmem:[%s10136_s1 + $0xbc] sm:$0xf]  ;;  %v4443_v53 = vor.u32 %v6463_v37, %v4442_v34  ;;  %v4447_v54 = vor.u32 %v6461_v38, %v4444_v39 }
  0x14   : > { %v4452_v45 = vld [vmem:[%s10136_s1 + $0xc8] sm:$0xf0]  ;;  %v214_v46 = vld [vmem:[%s10136_s1 + $0x80] sm:$0xff]  ;;  %v4426_v48 = vld [vmem:[%s10136_s1 + $0x90] sm:$0xf]  ;;  %s6880_s29 = smul.u32 12, %s10151_s13  ;;  %v4451_v58 = vor.u32 %v6464_v43, %v4450_v42 }
  0x15   : > { %368 = vmatpush.bf16.msra.mxu0 %v4475_v22  ;;  %382 = vmatpush.bf16.msra.mxu1 %v4479_v23  ;;  %v215_v47 = vld [vmem:[%s10136_s1 + $0x88] sm:$0xff]  ;;  %v6459_v49 = vld [vmem:[%s10136_s1 + $0x9c] sm:$0xf0]  ;;  %v470_v50 = vunpack.c.l.b16 %v214_v46  ;;  %v471_v51 = vunpack.c.h.b16 %v214_v46  ;;  %v6457_v55 = vld [vmem:[%s10136_s1 + $0x94] sm:$0xf]  ;;  %v4455_v59 = vor.u32 %v6462_v44, %v4452_v45  ;;  %vm347_vm2 = vcmask 588800  }
  0x16   : > { %396 = vmatpush.bf16.msra.mxu2 %v4483_v26  ;;  %410 = vmatpush.bf16.msra.mxu3 %v4487_v27  ;;  %v472_v52 = vunpack.c.l.b16 %v215_v47  ;;  %v4428_v56 = vld [vmem:[%s10136_s1 + $0xa0] sm:$0xf0]  ;;  %v473_v57 = vunpack.c.h.b16 %v215_v47  ;;  %v4434_v60 = vld [vmem:[%s10136_s1 + $0x98] sm:$0xf]  ;;  %v4427_v61 = vor.u32 %v6459_v49, %v4426_v48  ;;  %v6460_v62 = vld [vmem:[%s10136_s1 + $0xa4] sm:$0xf0]  ;;  %s7065_s16 = scalar_lea.vmem %s10135_s0, %s6880_s29 }
  0x17   : > { %v6458_v63 = vld [vmem:[%s10136_s1 + $0x9c] sm:$0xf]  ;;  %v4436_v0 = vld [vmem:[%s10136_s1 + $0xa8] sm:$0xf0]  ;;  %v4431_v1 = vor.u32 %v6457_v55, %v4428_v56  ;;  %v490_v2 = vpack.c.b16 %v470_v50, %v470_v50  ;;  %v491_v3 = vpack.c.b16 %v471_v51, %v471_v51  ;;  %v7068_v5 = vld [vmem:[%s7065_s16] sm:$0xff]   ;;  %v4435_v11 = vor.u32 %v6460_v62, %v4434_v60 }
  0x18   : > { %v492_v4 = vpack.c.b16 %v472_v52, %v472_v52  ;;  %v216_v6 = vld [vmem:[%s7065_s16 + $0x8] sm:$0x1]  ;;  %v493_v7 = vpack.c.b16 %v473_v57, %v473_v57  ;;  %v246_v9 = vshrl.u32 %v7068_v5, 16  ;;  %v248_v10 = vshll.u32 %v7068_v5, 16  ;;  %v4542_v15 = vld [vmem:[%s10136_s1 + $0x60] sm:$0xf] }
  0x19   : > { %369 = vmatpush.bf16.msra.mxu0 %v4459_v35  ;;  %383 = vmatpush.bf16.msra.mxu1 %v4463_v36  ;;  %v241_v8 = vunpack.c.l.b16 %v216_v6  ;;  %v4439_v12 = vor.u32 %v6458_v63, %v4436_v0  ;;  %vm244_vm1 = vsmask.f32 7424  ;;  %v6455_v16 = vld [vmem:[%s10136_s1 + $0x6c] sm:$0xf0]  ;;  %v513_v17 = vsel %vm351_vm0, %v490_v2, 0  ;;  %v4577_v44 = vld [vmem:[%s10136_s1 + $0x1a8] sm:$0xff] }
  0x1a   : > { %397 = vmatpush.bf16.msra.mxu2 %v4467_v40  ;;  %411 = vmatpush.bf16.msra.mxu3 %v4471_v41  ;;  %v250_v14 = vrot.slane %v248_v10, 1  ;;  %v516_v18 = vsel %vm351_vm0, %v491_v3, 0  ;;  %v6453_v19 = vld [vmem:[%s10136_s1 + $0x64] sm:$0xf]  ;;  %v4544_v20 = vld [vmem:[%s10136_s1 + $0x70] sm:$0xf0]  ;;  %v4543_v30 = vor.u32 %v6455_v16, %v4542_v15  ;;  %v660_v60 = vunpack.c.h.b16 %v4577_v44 }
  0x1b   : > { %v7073_v13 = vpack.c.b16 %v241_v8, %v241_v8  ;;  %v519_v21 = vsel %vm351_vm0, %v492_v4, 0  ;;  %v522_v22 = vsel %vm351_vm0, %v493_v7, 0  ;;  %v4550_v25 = vld [vmem:[%s10136_s1 + $0x68] sm:$0xf]  ;;  %v6456_v26 = vld [vmem:[%s10136_s1 + $0x74] sm:$0xf0]  ;;  %v4547_v31 = vor.u32 %v6453_v19, %v4544_v20 }
  0x1c   : > { %v251_v23 = vor.u32 %v250_v14, %v246_v9  ;;  %v6454_v27 = vld [vmem:[%s10136_s1 + $0x6c] sm:$0xf]  ;;  %v4552_v28 = vld [vmem:[%s10136_s1 + $0x78] sm:$0xf0]  ;;  %v4526_v32 = vld [vmem:[%s10136_s1 + $0x40] sm:$0xf]  ;;  %v4551_v36 = vor.u32 %v6456_v26, %v4550_v25  ;;  %v680_v14 = vpack.c.b16 %v660_v60, %v660_v60 }
  0x1d   : > { %370 = vmatpush.bf16.msra.mxu0 %v4443_v53  ;;  %384 = vmatpush.bf16.msra.mxu1 %v4447_v54  ;;  %v253_v24 = vshll.u32 %v7073_v13, 16  ;;  %v6451_v33 = vld [vmem:[%s10136_s1 + $0x4c] sm:$0xf0]  ;;  %v6449_v34 = vld [vmem:[%s10136_s1 + $0x44] sm:$0xf]  ;;  %v4555_v37 = vor.u32 %v6454_v27, %v4552_v28  ;;  %vm603_vm3 = vcmask 1046528  }
  0x1e   : > { %398 = vmatpush.bf16.msra.mxu2 %v4451_v58  ;;  %412 = vmatpush.bf16.msra.mxu3 %v4455_v59  ;;  %v4528_v38 = vld [vmem:[%s10136_s1 + $0x50] sm:$0xf0]  ;;  %v4534_v39 = vld [vmem:[%s10136_s1 + $0x48] sm:$0xf]  ;;  %v4576_v40 = vld [vmem:[%s10136_s1 + $0x1a0] sm:$0xff]  ;;  %v4527_v45 = vor.u32 %v6451_v33, %v4526_v32  ;;  %v659_v59 = vunpack.c.l.b16 %v4577_v44  ;;  %vm172_vm6 = vcmask 1040384  }
  0x1f   : > { %v255_v29 = vrot.slane %v253_v24, 1  ;;  %v6452_v41 = vld [vmem:[%s10136_s1 + $0x54] sm:$0xf0]  ;;  %v6450_v42 = vld [vmem:[%s10136_s1 + $0x4c] sm:$0xf]  ;;  %v4531_v46 = vor.u32 %v6449_v34, %v4528_v38  ;;  %v657_v49 = vunpack.c.l.b16 %v4576_v40  ;;  %v658_v55 = vunpack.c.h.b16 %v4576_v40 }
  0x20   : > { %v4536_v43 = vld [vmem:[%s10136_s1 + $0x58] sm:$0xf0]  ;;  %v4510_v47 = vld [vmem:[%s10136_s1 + $0x20] sm:$0xf]  ;;  %v6447_v48 = vld [vmem:[%s10136_s1 + $0x2c] sm:$0xf0]  ;;  %v4535_v50 = vor.u32 %v6452_v41, %v4534_v39 }
  0x21   : > { %371 = vmatpush.bf16.msra.mxu0 %v4427_v61  ;;  %385 = vmatpush.bf16.msra.mxu1 %v4431_v1  ;;  %v256_v35 = vsel %vm244_vm1, %v251_v23, %v255_v29  ;;  %v4539_v51 = vor.u32 %v6450_v42, %v4536_v43  ;;  %v6445_v52 = vld [vmem:[%s10136_s1 + $0x24] sm:$0xf]  ;;  %v4512_v53 = vld [vmem:[%s10136_s1 + $0x30] sm:$0xf0]  ;;  %v4518_v54 = vld [vmem:[%s10136_s1 + $0x28] sm:$0xf]  ;;  %v4511_v61 = vor.u32 %v6447_v48, %v4510_v47 }
  0x22   : > { %399 = vmatpush.bf16.msra.mxu2 %v4435_v11  ;;  %413 = vmatpush.bf16.msra.mxu3 %v4439_v12  ;;  %v6448_v56 = vld [vmem:[%s10136_s1 + $0x34] sm:$0xf0]  ;;  %v6446_v57 = vld [vmem:[%s10136_s1 + $0x2c] sm:$0xf]  ;;  %v4520_v58 = vld [vmem:[%s10136_s1 + $0x38] sm:$0xf0]  ;;  %v4515_v62 = vor.u32 %v6445_v52, %v4512_v53  ;;  %v677_v1 = vpack.c.b16 %v657_v49, %v657_v49  ;;  %v678_v8 = vpack.c.b16 %v658_v55, %v658_v55 }
  0x23   : > { %v4494_v63 = vld [vmem:[%s10136_s1] sm:$0xf]  ;;  %v6443_v0 = vld [vmem:[%s10136_s1 + $0xc] sm:$0xf0]  ;;  %v4519_v2 = vor.u32 %v6448_v56, %v4518_v54  ;;  %v4523_v3 = vor.u32 %v6446_v57, %v4520_v58  ;;  %v6441_v4 = vld [vmem:[%s10136_s1 + $0x4] sm:$0xf]  ;;  %v679_v12 = vpack.c.b16 %v659_v59, %v659_v59 }
  0x24   : > { %4488 = vmatmul.msk.bf16.vlgmr.msra.gmra.mxu0 %vm347_vm2, %v256_v35  ;;  %4489 = vmatmul.msk.bf16.vlgmr.msra.gmra.mxu1 %vm347_vm2, %v256_v35  ;;  %v4496_v6 = vld [vmem:[%s10136_s1 + $0x10] sm:$0xf0]  ;;  %v4502_v7 = vld [vmem:[%s10136_s1 + $0x8] sm:$0xf]  ;;  %v6444_v9 = vld [vmem:[%s10136_s1 + $0x14] sm:$0xf0]  ;;  %v4495_v15 = vor.u32 %v6443_v0, %v4494_v63 }
  0x25   : > { %527 = vmatpush.bf16.msrb.mxu0 %v513_v17  ;;  %541 = vmatpush.bf16.msrb.mxu1 %v516_v18  ;;  %v6442_v10 = vld [vmem:[%s10136_s1 + $0xc] sm:$0xf]  ;;  %v4504_v11 = vld [vmem:[%s10136_s1 + $0x18] sm:$0xf0]  ;;  %v4499_v16 = vor.u32 %v6441_v4, %v4496_v6  ;;  %v4503_v17 = vor.u32 %v6444_v9, %v4502_v7  ;;  %v701_v19 = vsel %vm351_vm0, %v677_v1, 0  ;;  %v704_v20 = vsel %vm351_vm0, %v678_v8, 0 }
  0x26   : > { %555 = vmatpush.bf16.msrb.mxu2 %v519_v21  ;;  %569 = vmatpush.bf16.msrb.mxu3 %v522_v22  ;;  %v4507_v18 = vor.u32 %v6442_v10, %v4504_v11  ;;  %v707_v21 = vsel %vm351_vm0, %v679_v12, 0  ;;  %v710_v22 = vsel %vm351_vm0, %v680_v14, 0  ;;  %v4628_v23 = vld [vmem:[%s10136_s1 + $0x180] sm:$0xf]  ;;  %v6487_v24 = vld [vmem:[%s10136_s1 + $0x18c] sm:$0xf0] }
  0x27   : > { %4490 = vmatmul.msk.bf16.vlgmr.msra.gmra.mxu2 %vm347_vm2, %v256_v35  ;;  %4491 = vmatmul.msk.bf16.vlgmr.msra.gmra.mxu3 %vm347_vm2, %v256_v35  ;;  %v6485_v25 = vld [vmem:[%s10136_s1 + $0x184] sm:$0xf]  ;;  %v4630_v26 = vld [vmem:[%s10136_s1 + $0x190] sm:$0xf0]  ;;  %v4636_v27 = vld [vmem:[%s10136_s1 + $0x188] sm:$0xf] }
  0x28   : > { %v6488_v28 = vld [vmem:[%s10136_s1 + $0x194] sm:$0xf0]  ;;  %v6486_v29 = vld [vmem:[%s10136_s1 + $0x18c] sm:$0xf]  ;;  %v4633_v32 = vor.u32 %v6485_v25, %v4630_v26  ;;  %v4612_v33 = vld [vmem:[%s10136_s1 + $0x160] sm:$0xf] }
  0x29   : > { %528 = vmatpush.bf16.msrb.mxu0 %v4543_v30  ;;  %542 = vmatpush.bf16.msrb.mxu1 %v4547_v31  ;;  %v4638_v30 = vld [vmem:[%s10136_s1 + $0x198] sm:$0xf0]  ;;  %v4629_v31 = vor.u32 %v6487_v24, %v4628_v23  ;;  %v6483_v34 = vld [vmem:[%s10136_s1 + $0x16c] sm:$0xf0]  ;;  %v4637_v35 = vor.u32 %v6488_v28, %v4636_v27  ;;  %v4614_v38 = vld [vmem:[%s10136_s1 + $0x170] sm:$0xf0] }
  0x2a   : > { %556 = vmatpush.bf16.msrb.mxu2 %v4551_v36  ;;  %570 = vmatpush.bf16.msrb.mxu3 %v4555_v37  ;;  %v4641_v36 = vor.u32 %v6486_v29, %v4638_v30  ;;  %v6481_v37 = vld [vmem:[%s10136_s1 + $0x164] sm:$0xf]  ;;  %v4620_v39 = vld [vmem:[%s10136_s1 + $0x168] sm:$0xf]  ;;  %v6484_v40 = vld [vmem:[%s10136_s1 + $0x174] sm:$0xf0]  ;;  %v4613_v44 = vor.u32 %v6483_v34, %v4612_v33 }
  0x2b   : > { %v6482_v41 = vld [vmem:[%s10136_s1 + $0x16c] sm:$0xf]  ;;  %v4622_v42 = vld [vmem:[%s10136_s1 + $0x178] sm:$0xf0]  ;;  %v4596_v43 = vld [vmem:[%s10136_s1 + $0x140] sm:$0xf]  ;;  %v4621_v48 = vor.u32 %v6484_v40, %v4620_v39 }
  0x2c   : > { %v6477_v47 = vld [vmem:[%s10136_s1 + $0x144] sm:$0xf]  ;;  %v4625_v49 = vor.u32 %v6482_v41, %v4622_v42  ;;  %v6878_v52 = vld [vmem:[%s7065_s16] sm:$0xe]  ;;  %v6480_v53 = vld [vmem:[%s10136_s1 + $0x154] sm:$0xf0] }
  0x2d   : > { %529 = vmatpush.bf16.msrb.mxu0 %v4527_v45  ;;  %543 = vmatpush.bf16.msrb.mxu1 %v4531_v46  ;;  %v4617_v45 = vor.u32 %v6481_v37, %v4614_v38  ;;  %v6479_v46 = vld [vmem:[%s10136_s1 + $0x14c] sm:$0xf0]  ;;  %v6478_v54 = vld [vmem:[%s10136_s1 + $0x14c] sm:$0xf]  ;;  %v4606_v55 = vld [vmem:[%s10136_s1 + $0x158] sm:$0xf0] }
  0x2e   : > { %557 = vmatpush.bf16.msrb.mxu2 %v4535_v50  ;;  %571 = vmatpush.bf16.msrb.mxu3 %v4539_v51  ;;  %v4604_v50 = vld [vmem:[%s10136_s1 + $0x148] sm:$0xf]  ;;  %v6877_v51 = vld [vmem:[%s7065_s16] sm:$0xf0]  ;;  %v4597_v56 = vor.u32 %v6479_v46, %v4596_v43  ;;  %v4580_v58 = vld [vmem:[%s10136_s1 + $0x120] sm:$0xf] }
  0x2f   : > { %v6475_v59 = vld [vmem:[%s10136_s1 + $0x12c] sm:$0xf0]  ;;  %v6879_v60 = vor.u32 %v6878_v52, %v6877_v51  ;;  %v6473_v63 = vld [vmem:[%s10136_s1 + $0x124] sm:$0xf]  ;;  %v4582_v0 = vld [vmem:[%s10136_s1 + $0x130] sm:$0xf0] }
  0x30   : > { %v4588_v1 = vld [vmem:[%s10136_s1 + $0x128] sm:$0xf]  ;;  %v4590_v4 = vld [vmem:[%s10136_s1 + $0x138] sm:$0xf0]  ;;  %v4581_v6 = vor.u32 %v6475_v59, %v4580_v58  ;;  %v4585_v7 = vor.u32 %v6473_v63, %v4582_v0  ;;  %v605_v9 = vrot.slane %v7073_v13, 1  ;;  %vm175_vm8 = vcmask 1044484  }
  0x31   : > { %530 = vmatpush.bf16.msrb.mxu0 %v4511_v61  ;;  %544 = vmatpush.bf16.msrb.mxu1 %v4515_v62  ;;  %v4605_v61 = vor.u32 %v6480_v53, %v4604_v50  ;;  %v4609_v62 = vor.u32 %v6478_v54, %v4606_v55  ;;  %v604_v8 = vrot.slane %v6879_v60, 1  ;;  %vm173_vm7 = vsmask.f32 256 }
  0x32   : > { %558 = vmatpush.bf16.msrb.mxu2 %v4519_v2  ;;  %572 = vmatpush.bf16.msrb.mxu3 %v4523_v3  ;;  %v6476_v2 = vld [vmem:[%s10136_s1 + $0x134] sm:$0xf0]  ;;  %v6474_v3 = vld [vmem:[%s10136_s1 + $0x12c] sm:$0xf]  ;;  %vm176_vm9 = vsmask.f32 4352  ;;  %vm174_vm10 = vmand %vm172_vm6, %vm173_vm7 }
  0x33   : > { %v4589_v10 = vor.u32 %v6476_v2, %v4588_v1  ;;  %v4593_v11 = vor.u32 %v6474_v3, %v4590_v4  ;;  %v606_v12 = vsel %vm603_vm3, %v604_v8, %v605_v9  ;;  %vm185_vm11 = vsmask.f32 7938  ;;  %vm177_vm12 = vmand %vm175_vm8, %vm176_vm9 }
  0x34   : > { %vm187_vm13 = vsmask.f32 7954  ;;  %vm7426_vm14 = vmor %vm177_vm12, %vm174_vm10  ;;  %vm1022_vm15 = vcmask 1047556  }
  0x35   : > { %531 = vmatpush.bf16.msrb.mxu0 %v4495_v15  ;;  %545 = vmatpush.bf16.msrb.mxu1 %v4499_v16  ;;  %vm188_vm9 = vmand %vm175_vm8, %vm187_vm13 }
  0x36   : > { %559 = vmatpush.bf16.msrb.mxu2 %v4503_v17  ;;  %573 = vmatpush.bf16.msrb.mxu3 %v4507_v18  ;;  %vm7464_vm8 = vmand %vm351_vm0, %vm185_vm11 }
  0x37   : > { %vm7476_vm10 = vmand %vm1022_vm15, %vm187_vm13 }
  0x38   : > { %4556 = vmatmul.msk.bf16.vlgmr.msrb.gmra.mxu0 %vm347_vm2, %v7068_v5  ;;  %4557 = vmatmul.msk.bf16.vlgmr.msrb.gmra.mxu1 %vm347_vm2, %v7068_v5  ;;  %vm1024_vm0 = vmor %vm7476_vm10, %vm7464_vm8 }
  0x39   : > { %715 = vmatpush.bf16.msra.mxu0 %v701_v19  ;;  %729 = vmatpush.bf16.msra.mxu1 %v704_v20 }
  0x3a   : > { %743 = vmatpush.bf16.msra.mxu2 %v707_v21  ;;  %757 = vmatpush.bf16.msra.mxu3 %v710_v22 }
  0x3b   : > { %4558 = vmatmul.msk.bf16.vlgmr.msrb.gmra.mxu2 %vm347_vm2, %v7068_v5  ;;  %4559 = vmatmul.msk.bf16.vlgmr.msrb.gmra.mxu3 %vm347_vm2, %v7068_v5  ;;  %v4598_v5 = vld [vmem:[%s10136_s1 + $0x150] sm:$0xf0] }
  0x3c   : > { %v4601_v57 = vor.u32 %v6477_v47, %v4598_v5 }
  0x3d   : > { %716 = vmatpush.bf16.msra.mxu0 %v4629_v31  ;;  %730 = vmatpush.bf16.msra.mxu1 %v4633_v32 }
  0x3e   : > { %744 = vmatpush.bf16.msra.mxu2 %v4637_v35  ;;  %758 = vmatpush.bf16.msra.mxu3 %v4641_v36 }
  0x41   : > { %717 = vmatpush.bf16.msra.mxu0 %v4613_v44  ;;  %731 = vmatpush.bf16.msra.mxu1 %v4617_v45 }
  0x42   : > { %745 = vmatpush.bf16.msra.mxu2 %v4621_v48  ;;  %759 = vmatpush.bf16.msra.mxu3 %v4625_v49 }
  0x45   : > { %718 = vmatpush.bf16.msra.mxu0 %v4597_v56  ;;  %732 = vmatpush.bf16.msra.mxu1 %v4601_v57 }
  0x46   : > { %746 = vmatpush.bf16.msra.mxu2 %v4605_v61  ;;  %760 = vmatpush.bf16.msra.mxu3 %v4609_v62 }
  0x49   : > { %719 = vmatpush.bf16.msra.mxu0 %v4581_v6  ;;  %733 = vmatpush.bf16.msra.mxu1 %v4585_v7 }
  0x4a   : > { %747 = vmatpush.bf16.msra.mxu2 %v4589_v10  ;;  %761 = vmatpush.bf16.msra.mxu3 %v4593_v11 }
  0x4c   : > { %4642 = vmatmul.msk.bf16.vlgmr.msra.gmra.mxu0 %vm347_vm2, %v606_v12  ;;  %4643 = vmatmul.msk.bf16.vlgmr.msra.gmra.mxu1 %vm347_vm2, %v606_v12 }
  0x4d   : > { %4644 = vmatmul.msk.bf16.vlgmr.msra.gmra.mxu2 %vm347_vm2, %v606_v12  ;;  %4645 = vmatmul.msk.bf16.vlgmr.msra.gmra.mxu3 %vm347_vm2, %v606_v12  ;;  %vm186_vm2 = vmand %vm172_vm6, %vm185_vm11 }
  0x4e   : > { %vm189_vm6 = vmor %vm188_vm9, %vm186_vm2 }
  0xa1   : > { %v373_v13 = vpop.f32.mrf.mxu0  ;;  %v387_v14 = vpop.f32.mrf.mxu1 }
  0xa9   : > { %v375_v17 = vpop.f32.mrf.mxu0  ;;  %v389_v18 = vpop.f32.mrf.mxu1 }
  0xaa   : > { %v401_v15 = vpop.f32.mrf.mxu2  ;;  %v415_v16 = vpop.f32.mrf.mxu3 }
  0xb2   : > { %v403_v19 = vpop.f32.mrf.mxu2  ;;  %v417_v20 = vpop.f32.mrf.mxu3 }
  0xb5   : > { %v533_v21 = vpop.f32.mrf.mxu0  ;;  %v547_v22 = vpop.f32.mrf.mxu1 }
  0xb6   : > { %v534_v31 = vadd.f32 %v533_v21, %v373_v13  ;;  %v548_v32 = vadd.f32 %v547_v22, %v387_v14 }
  0xbd   : > { %v535_v25 = vpop.f32.mrf.mxu0  ;;  %v549_v26 = vpop.f32.mrf.mxu1 }
  0xbe   : > { %v561_v23 = vpop.f32.mrf.mxu2  ;;  %v575_v24 = vpop.f32.mrf.mxu3  ;;  %v536_v33 = vadd.f32 %v535_v25, %v375_v17  ;;  %v550_v34 = vadd.f32 %v549_v26, %v389_v18  ;;  %v812_v17 = vlaneseq }
  0xbf   : > { %v562_v47 = vadd.f32 %v561_v23, %v401_v15  ;;  %v576_v5 = vadd.f32 %v575_v24, %v415_v16 }
  0xc6   : > { %v563_v27 = vpop.f32.mrf.mxu2  ;;  %v577_v28 = vpop.f32.mrf.mxu3 }
  0xc7   : > { %v564_v48 = vadd.f32 %v563_v27, %v403_v19  ;;  %v578_v49 = vadd.f32 %v577_v28, %v417_v20  ;;  %v7331_v19 = vand.u32 127, %v812_v17 }
  0xc9   : > { %v721_v29 = vpop.f32.mrf.mxu0  ;;  %v735_v30 = vpop.f32.mrf.mxu1  ;;  %vm814_vm4 = vcmp.lt.s32.totalorder %v7331_v19, 32  ;;  %vm831_vm5 = vcmp.lt.s32.totalorder %v7331_v19, 64 }
  0xca   : > { %v7303_v39 = vadd.f32 %v721_v29, %v534_v31  ;;  %v7305_v40 = vadd.f32 %v735_v30, %v548_v32 }
  0xd0   : > { %v749_v35 = vpop.f32.mrf.mxu2  ;;  %v763_v36 = vpop.f32.mrf.mxu3 }
  0xd1   : > { %v723_v37 = vpop.f32.mrf.mxu0  ;;  %v737_v38 = vpop.f32.mrf.mxu1  ;;  %v7315_v54 = vadd.f32 %v749_v35, %v562_v47  ;;  %v7317_v55 = vadd.f32 %v763_v36, %v576_v5 }
  0xd2   : > { %v7307_v41 = vadd.f32 %v723_v37, %v536_v33  ;;  %v7309_v42 = vadd.f32 %v737_v38, %v550_v34 }
  0xd4   : > { %v776_v43 = vadd.f32 %v7307_v41, %v7303_v39  ;;  %v783_v44 = vadd.f32 %v7309_v42, %v7305_v40 }
  0xd6   : > { %v777_v45 = vrot.slane %v776_v43, 4  ;;  %v784_v46 = vrot.slane %v783_v44, 4 }
  0xd8   : > { %v785_v50 = vadd.f32 %v784_v46, %v783_v44  ;;  %v751_v51 = vpop.f32.mrf.mxu2  ;;  %v765_v52 = vpop.f32.mrf.mxu3  ;;  %v778_v53 = vadd.f32 %v777_v45, %v776_v43 }
  0xd9   : > { %v7319_v56 = vadd.f32 %v751_v51, %v564_v48  ;;  %v7321_v57 = vadd.f32 %v765_v52, %v578_v49 }
  0xda   : > { %v779_v58 = vrot.slane %v778_v53, 2  ;;  %v786_v61 = vrot.slane %v785_v50, 2 }
  0xdb   : > { %v790_v59 = vadd.f32 %v7319_v56, %v7315_v54  ;;  %v797_v60 = vadd.f32 %v7321_v57, %v7317_v55 }
  0xdc   : > { %v780_v62 = vadd.f32 %v779_v58, %v778_v53  ;;  %v787_v6 = vadd.f32 %v786_v61, %v785_v50 }
  0xdd   : > { %v791_v63 = vrot.slane %v790_v59, 4  ;;  %v798_v0 = vrot.slane %v797_v60, 4 }
  0xde   : > { %v781_v1 = vrot.slane %v780_v62, 1  ;;  %v788_v10 = vrot.slane %v787_v6, 1 }
  0xdf   : > { %v799_v2 = vadd.f32 %v798_v0, %v797_v60  ;;  %v792_v3 = vadd.f32 %v791_v63, %v790_v59 }
  0xe0   : > { %v782_v4 = vadd.f32 %v781_v1, %v780_v62  ;;  %v789_v14 = vadd.f32 %v788_v10, %v787_v6 }
  0xe1   : > { %v793_v7 = vrot.slane %v792_v3, 2  ;;  %v800_v8 = vrot.slane %v799_v2, 2 }
  0xe2   : > { %804 = vrot.lane.b32.xlu0 %v782_v4, %s6907_s27 }
  0xe3   : > { %v794_v9 = vadd.f32 %v793_v7, %v792_v3  ;;  %v801_v13 = vadd.f32 %v800_v8, %v799_v2 }
  0xe5   : > { %v795_v11 = vrot.slane %v794_v9, 1  ;;  %v802_v15 = vrot.slane %v801_v13, 1 }
  0xe7   : > { %v796_v12 = vadd.f32 %v795_v11, %v794_v9  ;;  %v803_v16 = vadd.f32 %v802_v15, %v801_v13 }
  0xe9   : > { %808 = vrot.lane.b32.xlu1 %v796_v12, %s6907_s27 }
  0xea   : > { %806 = vrot.lane.b32.xlu0 %v789_v14, %s6907_s27 }
  0xf1   : > { %810 = vrot.lane.b32.xlu1 %v803_v16, %s6907_s27 }
 0x154   : > { %v805_v18 = vpop.permute.xlu0 %804 }
 0x15b   : > { %v809_v20 = vpop.permute.xlu1 %808 }
 0x15c   : > { %v807_v21 = vpop.permute.xlu0 %806 }
 0x15d   : > { %v816_v22 = vsel %vm814_vm4, %v807_v21, %v809_v20  ;;  %v817_v29 = vsel %vm814_vm4, %v805_v18, %v807_v21 }
 0x15e   : > { %v821_v23 = vadd.f32 %v816_v22, %v796_v12  ;;  %v820_v30 = vadd.f32 %v817_v29, %v789_v14 }
 0x160   : > { %827 = vrot.lane.b32.xlu0 %v821_v23, %s6908_s28 }
 0x163   : > { %v811_v24 = vpop.permute.xlu1 %810 }
 0x164   : > { %v815_v25 = vsel %vm814_vm4, %v809_v20, %v811_v24  ;;  %v818_v26 = vsel %vm814_vm4, %v811_v24, %v805_v18 }
 0x165   : > { %v822_v27 = vadd.f32 %v815_v25, %v803_v16  ;;  %v819_v28 = vadd.f32 %v818_v26, %v782_v4 }
 0x167   : > { %829 = vrot.lane.b32.xlu1 %v822_v27, %s6908_s28  ;;  %823 = vrot.lane.b32.xlu2 %v819_v28, %s6908_s28 }
 0x16f   : > { %825 = vrot.lane.b32.xlu2 %v820_v30, %s6908_s28 }
 0x1c1   : > { %v824_v31 = vpop.permute.xlu2 %823 }
 0x1c9   : > { %v826_v33 = vpop.permute.xlu2 %825 }
 0x1ca   : > { %v834_v35 = vsel %vm831_vm5, %v824_v31, %v826_v33 }
 0x1cb   : > { %v837_v44 = vadd.f32 %v834_v35, %v820_v30 }
 0x1d2   : > { %v828_v32 = vpop.permute.xlu0 %827 }
 0x1d3   : > { %v833_v34 = vsel %vm831_vm5, %v826_v33, %v828_v32 }
 0x1d4   : > { %v838_v36 = vadd.f32 %v833_v34, %v821_v23 }
 0x1d6   : > { %v842_v47 = vadd.f32 %v838_v36, %v837_v44 }
 0x1d9   : > { %v830_v37 = vpop.permute.xlu1 %829 }
 0x1da   : > { %v832_v38 = vsel %vm831_vm5, %v828_v32, %v830_v37  ;;  %v835_v43 = vsel %vm831_vm5, %v830_v37, %v824_v31 }
 0x1db   : > { %v836_v45 = vadd.f32 %v835_v43, %v819_v28  ;;  %v839_v46 = vadd.f32 %v832_v38, %v822_v27 }
 0x1dd   : > { %v840_v5 = vadd.f32 %v839_v46, %v836_v45  ;;  %v841_v48 = vadd.f32 %v837_v44, %v836_v45  ;;  %v843_v49 = vadd.f32 %v839_v46, %v838_v36 }
 0x1df   : > { %v844_v50 = vadd.f32 %v842_v47, %v840_v5  ;;  %v845_v51 = vadd.f32 %v843_v49, %v841_v48  ;;  %v179_v49 = vld [vmem:[#allocation2 + $0x18] sm:$0x11] }
 0x1e1   : > { %v846_v52 = vmul.f32 0.00390625, %v844_v50  ;;  %v847_v53 = vmul.f32 0.00390625, %v845_v51  ;;  %v182_v50 = vld [vmem:[#allocation2 + $0x20] sm:$0x11] }
 0x1e3   : > { %v848_v58 = vperm.slane %v846_v52, 0  ;;  %v849_v59 = vperm.slane %v847_v53, 0  ;;  %v190_v52 = vld [vmem:[#allocation2 + $0x8] sm:$0x11]  ;;  %v193_v53 = vld [vmem:[#allocation2] sm:$0x11] }
 0x1e5   : > { %v7356_v60 = vsub.f32 %v7305_v40, %v849_v59  ;;  %v7359_v61 = vsub.f32 %v7309_v42, %v849_v59  ;;  %v7362_v62 = vsub.f32 %v7315_v54, %v848_v58  ;;  %v7365_v63 = vsub.f32 %v7319_v56, %v848_v58 }
 0x1e6   : > { %v7368_v0 = vsub.f32 %v7303_v39, %v848_v58  ;;  %v7371_v1 = vsub.f32 %v7307_v41, %v848_v58  ;;  %v7374_v2 = vsub.f32 %v7317_v55, %v849_v59  ;;  %v7377_v40 = vsub.f32 %v7321_v57, %v849_v59 }
 0x1e7   : > { %v859_v42 = vmul.f32 %v7356_v60, %v7356_v60  ;;  %v863_v54 = vmul.f32 %v7359_v61, %v7359_v61  ;;  %v860_v56 = vmul.f32 %v7362_v62, %v7362_v62  ;;  %v864_v39 = vmul.f32 %v7365_v63, %v7365_v63 }
 0x1e8   : > { %v858_v41 = vmul.f32 %v7368_v0, %v7368_v0  ;;  %v862_v55 = vmul.f32 %v7371_v1, %v7371_v1  ;;  %v861_v57 = vmul.f32 %v7374_v2, %v7374_v2  ;;  %v865_v3 = vmul.f32 %v7377_v40, %v7377_v40 }
 0x1e9   : > { %v873_v4 = vadd.f32 %v863_v54, %v859_v42  ;;  %v880_v6 = vadd.f32 %v864_v39, %v860_v56  ;;  %v180_v58 = vsel %vm7426_vm14, 0, %v179_v49  ;;  %v183_v59 = vsel %vm7426_vm14, 0, %v182_v50  ;;  %v4888_v42 = vld [vmem:[%s10137_s2 + $0x4e0] sm:$0xf]  ;;  %v6647_v54 = vld [vmem:[%s10137_s2 + $0x4ec] sm:$0xf0] }
 0x1ea   : > { %v866_v7 = vadd.f32 %v862_v55, %v858_v41  ;;  %v887_v8 = vadd.f32 %v865_v3, %v861_v57  ;;  %181 = vst [vmem:[#allocation2 + $0x18] sm:$0x11] %v180_v58  ;;  %v4889_v56 = vor.u32 %v6647_v54, %v4888_v42  ;;  %v5016_v39 = vld [vmem:[%s10137_s2 + $0x5e0] sm:$0xf]  ;;  %v6679_v41 = vld [vmem:[%s10137_s2 + $0x5ec] sm:$0xf0] }
 0x1eb   : > { %v874_v9 = vrot.slane %v873_v4, 4  ;;  %v881_v10 = vrot.slane %v880_v6, 4  ;;  %184 = vst [vmem:[#allocation2 + $0x20] sm:$0x11] %v183_v59  ;;  %v5017_v55 = vor.u32 %v6679_v41, %v5016_v39  ;;  %v5144_v57 = vld [vmem:[%s10137_s2 + $0x6e0] sm:$0xf] }
 0x1ec   : > { %v867_v11 = vrot.slane %v866_v7, 4  ;;  %v888_v12 = vrot.slane %v887_v8, 4  ;;  %v6711_v3 = vld [vmem:[%s10137_s2 + $0x6ec] sm:$0xf0]  ;;  %2020 = vmatpush.bf16.msrb.mxu0 %v4889_v56  ;;  %v5096_v50 = vld [vmem:[%s10137_s2 + $0x680] sm:$0xf] }
 0x1ed   : > { %v875_v13 = vadd.f32 %v874_v9, %v873_v4  ;;  %v882_v14 = vadd.f32 %v881_v10, %v880_v6  ;;  %v191_v4 = vsel %vm189_vm6, 0, %v190_v52  ;;  %v194_v6 = vsel %vm189_vm6, 0, %v193_v53  ;;  %v6743_v9 = vld [vmem:[%s10137_s2 + $0x7ec] sm:$0xf0]  ;;  %2034 = vmatpush.bf16.msrb.mxu1 %v5017_v55  ;;  %v5224_v58 = vld [vmem:[%s10137_s2 + $0x780] sm:$0xf] }
 0x1ee   : > { %v868_v15 = vadd.f32 %v867_v11, %v866_v7  ;;  %v889_v16 = vadd.f32 %v888_v12, %v887_v8  ;;  %v5145_v7 = vor.u32 %v6711_v3, %v5144_v57  ;;  %v5272_v8 = vld [vmem:[%s10137_s2 + $0x7e0] sm:$0xf]  ;;  %192 = vst [vmem:[#allocation2 + $0x8] sm:$0x11] %v191_v4  ;;  %v6667_v49 = vld [vmem:[%s10137_s2 + $0x58c] sm:$0xf0] }
 0x1ef   : > { %v876_v17 = vrot.slane %v875_v13, 2  ;;  %v883_v18 = vrot.slane %v882_v14, 2  ;;  %v5273_v11 = vor.u32 %v6743_v9, %v5272_v8  ;;  %v4872_v12 = vld [vmem:[%s10137_s2 + $0x4c0] sm:$0xf]  ;;  %195 = vst [vmem:[#allocation2] sm:$0x11] %v194_v6 }
 0x1f0   : > { %v869_v20 = vrot.slane %v868_v15, 2  ;;  %v890_v24 = vrot.slane %v889_v16, 2  ;;  %2048 = vmatpush.bf16.msrb.mxu2 %v5145_v7  ;;  %v6699_v53 = vld [vmem:[%s10137_s2 + $0x68c] sm:$0xf0]  ;;  %v4824_v56 = vld [vmem:[%s10137_s2 + $0x460] sm:$0xf] }
 0x1f1   : > { %v877_v21 = vadd.f32 %v876_v17, %v875_v13  ;;  %v884_v22 = vadd.f32 %v883_v18, %v882_v14  ;;  %v6643_v13 = vld [vmem:[%s10137_s2 + $0x4cc] sm:$0xf0]  ;;  %2062 = vmatpush.bf16.msrb.mxu3 %v5273_v11  ;;  %v5097_v42 = vor.u32 %v6699_v53, %v5096_v50  ;;  %v4952_v41 = vld [vmem:[%s10137_s2 + $0x560] sm:$0xf]  ;;  %vm978_vm6 = vsmask.f32 4368 }
 0x1f2   : > { %v870_v23 = vadd.f32 %v869_v20, %v868_v15  ;;  %v891_v31 = vadd.f32 %v890_v24, %v889_v16  ;;  %v4873_v15 = vor.u32 %v6643_v13, %v4872_v12  ;;  %v5000_v16 = vld [vmem:[%s10137_s2 + $0x5c0] sm:$0xf]  ;;  %v6675_v17 = vld [vmem:[%s10137_s2 + $0x5cc] sm:$0xf0] }
 0x1f3   : > { %v878_v25 = vrot.slane %v877_v21, 1  ;;  %v885_v26 = vrot.slane %v884_v22, 1  ;;  %v5001_v18 = vor.u32 %v6675_v17, %v5000_v16  ;;  %v5128_v20 = vld [vmem:[%s10137_s2 + $0x6c0] sm:$0xf]  ;;  %v6739_v24 = vld [vmem:[%s10137_s2 + $0x7cc] sm:$0xf0] }
 0x1f4   : > { %v871_v27 = vrot.slane %v870_v23, 1  ;;  %v892_v32 = vrot.slane %v891_v31, 1  ;;  %2021 = vmatpush.bf16.msrb.mxu0 %v4873_v15  ;;  %v6731_v59 = vld [vmem:[%s10137_s2 + $0x78c] sm:$0xf0]  ;;  %v5080_v4 = vld [vmem:[%s10137_s2 + $0x660] sm:$0xf] }
 0x1f5   : > { %v879_v28 = vadd.f32 %v878_v25, %v877_v21  ;;  %v886_v29 = vadd.f32 %v885_v26, %v884_v22  ;;  %v6707_v21 = vld [vmem:[%s10137_s2 + $0x6cc] sm:$0xf0]  ;;  %2035 = vmatpush.bf16.msrb.mxu1 %v5001_v18  ;;  %v4856_v26 = vld [vmem:[%s10137_s2 + $0x4a0] sm:$0xf]  ;;  %v5225_v54 = vor.u32 %v6731_v59, %v5224_v58 }
 0x1f6   : > { %v872_v30 = vadd.f32 %v871_v27, %v870_v23  ;;  %v893_v33 = vadd.f32 %v892_v32, %v891_v31  ;;  %v5129_v22 = vor.u32 %v6707_v21, %v5128_v20  ;;  %v5256_v23 = vld [vmem:[%s10137_s2 + $0x7c0] sm:$0xf]  ;;  %v6639_v27 = vld [vmem:[%s10137_s2 + $0x4ac] sm:$0xf0] }
 0x1f7   : > { %896 = vrot.lane.b32.xlu0 %v879_v28, %s6907_s27  ;;  %898 = vrot.lane.b32.xlu1 %v886_v29, %s6907_s27  ;;  %v5257_v25 = vor.u32 %v6739_v24, %v5256_v23  ;;  %v5112_v32 = vld [vmem:[%s10137_s2 + $0x6a0] sm:$0xf]  ;;  %v6631_v39 = vld [vmem:[%s10137_s2 + $0x46c] sm:$0xf0] }
 0x1f8   : > { %894 = vrot.lane.b32.xlu2 %v872_v30, %s6907_s27  ;;  %2049 = vmatpush.bf16.msrb.mxu2 %v5129_v22  ;;  %v4825_v57 = vor.u32 %v6631_v39, %v4824_v56  ;;  %v6663_v3 = vld [vmem:[%s10137_s2 + $0x56c] sm:$0xf0]  ;;  %v5208_v9 = vld [vmem:[%s10137_s2 + $0x760] sm:$0xf] }
 0x1f9   : > { %2063 = vmatpush.bf16.msrb.mxu3 %v5257_v25  ;;  %v6695_v6 = vld [vmem:[%s10137_s2 + $0x66c] sm:$0xf0]  ;;  %v4953_v7 = vor.u32 %v6663_v3, %v4952_v41  ;;  %v4808_v13 = vld [vmem:[%s10137_s2 + $0x440] sm:$0xf] }
 0x1fa   : > { %v5081_v8 = vor.u32 %v6695_v6, %v5080_v4  ;;  %v6727_v11 = vld [vmem:[%s10137_s2 + $0x76c] sm:$0xf0]  ;;  %v4936_v16 = vld [vmem:[%s10137_s2 + $0x540] sm:$0xf] }
 0x1fb   : > { %v5209_v12 = vor.u32 %v6727_v11, %v5208_v9  ;;  %v6627_v15 = vld [vmem:[%s10137_s2 + $0x44c] sm:$0xf0]  ;;  %v5064_v20 = vld [vmem:[%s10137_s2 + $0x640] sm:$0xf]  ;;  %v6645_v11 = vld [vmem:[%s10137_s2 + $0x4e4] sm:$0xf] }
 0x1fc   : > { %v4809_v17 = vor.u32 %v6627_v15, %v4808_v13  ;;  %v6659_v18 = vld [vmem:[%s10137_s2 + $0x54c] sm:$0xf0]  ;;  %v5192_v24 = vld [vmem:[%s10137_s2 + $0x740] sm:$0xf] }
 0x1fd   : > { %v6691_v21 = vld [vmem:[%s10137_s2 + $0x64c] sm:$0xf0]  ;;  %v4937_v22 = vor.u32 %v6659_v18, %v4936_v16  ;;  %v5176_v50 = vld [vmem:[%s10137_s2 + $0x720] sm:$0xf]  ;;  %v4890_v16 = vld [vmem:[%s10137_s2 + $0x4f0] sm:$0xf0] }
 0x1fe   : > { %v5065_v23 = vor.u32 %v6691_v21, %v5064_v20  ;;  %v6723_v25 = vld [vmem:[%s10137_s2 + $0x74c] sm:$0xf0]  ;;  %v4904_v39 = vld [vmem:[%s10137_s2 + $0x500] sm:$0xf]  ;;  %v5018_v18 = vld [vmem:[%s10137_s2 + $0x5f0] sm:$0xf0]  ;;  %v4893_v20 = vor.u32 %v6645_v11, %v4890_v16 }
 0x1ff   : > { %v6619_v56 = vld [vmem:[%s10137_s2 + $0x40c] sm:$0xf0] }
 0x200   : > { %900 = vrot.lane.b32.xlu2 %v893_v33, %s6907_s27  ;;  %v6683_v3 = vld [vmem:[%s10137_s2 + $0x60c] sm:$0xf0] }
 0x201   : > { %v6715_v9 = vld [vmem:[%s10137_s2 + $0x70c] sm:$0xf0] }
 0x252   : > { %v895_v34 = vpop.permute.xlu2 %894 }
 0x25a   : > { %v901_v35 = vpop.permute.xlu2 %900 }
 0x25b   : > { %v905_v36 = vsel %vm814_vm4, %v901_v35, %v895_v34 }
 0x25c   : > { %v7401_v37 = vadd.f32 %v905_v36, %v872_v30  ;;  %v6671_v30 = vld [vmem:[%s10137_s2 + $0x5ac] sm:$0xf0] }
 0x25d   : > { %v6735_v36 = vld [vmem:[%s10137_s2 + $0x7ac] sm:$0xf0] }
 0x25e   : > { %910 = vrot.lane.b32.xlu0 %v7401_v37, %s6908_s28 }
 0x269   : > { %v897_v38 = vpop.permute.xlu0 %896  ;;  %v899_v43 = vpop.permute.xlu1 %898 }
 0x26a   : > { %v904_v44 = vsel %vm814_vm4, %v895_v34, %v897_v38  ;;  %v902_v45 = vsel %vm814_vm4, %v899_v43, %v901_v35  ;;  %v903_v46 = vsel %vm814_vm4, %v897_v38, %v899_v43  ;;  %v5240_v34 = vld [vmem:[%s10137_s2 + $0x7a0] sm:$0xf] }
 0x26b   : > { %v7411_v47 = vadd.f32 %v904_v44, %v879_v28  ;;  %v7413_v5 = vadd.f32 %v903_v46, %v886_v29  ;;  %v7415_v48 = vadd.f32 %v902_v45, %v893_v33  ;;  %v4857_v28 = vor.u32 %v6639_v27, %v4856_v26  ;;  %v4984_v29 = vld [vmem:[%s10137_s2 + $0x5a0] sm:$0xf]  ;;  %v6703_v33 = vld [vmem:[%s10137_s2 + $0x6ac] sm:$0xf0] }
 0x26c   : > { %v4985_v31 = vor.u32 %v6671_v30, %v4984_v29  ;;  %v5113_v35 = vor.u32 %v6703_v33, %v5112_v32  ;;  %v5241_v38 = vor.u32 %v6735_v36, %v5240_v34  ;;  %v4840_v43 = vld [vmem:[%s10137_s2 + $0x480] sm:$0xf]  ;;  %v6635_v44 = vld [vmem:[%s10137_s2 + $0x48c] sm:$0xf0]  ;;  %v5193_v26 = vor.u32 %v6723_v25, %v5192_v24  ;;  %v6741_v24 = vld [vmem:[%s10137_s2 + $0x7e4] sm:$0xf] }
 0x26d   : > { %914 = vrot.lane.b32.xlu2 %v7413_v5, %s6908_s28  ;;  %912 = vrot.lane.b32.xlu1 %v7411_v47, %s6908_s28  ;;  %v4841_v45 = vor.u32 %v6635_v44, %v4840_v43  ;;  %v4968_v46 = vld [vmem:[%s10137_s2 + $0x580] sm:$0xf]  ;;  %v6623_v30 = vld [vmem:[%s10137_s2 + $0x42c] sm:$0xf0] }
 0x26e   : > { %916 = vrot.lane.b32.xlu0 %v7415_v48, %s6908_s28  ;;  %2022 = vmatpush.bf16.msrb.mxu0 %v4857_v28  ;;  %v4969_v52 = vor.u32 %v6667_v49, %v4968_v46  ;;  %v4792_v29 = vld [vmem:[%s10137_s2 + $0x420] sm:$0xf]  ;;  %v6655_v36 = vld [vmem:[%s10137_s2 + $0x52c] sm:$0xf0] }
 0x26f   : > { %2036 = vmatpush.bf16.msrb.mxu1 %v4985_v31  ;;  %2050 = vmatpush.bf16.msrb.mxu2 %v5113_v35  ;;  %v4920_v31 = vld [vmem:[%s10137_s2 + $0x520] sm:$0xf]  ;;  %v4793_v35 = vor.u32 %v6623_v30, %v4792_v29  ;;  %v6687_v43 = vld [vmem:[%s10137_s2 + $0x62c] sm:$0xf0]  ;;  %v6641_v29 = vld [vmem:[%s10137_s2 + $0x4c4] sm:$0xf] }
 0x270   : > { %2064 = vmatpush.bf16.msrb.mxu3 %v5241_v38  ;;  %v5048_v38 = vld [vmem:[%s10137_s2 + $0x620] sm:$0xf] }
 0x271   : > { %v5049_v58 = vor.u32 %v6687_v43, %v5048_v38  ;;  %v6705_v43 = vld [vmem:[%s10137_s2 + $0x6c4] sm:$0xf] }
 0x272   : > { %2023 = vmatpush.bf16.msrb.mxu0 %v4841_v45 }
 0x273   : > { %2037 = vmatpush.bf16.msrb.mxu1 %v4969_v52  ;;  %2051 = vmatpush.bf16.msrb.mxu2 %v5097_v42  ;;  %v6719_v52 = vld [vmem:[%s10137_s2 + $0x72c] sm:$0xf0] }
 0x274   : > { %2065 = vmatpush.bf16.msrb.mxu3 %v5225_v54  ;;  %v5177_v42 = vor.u32 %v6719_v52, %v5176_v50  ;;  %v4776_v54 = vld [vmem:[%s10137_s2 + $0x400] sm:$0xf]  ;;  %v6637_v50 = vld [vmem:[%s10137_s2 + $0x4a4] sm:$0xf]  ;;  %v4858_v52 = vld [vmem:[%s10137_s2 + $0x4b0] sm:$0xf0] }
 0x275   : > { %v4777_v4 = vor.u32 %v6619_v56, %v4776_v54 }
 0x276   : > { %2024 = vmatpush.bf16.msrb.mxu0 %v4825_v57  ;;  %v5032_v57 = vld [vmem:[%s10137_s2 + $0x600] sm:$0xf] }
 0x277   : > { %2038 = vmatpush.bf16.msrb.mxu1 %v4953_v7  ;;  %2052 = vmatpush.bf16.msrb.mxu2 %v5081_v8  ;;  %v5033_v7 = vor.u32 %v6683_v3, %v5032_v57  ;;  %v5160_v8 = vld [vmem:[%s10137_s2 + $0x700] sm:$0xf]  ;;  %v6665_v57 = vld [vmem:[%s10137_s2 + $0x584] sm:$0xf] }
 0x278   : > { %2066 = vmatpush.bf16.msrb.mxu3 %v5209_v12  ;;  %v5161_v15 = vor.u32 %v6715_v9, %v5160_v8 }
 0x27a   : > { %2025 = vmatpush.bf16.msrb.mxu0 %v4809_v17  ;;  %v6677_v17 = vld [vmem:[%s10137_s2 + $0x5e4] sm:$0xf] }
 0x27b   : > { %2039 = vmatpush.bf16.msrb.mxu1 %v4937_v22  ;;  %2053 = vmatpush.bf16.msrb.mxu2 %v5065_v23  ;;  %v5021_v21 = vor.u32 %v6677_v17, %v5018_v18  ;;  %v6709_v22 = vld [vmem:[%s10137_s2 + $0x6e4] sm:$0xf]  ;;  %v5146_v23 = vld [vmem:[%s10137_s2 + $0x6f0] sm:$0xf0] }
 0x27c   : > { %2067 = vmatpush.bf16.msrb.mxu3 %v5193_v26  ;;  %v6629_v18 = vld [vmem:[%s10137_s2 + $0x464] sm:$0xf] }
 0x27e   : > { %2026 = vmatpush.bf16.msrb.mxu0 %v4793_v35 }
 0x27f   : > { %2054 = vmatpush.bf16.msrb.mxu2 %v5049_v58  ;;  %v4986_v58 = vld [vmem:[%s10137_s2 + $0x5b0] sm:$0xf0] }
 0x280   : > { %2068 = vmatpush.bf16.msrb.mxu3 %v5177_v42  ;;  %v5114_v42 = vld [vmem:[%s10137_s2 + $0x6b0] sm:$0xf0] }
 0x282   : > { %2027 = vmatpush.bf16.msrb.mxu0 %v4777_v4  ;;  %v4970_v4 = vld [vmem:[%s10137_s2 + $0x590] sm:$0xf0] }
 0x283   : > { %2055 = vmatpush.bf16.msrb.mxu2 %v5033_v7  ;;  %v5098_v7 = vld [vmem:[%s10137_s2 + $0x690] sm:$0xf0]  ;;  %v4973_v9 = vor.u32 %v6665_v57, %v4970_v4  ;;  %v6717_v4 = vld [vmem:[%s10137_s2 + $0x724] sm:$0xf] }
 0x284   : > { %2069 = vmatpush.bf16.msrb.mxu3 %v5161_v15 }
 0x286   : > { %2076 = vmatpush.bf16.msra.mxu0 %v4893_v20  ;;  %v4826_v20 = vld [vmem:[%s10137_s2 + $0x470] sm:$0xf0] }
 0x2c7   : > { %v915_v27 = vpop.permute.xlu2 %914 }
 0x2d0   : > { %v911_v55 = vpop.permute.xlu0 %910 }
 0x2df   : > { %v913_v28 = vpop.permute.xlu1 %912 }
 0x2e0   : > { %v919_v32 = vsel %vm831_vm5, %v913_v28, %v915_v27  ;;  %v920_v33 = vsel %vm831_vm5, %v911_v55, %v913_v28  ;;  %v917_v34 = vpop.permute.xlu0 %916  ;;  %v5274_v28 = vld [vmem:[%s10137_s2 + $0x7f0] sm:$0xf0] }
 0x2e1   : > { %v923_v44 = vadd.f32 %v920_v33, %v7411_v47  ;;  %v924_v45 = vadd.f32 %v919_v32, %v7413_v5  ;;  %v918_v46 = vsel %vm831_vm5, %v915_v27, %v917_v34  ;;  %v921_v49 = vsel %vm831_vm5, %v917_v34, %v911_v55  ;;  %v6651_v55 = vld [vmem:[%s10137_s2 + $0x50c] sm:$0xf0]  ;;  %v6673_v32 = vld [vmem:[%s10137_s2 + $0x5c4] sm:$0xf]  ;;  %v5002_v33 = vld [vmem:[%s10137_s2 + $0x5d0] sm:$0xf0] }
 0x2e2   : > { %v922_v53 = vadd.f32 %v921_v49, %v7401_v37  ;;  %v925_v47 = vadd.f32 %v918_v46, %v7415_v48  ;;  %v4921_v5 = vor.u32 %v6655_v36, %v4920_v31  ;;  %v4905_v6 = vor.u32 %v6651_v55, %v4904_v39  ;;  %v4874_v31 = vld [vmem:[%s10137_s2 + $0x4d0] sm:$0xf0]  ;;  %v6733_v39 = vld [vmem:[%s10137_s2 + $0x7a4] sm:$0xf] }
 0x2e3   : > { %v928_v59 = vadd.f32 %v924_v45, %v923_v44  ;;  %v5149_v27 = vor.u32 %v6709_v22, %v5146_v23  ;;  %v5277_v30 = vor.u32 %v6741_v24, %v5274_v28  ;;  %v4877_v36 = vor.u32 %v6641_v29, %v4874_v31  ;;  %v5258_v46 = vld [vmem:[%s10137_s2 + $0x7d0] sm:$0xf0]  ;;  %v6693_v24 = vld [vmem:[%s10137_s2 + $0x664] sm:$0xf] }
 0x2e4   : > { %v926_v37 = vadd.f32 %v925_v47, %v922_v53  ;;  %v927_v41 = vadd.f32 %v923_v44, %v922_v53  ;;  %v929_v48 = vadd.f32 %v925_v47, %v924_v45  ;;  %2040 = vmatpush.bf16.msrb.mxu1 %v4921_v5  ;;  %v5005_v38 = vor.u32 %v6673_v32, %v5002_v33  ;;  %v5130_v44 = vld [vmem:[%s10137_s2 + $0x6d0] sm:$0xf0]  ;;  %v6737_v45 = vld [vmem:[%s10137_s2 + $0x7c4] sm:$0xf] }
 0x2e5   : > { %2104 = vmatpush.bf16.msra.mxu2 %v5149_v27  ;;  %2118 = vmatpush.bf16.msra.mxu3 %v5277_v30  ;;  %v5133_v49 = vor.u32 %v6705_v43, %v5130_v44  ;;  %v6669_v53 = vld [vmem:[%s10137_s2 + $0x5a4] sm:$0xf]  ;;  %v5261_v47 = vor.u32 %v6737_v45, %v5258_v46  ;;  %v4861_v5 = vor.u32 %v6637_v50, %v4858_v52  ;;  %v4842_v55 = vld [vmem:[%s10137_s2 + $0x490] sm:$0xf0] }
 0x2e6   : > { %v930_v12 = vadd.f32 %v928_v59, %v926_v37  ;;  %v931_v13 = vadd.f32 %v929_v48, %v927_v41  ;;  %2077 = vmatpush.bf16.msra.mxu0 %v4877_v36  ;;  %v6701_v59 = vld [vmem:[%s10137_s2 + $0x6a4] sm:$0xf]  ;;  %v4989_v54 = vor.u32 %v6669_v53, %v4986_v58  ;;  %v5242_v37 = vld [vmem:[%s10137_s2 + $0x7b0] sm:$0xf0] }
 0x2e7   : > { %v5117_v56 = vor.u32 %v6701_v59, %v5114_v42  ;;  %v5245_v41 = vor.u32 %v6733_v39, %v5242_v37  ;;  %v6633_v48 = vld [vmem:[%s10137_s2 + $0x484] sm:$0xf]  ;;  %v4954_v23 = vld [vmem:[%s10137_s2 + $0x570] sm:$0xf0] }
 0x2e8   : > { %v932_v25 = vmul.f32 0.00390625, %v930_v12  ;;  %v933_v26 = vmul.f32 0.00390625, %v931_v13  ;;  %2041 = vmatpush.bf16.msrb.mxu1 %v4905_v6  ;;  %v4845_v3 = vor.u32 %v6633_v48, %v4842_v55  ;;  %v6697_v6 = vld [vmem:[%s10137_s2 + $0x684] sm:$0xf]  ;;  %v5226_v13 = vld [vmem:[%s10137_s2 + $0x790] sm:$0xf0] }
 0x2e9   : > { %2105 = vmatpush.bf16.msra.mxu2 %v5133_v49  ;;  %2119 = vmatpush.bf16.msra.mxu3 %v5261_v47  ;;  %v5101_v11 = vor.u32 %v6697_v6, %v5098_v7  ;;  %v6729_v12 = vld [vmem:[%s10137_s2 + $0x784] sm:$0xf]  ;;  %v5082_v27 = vld [vmem:[%s10137_s2 + $0x670] sm:$0xf0] }
 0x2ea   : > { %v7694_v34 = vadd.f32 1e-05, %v932_v25  ;;  %v7696_v35 = vadd.f32 1e-05, %v933_v26  ;;  %2078 = vmatpush.bf16.msra.mxu0 %v4861_v5  ;;  %v5229_v17 = vor.u32 %v6729_v12, %v5226_v13  ;;  %v4829_v26 = vor.u32 %v6629_v18, %v4826_v20  ;;  %v6725_v28 = vld [vmem:[%s10137_s2 + $0x764] sm:$0xf] }
 0x2eb   : > { %v5085_v31 = vor.u32 %v6693_v24, %v5082_v27  ;;  %v5210_v32 = vld [vmem:[%s10137_s2 + $0x770] sm:$0xf0]  ;;  %v6625_v33 = vld [vmem:[%s10137_s2 + $0x444] sm:$0xf] }
 0x2ec   : > { %2090 = vmatpush.bf16.msra.mxu1 %v5021_v21  ;;  %6891 = vrsqrt.f32 %v7694_v34  ;;  %v6661_v21 = vld [vmem:[%s10137_s2 + $0x564] sm:$0xf]  ;;  %v4810_v36 = vld [vmem:[%s10137_s2 + $0x450] sm:$0xf0]  ;;  %v5213_v43 = vor.u32 %v6725_v28, %v5210_v32  ;;  %vm942_vm13 = vweird.f32 %v7694_v34  ;;  %vm952_vm2 = vweird.f32 %v7696_v35 }
 0x2ed   : > { %6893 = vrsqrt.f32 %v7696_v35  ;;  %2106 = vmatpush.bf16.msra.mxu2 %v5117_v56  ;;  %2120 = vmatpush.bf16.msra.mxu3 %v5245_v41  ;;  %v4957_v30 = vor.u32 %v6661_v21, %v4954_v23  ;;  %v6657_v44 = vld [vmem:[%s10137_s2 + $0x544] sm:$0xf]  ;;  %v4938_v45 = vld [vmem:[%s10137_s2 + $0x550] sm:$0xf0] }
 0x2ee   : > { %2079 = vmatpush.bf16.msra.mxu0 %v4845_v3  ;;  %v6689_v49 = vld [vmem:[%s10137_s2 + $0x644] sm:$0xf]  ;;  %v5066_v50 = vld [vmem:[%s10137_s2 + $0x650] sm:$0xf0] }
 0x2ef   : > { %v6721_v47 = vld [vmem:[%s10137_s2 + $0x744] sm:$0xf]  ;;  %v5194_v5 = vld [vmem:[%s10137_s2 + $0x750] sm:$0xf0]  ;;  %v5069_v42 = vor.u32 %v6689_v49, %v5066_v50 }
 0x2f0   : > { %2091 = vmatpush.bf16.msra.mxu1 %v5005_v38  ;;  %v4794_v56 = vld [vmem:[%s10137_s2 + $0x430] sm:$0xf0]  ;;  %v5197_v37 = vor.u32 %v6721_v47, %v5194_v5  ;;  %v6653_v41 = vld [vmem:[%s10137_s2 + $0x524] sm:$0xf] }
 0x2f1   : > { %2107 = vmatpush.bf16.msra.mxu2 %v5101_v11  ;;  %2121 = vmatpush.bf16.msra.mxu3 %v5229_v17  ;;  %v4922_v48 = vld [vmem:[%s10137_s2 + $0x530] sm:$0xf0]  ;;  %v6685_v55 = vld [vmem:[%s10137_s2 + $0x624] sm:$0xf] }
 0x2f2   : > { %v7754_v8 = vpop.eup %6891  ;;  %2080 = vmatpush.bf16.msra.mxu0 %v4829_v26  ;;  %v5050_v3 = vld [vmem:[%s10137_s2 + $0x630] sm:$0xf0]  ;;  %v6617_v11 = vld [vmem:[%s10137_s2 + $0x404] sm:$0xf] }
 0x2f3   : > { %v7762_v15 = vpop.eup %6893  ;;  %v937_v16 = vmul.f32 %v7754_v8, %v7694_v34  ;;  %vm943_vm11 = vweird.f32 %v7754_v8  ;;  %v4813_v34 = vor.u32 %v6625_v33, %v4810_v36  ;;  %v5178_v6 = vld [vmem:[%s10137_s2 + $0x730] sm:$0xf0]  ;;  %v6649_v13 = vld [vmem:[%s10137_s2 + $0x504] sm:$0xf]  ;;  %v5053_v18 = vor.u32 %v6685_v55, %v5050_v3 }
 0x2f4   : > { %2092 = vmatpush.bf16.msra.mxu1 %v4989_v54  ;;  %v947_v22 = vmul.f32 %v7762_v15, %v7696_v35  ;;  %vm953_vm12 = vweird.f32 %v7762_v15  ;;  %vm7817_vm15 = vmor %vm942_vm13, %vm943_vm11  ;;  %v4941_v35 = vor.u32 %v6657_v44, %v4938_v45  ;;  %v6621_v54 = vld [vmem:[%s10137_s2 + $0x424] sm:$0xf]  ;;  %v4778_v12 = vld [vmem:[%s10137_s2 + $0x410] sm:$0xf0] }
 0x2f5   : > { %v938_v25 = vmul.f32 %v7754_v8, %v937_v16  ;;  %vm7830_vm9 = vmor %vm952_vm2, %vm953_vm12  ;;  %2108 = vmatpush.bf16.msra.mxu2 %v5085_v31  ;;  %2122 = vmatpush.bf16.msra.mxu3 %v5213_v43  ;;  %v4906_v20 = vld [vmem:[%s10137_s2 + $0x510] sm:$0xf0]  ;;  %v4781_v23 = vor.u32 %v6617_v11, %v4778_v12  ;;  %v6681_v28 = vld [vmem:[%s10137_s2 + $0x604] sm:$0xf] }
 0x2f6   : > { %v948_v29 = vmul.f32 %v7762_v15, %v947_v22  ;;  %2081 = vmatpush.bf16.msra.mxu0 %v4813_v34  ;;  %v5181_v22 = vor.u32 %v6717_v4, %v5178_v6  ;;  %v4909_v24 = vor.u32 %v6649_v13, %v4906_v20  ;;  %vm979_vm11 = vmor %vm173_vm7, %vm978_vm6  ;;  %v1036_v55 = vld [vmem:[#allocation2] sm:$0x11] }
 0x2f7   : > { %v939_v38 = vmul.f32 0.5, %v938_v25 }
 0x2f8   : > { %2093 = vmatpush.bf16.msra.mxu1 %v4973_v9  ;;  %v949_v46 = vmul.f32 0.5, %v948_v29  ;;  %v4797_v9 = vor.u32 %v6621_v54, %v4794_v56  ;;  %v1028_v54 = vld [vmem:[#allocation2 + $0x20] sm:$0xff] }
 0x2f9   : > { %v940_v52 = vsub.f32 1.5, %v939_v38  ;;  %2109 = vmatpush.bf16.msra.mxu2 %v5069_v42  ;;  %2123 = vmatpush.bf16.msra.mxu3 %v5197_v37  ;;  %v1025_v42 = vld [vmem:[#allocation2 + $0x18] sm:$0xff] }
 0x2fa   : > { %v950_v58 = vsub.f32 1.5, %v949_v46  ;;  %2082 = vmatpush.bf16.msra.mxu0 %v4797_v9 }
 0x2fb   : > { %v941_v39 = vmul.f32 %v7754_v8, %v940_v52 }
 0x2fc   : > { %2094 = vmatpush.bf16.msra.mxu1 %v4957_v30  ;;  %v951_v57 = vmul.f32 %v7762_v15, %v950_v58 }
 0x2fd   : > { %v945_v7 = vsel %vm7817_vm15, %v7754_v8, %v941_v39  ;;  %v4925_v8 = vor.u32 %v6653_v41, %v4922_v48  ;;  %2110 = vmatpush.bf16.msra.mxu2 %v5053_v18  ;;  %2124 = vmatpush.bf16.msra.mxu3 %v5181_v22  ;;  %v1033_v48 = vld [vmem:[#allocation2 + $0x8] sm:$0x11] }
 0x2fe   : > { %v955_v16 = vsel %vm7830_vm9, %v7762_v15, %v951_v57  ;;  %v956_v17 = vperm.slane %v945_v7, 0  ;;  %2083 = vmatpush.bf16.msra.mxu0 %v4781_v23 }
 0x2ff   : > { %v957_v21 = vperm.slane %v955_v16, 0 }
 0x300   : > { %2095 = vmatpush.bf16.msra.mxu1 %v4941_v35  ;;  %v958_v25 = vmul.f32 %v956_v17, %v7368_v0  ;;  %v960_v26 = vmul.f32 %v956_v17, %v7362_v62  ;;  %v962_v15 = vmul.f32 %v956_v17, %v7371_v1  ;;  %v964_v27 = vmul.f32 %v956_v17, %v7365_v63  ;;  %v5034_v62 = vld [vmem:[%s10137_s2 + $0x610] sm:$0xf0]  ;;  %v6713_v63 = vld [vmem:[%s10137_s2 + $0x704] sm:$0xf] }
 0x301   : > { %v959_v29 = vmul.f32 %v957_v21, %v7356_v60  ;;  %v961_v30 = vmul.f32 %v957_v21, %v7374_v2  ;;  %v963_v31 = vmul.f32 %v957_v21, %v7359_v61  ;;  %v965_v32 = vmul.f32 %v957_v21, %v7377_v40  ;;  %v5162_v0 = vld [vmem:[%s10137_s2 + $0x710] sm:$0xf0] }
 0x302   : > { %v966_v60 = vmax.f32 %v958_v25, 0.0  ;;  %v968_v1 = vmax.f32 %v960_v26, 0.0  ;;  %v970_v2 = vmax.f32 %v962_v15, 0.0  ;;  %v972_v33 = vmax.f32 %v964_v27, 0.0 }
 0x303   : > { %v967_v61 = vmax.f32 %v959_v29, 0.0  ;;  %v969_v40 = vmax.f32 %v961_v30, 0.0  ;;  %v971_v36 = vmax.f32 %v963_v31, 0.0  ;;  %v973_v38 = vmax.f32 %v965_v32, 0.0  ;;  %v7940_v29 = vld [vmem:[%s10137_s2 + $0x4e8] sm:$0xf] }
 0x304   : > { %2096 = vmatpush.bf16.msra.mxu1 %v4925_v8  ;;  %v5037_v43 = vor.u32 %v6681_v28, %v5034_v62  ;;  %v5165_v44 = vor.u32 %v6713_v63, %v5162_v0  ;;  %v6648_v30 = vld [vmem:[%s10137_s2 + $0x4f4] sm:$0xf0]  ;;  %v5024_v62 = vld [vmem:[%s10137_s2 + $0x5e8] sm:$0xf] }
 0x305   : > { %v974_v45 = vpack.c.bf16 %v967_v61, %v966_v60  ;;  %v975_v46 = vpack.c.bf16 %v969_v40, %v968_v1  ;;  %v976_v49 = vpack.c.bf16 %v971_v36, %v970_v2  ;;  %v977_v50 = vpack.c.bf16 %v973_v38, %v972_v33  ;;  %v6680_v63 = vld [vmem:[%s10137_s2 + $0x5f4] sm:$0xf0] }
 0x306   : > { %2111 = vmatpush.bf16.msra.mxu2 %v5037_v43  ;;  %2125 = vmatpush.bf16.msra.mxu3 %v5165_v44  ;;  %v4897_v38 = vor.u32 %v6648_v30, %v7940_v29  ;;  %v5025_v43 = vor.u32 %v6680_v63, %v5024_v62  ;;  %v6740_v62 = vld [vmem:[%s10137_s2 + $0x7d4] sm:$0xf0] }
 0x307   : > { %v981_v52 = vshrl.u32 %v974_v45, 16  ;;  %v988_v53 = vshrl.u32 %v975_v46, 16  ;;  %v996_v34 = vshrl.u32 %v976_v49, 16  ;;  %v1005_v47 = vshrl.u32 %v977_v50, 16 }
 0x308   : > { %2097 = vmatpush.bf16.msra.mxu1 %v4909_v24  ;;  %v984_v58 = vshll.u32 %v974_v45, 16  ;;  %v991_v35 = vshll.u32 %v975_v46, 16  ;;  %v999_v39 = vshll.u32 %v976_v49, 16  ;;  %v1008_v41 = vshll.u32 %v977_v50, 16 }
 0x309   : > { %v983_v5 = vrot.slane %v981_v52, 7  ;;  %v990_v59 = vrot.slane %v988_v53, 7  ;;  %v998_v56 = vrot.slane %v996_v34, 7  ;;  %v1007_v37 = vrot.slane %v1005_v47, 7  ;;  %v5152_v47 = vld [vmem:[%s10137_s2 + $0x6e8] sm:$0xf] }
 0x30b   : > { %v986_v57 = vor.u32 %v984_v58, %v983_v5  ;;  %v993_v3 = vor.u32 %v991_v35, %v990_v59  ;;  %v994_v4 = vrot.slane %v983_v5, 4  ;;  %v1003_v6 = vrot.slane %v990_v59, 4  ;;  %v6712_v5 = vld [vmem:[%s10137_s2 + $0x6f4] sm:$0xf0] }
 0x30c   : > { %v1001_v7 = vor.u32 %v999_v39, %v998_v56  ;;  %v1010_v9 = vor.u32 %v1008_v41, %v1007_v37  ;;  %v1012_v11 = vrot.slane %v998_v56, 4  ;;  %v1013_v12 = vrot.slane %v1007_v37, 4 }
 0x30d   : > { %v1026_v13 = vsel %vm1024_vm0, %v986_v57, %v1025_v42  ;;  %v1029_v16 = vsel %vm1024_vm0, %v993_v3, %v1028_v54  ;;  %v5280_v54 = vld [vmem:[%s10137_s2 + $0x7e8] sm:$0xf] }
 0x30e   : > { %v7909_v17 = vsel %vm979_vm11, %v994_v4, %v1001_v7  ;;  %v7911_v8 = vsel %vm979_vm11, %v1003_v6, %v1010_v9  ;;  %1027 = vst [vmem:[#allocation2 + $0x18] sm:$0xff] %v1026_v13  ;;  %v1034_v18 = vsel %vm7426_vm14, %v1012_v11, %v1033_v48  ;;  %v1037_v20 = vsel %vm7426_vm14, %v1013_v12, %v1036_v55  ;;  %v6744_v48 = vld [vmem:[%s10137_s2 + $0x7f4] sm:$0xf0]  ;;  %v4880_v12 = vld [vmem:[%s10137_s2 + $0x4c8] sm:$0xf] }
 0x30f   : > { %1030 = vst [vmem:[#allocation2 + $0x20] sm:$0xff] %v1029_v16  ;;  %v1308_v21 = vunpack.c.l.b16 %v1026_v13  ;;  %v1312_v22 = vunpack.c.l.b16 %v7909_v17  ;;  %v1309_v14 = vunpack.c.h.b16 %v1026_v13  ;;  %v1313_v10 = vunpack.c.h.b16 %v7909_v17  ;;  %v6644_v13 = vld [vmem:[%s10137_s2 + $0x4d4] sm:$0xf0] }
 0x310   : > { %v1310_v23 = vunpack.c.l.b16 %v1029_v16  ;;  %v1314_v24 = vunpack.c.l.b16 %v7911_v8  ;;  %v1311_v25 = vunpack.c.h.b16 %v1029_v16  ;;  %v1315_v26 = vunpack.c.h.b16 %v7911_v8  ;;  %1035 = vst [vmem:[#allocation2 + $0x8] sm:$0x11] %v1034_v18  ;;  %v4816_v8 = vld [vmem:[%s10137_s2 + $0x448] sm:$0xf] }
 0x311   : > { %v7923_v15 = vpack.c.b16 %v1312_v22, %v1308_v21  ;;  %v7927_v51 = vpack.c.b16 %v1313_v10, %v1309_v14  ;;  %1038 = vst [vmem:[#allocation2] sm:$0x11] %v1037_v20  ;;  %v5153_v20 = vor.u32 %v6712_v5, %v5152_v47  ;;  %v5281_v21 = vor.u32 %v6744_v48, %v5280_v54  ;;  %v5008_v14 = vld [vmem:[%s10137_s2 + $0x5c8] sm:$0xf] }
 0x312   : > { %v7931_v27 = vpack.c.b16 %v1314_v24, %v1310_v23  ;;  %v7935_v28 = vpack.c.b16 %v1315_v26, %v1311_v25  ;;  %v6676_v23 = vld [vmem:[%s10137_s2 + $0x5d4] sm:$0xf0]  ;;  %v5136_v25 = vld [vmem:[%s10137_s2 + $0x6c8] sm:$0xf] }
 0x313   : > { %v1331_v31 = vshll.u32 %v7923_v15, 16  ;;  %v1343_v32 = vshll.u32 %v7927_v51, 16  ;;  %v1329_v58 = vshrl.u32 %v7923_v15, 16  ;;  %v1341_v35 = vshrl.u32 %v7927_v51, 16  ;;  %v4848_v47 = vld [vmem:[%s10137_s2 + $0x488] sm:$0xf] }
 0x314   : > { %v1355_v60 = vshll.u32 %v7931_v27, 16  ;;  %v1367_v1 = vshll.u32 %v7935_v28, 16  ;;  %v1353_v56 = vshrl.u32 %v7931_v27, 16  ;;  %v1365_v37 = vshrl.u32 %v7935_v28, 16  ;;  %v5232_v48 = vld [vmem:[%s10137_s2 + $0x788] sm:$0xf] }
 0x315   : > { %v1333_v45 = vrot.slane %v1331_v31, 1  ;;  %v1345_v49 = vrot.slane %v1343_v32, 1  ;;  %v6708_v31 = vld [vmem:[%s10137_s2 + $0x6d4] sm:$0xf0]  ;;  %v5264_v32 = vld [vmem:[%s10137_s2 + $0x7c8] sm:$0xf] }
 0x316   : > { %v1357_v52 = vrot.slane %v1355_v60, 1  ;;  %v1369_v34 = vrot.slane %v1367_v1, 1  ;;  %v3112_v63 = vld [vmem:[#allocation2 + $0x18] sm:$0xee]  ;;  %v5009_v60 = vor.u32 %v6676_v23, %v5008_v14  ;;  %v4864_v1 = vld [vmem:[%s10137_s2 + $0x4a8] sm:$0xf] }
 0x317   : > { %v1171_v0 = vld [vmem:[#allocation2 + $0x8] sm:$0x11]  ;;  %v1334_v55 = vor.u32 %v1333_v45, %v1329_v58  ;;  %v1346_v3 = vor.u32 %v1345_v49, %v1341_v35  ;;  %v6704_v49 = vld [vmem:[%s10137_s2 + $0x6b4] sm:$0xf0] }
 0x318   : > { %v1316_v2 = vunpack.c.l.b16 %v1171_v0  ;;  %v1317_v33 = vunpack.c.h.b16 %v1171_v0  ;;  %v1172_v61 = vld [vmem:[#allocation2] sm:$0x11]  ;;  %v1358_v6 = vor.u32 %v1357_v52, %v1353_v56  ;;  %v1370_v9 = vor.u32 %v1369_v34, %v1365_v37  ;;  %v5120_v45 = vld [vmem:[%s10137_s2 + $0x6a8] sm:$0xf]  ;;  %v6736_v34 = vld [vmem:[%s10137_s2 + $0x7b4] sm:$0xf0] }
 0x319   : > { %v1318_v40 = vunpack.c.l.b16 %v1172_v61  ;;  %v1319_v36 = vunpack.c.h.b16 %v1172_v61  ;;  %v4881_v0 = vor.u32 %v6644_v13, %v4880_v12  ;;  %v3245_v61 = vunpack.c.l.b16 %v3112_v63  ;;  %v5248_v52 = vld [vmem:[%s10137_s2 + $0x7a8] sm:$0xf]  ;;  %v6636_v58 = vld [vmem:[%s10137_s2 + $0x494] sm:$0xf0] }
 0x31a   : > { %v7956_v44 = vpack.c.b16 %v1316_v2, %v1316_v2  ;;  %v7958_v46 = vpack.c.b16 %v1317_v33, %v1317_v33  ;;  %v6640_v2 = vld [vmem:[%s10137_s2 + $0x4b4] sm:$0xf0]  ;;  %v4992_v33 = vld [vmem:[%s10137_s2 + $0x5a8] sm:$0xf]  ;;  %v5121_v17 = vor.u32 %v6704_v49, %v5120_v45 }
 0x31b   : > { %v7960_v50 = vpack.c.b16 %v1318_v40, %v1318_v40  ;;  %v7962_v53 = vpack.c.b16 %v1319_v36, %v1319_v36  ;;  %v3246_v40 = vunpack.c.h.b16 %v3112_v63  ;;  %v5137_v36 = vor.u32 %v6708_v31, %v5136_v25  ;;  %v6668_v35 = vld [vmem:[%s10137_s2 + $0x594] sm:$0xf0]  ;;  %v5088_v25 = vld [vmem:[%s10137_s2 + $0x668] sm:$0xf] }
 0x31c   : > { %v1336_v59 = vshll.u32 %v7956_v44, 16  ;;  %v1348_v42 = vshll.u32 %v7958_v46, 16  ;;  %v3249_v5 = vpack.c.b16 %v1312_v22, %v3245_v61  ;;  %v4865_v54 = vor.u32 %v6640_v2, %v4864_v1  ;;  %v5104_v22 = vld [vmem:[%s10137_s2 + $0x688] sm:$0xf]  ;;  %v6632_v13 = vld [vmem:[%s10137_s2 + $0x474] sm:$0xf0] }
 0x31d   : > { %v1360_v39 = vshll.u32 %v7960_v50, 16  ;;  %v1372_v41 = vshll.u32 %v7962_v53, 16  ;;  %v3254_v37 = vrot.slane %v7956_v44, 1  ;;  %v6696_v31 = vld [vmem:[%s10137_s2 + $0x674] sm:$0xf0] }
 0x31e   : > { %v1338_v57 = vrot.slane %v1336_v59, 1  ;;  %v1350_v4 = vrot.slane %v1348_v42, 1  ;;  %v4976_v59 = vld [vmem:[%s10137_s2 + $0x588] sm:$0xf]  ;;  %v3250_v42 = vpack.c.b16 %v1313_v10, %v3246_v40  ;;  %v5249_v10 = vor.u32 %v6736_v34, %v5248_v52  ;;  %v6728_v1 = vld [vmem:[%s10137_s2 + $0x774] sm:$0xf0] }
 0x31f   : > { %v1362_v7 = vrot.slane %v1360_v39, 1  ;;  %v1374_v11 = vrot.slane %v1372_v41, 1  ;;  %v6700_v39 = vld [vmem:[%s10137_s2 + $0x694] sm:$0xf0]  ;;  %v3257_v41 = vrot.slane %v7958_v46, 1 }
 0x320   : > { %v7991_v16 = vsel %vm244_vm1, %v1334_v55, %v1338_v57  ;;  %v7994_v18 = vsel %vm244_vm1, %v1346_v3, %v1350_v4  ;;  %v6732_v55 = vld [vmem:[%s10137_s2 + $0x794] sm:$0xf0]  ;;  %v4849_v57 = vor.u32 %v6636_v58, %v4848_v47  ;;  %v3253_v3 = vrot.slane %v3249_v5, 1  ;;  %v4832_v46 = vld [vmem:[%s10137_s2 + $0x468] sm:$0xf] }
 0x321   : > { %2028 = vmatmul.bf16.vlgmr.msrb.gmra.mxu0 %v7991_v16  ;;  %2042 = vmatmul.bf16.vlgmr.msrb.gmra.mxu1 %v7994_v18  ;;  %v8008_v29 = vsel %vm244_vm1, %v1358_v6, %v1362_v7  ;;  %v8011_v30 = vsel %vm244_vm1, %v1370_v9, %v1374_v11  ;;  %v3256_v4 = vrot.slane %v3250_v42, 1  ;;  %v3113_v6 = vld [vmem:[#allocation2 + $0x20] sm:$0xee]  ;;  %v4977_v7 = vor.u32 %v6668_v35, %v4976_v59  ;;  %v4944_v40 = vld [vmem:[%s10137_s2 + $0x548] sm:$0xf] }
 0x322   : > { %2056 = vmatmul.bf16.vlgmr.msrb.gmra.mxu2 %v8008_v29  ;;  %2070 = vmatmul.bf16.vlgmr.msrb.gmra.mxu3 %v8011_v30  ;;  %v5105_v44 = vor.u32 %v6700_v39, %v5104_v22  ;;  %v3247_v9 = vunpack.c.l.b16 %v3113_v6  ;;  %v3248_v11 = vunpack.c.h.b16 %v3113_v6  ;;  %v5233_v12 = vor.u32 %v6732_v55, %v5232_v48  ;;  %v6692_v49 = vld [vmem:[%s10137_s2 + $0x654] sm:$0xf0]  ;;  %v5200_v52 = vld [vmem:[%s10137_s2 + $0x748] sm:$0xf] }
 0x323   : > { %2132 = vmatpush.bf16.msrb.mxu0 %v4897_v38  ;;  %2146 = vmatpush.bf16.msrb.mxu1 %v5025_v43  ;;  %v5265_v38 = vor.u32 %v6740_v62, %v5264_v32  ;;  %v6672_v43 = vld [vmem:[%s10137_s2 + $0x5b4] sm:$0xf0]  ;;  %v8091_v14 = vsel %vm603_vm3, %v3253_v3, %v3254_v37  ;;  %v8094_v23 = vsel %vm603_vm3, %v3256_v4, %v3257_v41  ;;  %v3260_v62 = vrot.slane %v7960_v50, 1  ;;  %v4800_v58 = vld [vmem:[%s10137_s2 + $0x428] sm:$0xf] }
 0x324   : > { %2160 = vmatpush.bf16.msrb.mxu2 %v5153_v20  ;;  %2174 = vmatpush.bf16.msrb.mxu3 %v5281_v21  ;;  %v4993_v56 = vor.u32 %v6672_v43, %v4992_v33  ;;  %v4960_v20 = vld [vmem:[%s10137_s2 + $0x568] sm:$0xf]  ;;  %v6664_v21 = vld [vmem:[%s10137_s2 + $0x574] sm:$0xf0]  ;;  %v3251_v32 = vpack.c.b16 %v1314_v24, %v3247_v9  ;;  %v3252_v63 = vpack.c.b16 %v1315_v26, %v3248_v11  ;;  %v6646_v11 = vld [vmem:[%s10137_s2 + $0x4ec] sm:$0xf] }
 0x325   : > { %v4833_v24 = vor.u32 %v6632_v13, %v4832_v46  ;;  %v4961_v61 = vor.u32 %v6664_v21, %v4960_v20  ;;  %v5089_v50 = vor.u32 %v6696_v31, %v5088_v25  ;;  %v6628_v26 = vld [vmem:[%s10137_s2 + $0x454] sm:$0xf0]  ;;  %v5056_v22 = vld [vmem:[%s10137_s2 + $0x628] sm:$0xf]  ;;  %v6678_v13 = vld [vmem:[%s10137_s2 + $0x5ec] sm:$0xf] }
 0x326   : > { %v3259_v2 = vrot.slane %v3251_v32, 1  ;;  %v3262_v33 = vrot.slane %v3252_v63, 1  ;;  %v6724_v34 = vld [vmem:[%s10137_s2 + $0x754] sm:$0xf0]  ;;  %v4817_v47 = vor.u32 %v6628_v26, %v4816_v8  ;;  %v5184_v37 = vld [vmem:[%s10137_s2 + $0x728] sm:$0xf] }
 0x327   : > { %2133 = vmatpush.bf16.msrb.mxu0 %v4881_v0  ;;  %2147 = vmatpush.bf16.msrb.mxu1 %v5009_v60  ;;  %v3263_v0 = vrot.slane %v7962_v53, 1  ;;  %v5216_v60 = vld [vmem:[%s10137_s2 + $0x768] sm:$0xf]  ;;  %v6624_v59 = vld [vmem:[%s10137_s2 + $0x434] sm:$0xf0]  ;;  %v5201_v42 = vor.u32 %v6724_v34, %v5200_v52 }
 0x328   : > { %2161 = vmatpush.bf16.msrb.mxu2 %v5137_v36  ;;  %2175 = vmatpush.bf16.msrb.mxu3 %v5265_v38  ;;  %v5217_v53 = vor.u32 %v6728_v1, %v5216_v60  ;;  %v6660_v36 = vld [vmem:[%s10137_s2 + $0x554] sm:$0xf0]  ;;  %v5072_v38 = vld [vmem:[%s10137_s2 + $0x648] sm:$0xf]  ;;  %v8130_v43 = vsel %vm603_vm3, %v3259_v2, %v3260_v62  ;;  %v5026_v20 = vld [vmem:[%s10137_s2 + $0x5f8] sm:$0xf0] }
 0x329   : > { %v8133_v45 = vsel %vm603_vm3, %v3262_v33, %v3263_v0  ;;  %v4945_v5 = vor.u32 %v6660_v36, %v4944_v40  ;;  %v5073_v35 = vor.u32 %v6692_v49, %v5072_v38  ;;  %v6688_v39 = vld [vmem:[%s10137_s2 + $0x634] sm:$0xf0]  ;;  %v5168_v46 = vld [vmem:[%s10137_s2 + $0x708] sm:$0xf]  ;;  %v6710_v21 = vld [vmem:[%s10137_s2 + $0x6ec] sm:$0xf]  ;;  %v5029_v2 = vor.u32 %v6678_v13, %v5026_v20 }
 0x32a   : > { %v6720_v41 = vld [vmem:[%s10137_s2 + $0x734] sm:$0xf0]  ;;  %v5057_v4 = vor.u32 %v6688_v39, %v5056_v22  ;;  %v5154_v32 = vld [vmem:[%s10137_s2 + $0x6f8] sm:$0xf0]  ;;  %v6742_v62 = vld [vmem:[%s10137_s2 + $0x7ec] sm:$0xf] }
 0x32b   : > { %2134 = vmatpush.bf16.msrb.mxu0 %v4865_v54  ;;  %2148 = vmatpush.bf16.msrb.mxu1 %v4993_v56  ;;  %v4928_v54 = vld [vmem:[%s10137_s2 + $0x528] sm:$0xf]  ;;  %v6656_v56 = vld [vmem:[%s10137_s2 + $0x534] sm:$0xf0]  ;;  %v5185_v6 = vor.u32 %v6720_v41, %v5184_v37  ;;  %v5282_v63 = vld [vmem:[%s10137_s2 + $0x7f8] sm:$0xf0] }
 0x32c   : > { %2162 = vmatpush.bf16.msrb.mxu2 %v5121_v17  ;;  %2176 = vmatpush.bf16.msrb.mxu3 %v5249_v10  ;;  %v4784_v17 = vld [vmem:[%s10137_s2 + $0x408] sm:$0xf]  ;;  %v4801_v10 = vor.u32 %v6624_v59, %v4800_v58  ;;  %v4929_v48 = vor.u32 %v6656_v56, %v4928_v54  ;;  %v6620_v55 = vld [vmem:[%s10137_s2 + $0x414] sm:$0xf0]  ;;  %v6642_v33 = vld [vmem:[%s10137_s2 + $0x4cc] sm:$0xf] }
 0x32d   : > { %v6652_v3 = vld [vmem:[%s10137_s2 + $0x514] sm:$0xf0]  ;;  %v4785_v25 = vor.u32 %v6620_v55, %v4784_v17  ;;  %v6674_v8 = vld [vmem:[%s10137_s2 + $0x5cc] sm:$0xf]  ;;  %v5010_v26 = vld [vmem:[%s10137_s2 + $0x5d8] sm:$0xf0] }
 0x32e   : > { %v6716_v9 = vld [vmem:[%s10137_s2 + $0x714] sm:$0xf0]  ;;  %v5138_v40 = vld [vmem:[%s10137_s2 + $0x6d8] sm:$0xf0]  ;;  %v6738_v36 = vld [vmem:[%s10137_s2 + $0x7cc] sm:$0xf]  ;;  %v5013_v52 = vor.u32 %v6674_v8, %v5010_v26 }
 0x32f   : > { %2135 = vmatpush.bf16.msrb.mxu0 %v4849_v57  ;;  %2149 = vmatpush.bf16.msrb.mxu1 %v4977_v7  ;;  %v4912_v57 = vld [vmem:[%s10137_s2 + $0x508] sm:$0xf]  ;;  %v5169_v60 = vor.u32 %v6716_v9, %v5168_v46  ;;  %v5266_v38 = vld [vmem:[%s10137_s2 + $0x7d8] sm:$0xf0]  ;;  %v6638_v34 = vld [vmem:[%s10137_s2 + $0x4ac] sm:$0xf] }
 0x330   : > { %2163 = vmatpush.bf16.msrb.mxu2 %v5105_v44  ;;  %2177 = vmatpush.bf16.msrb.mxu3 %v5233_v12  ;;  %v5040_v7 = vld [vmem:[%s10137_s2 + $0x608] sm:$0xf]  ;;  %v6684_v44 = vld [vmem:[%s10137_s2 + $0x614] sm:$0xf0]  ;;  %v4898_v12 = vld [vmem:[%s10137_s2 + $0x4f8] sm:$0xf0]  ;;  %v4913_v31 = vor.u32 %v6652_v3, %v4912_v57  ;;  %v5269_v58 = vor.u32 %v6738_v36, %v5266_v38 }
 0x331   : > { %2084 = vmatmul.bf16.vlgmr.msra.gmra.mxu0 %v7991_v16  ;;  %2098 = vmatmul.bf16.vlgmr.msra.gmra.mxu1 %v7994_v18  ;;  %v5041_v0 = vor.u32 %v6684_v44, %v5040_v7  ;;  %v4901_v1 = vor.u32 %v6646_v11, %v4898_v12  ;;  %v6670_v59 = vld [vmem:[%s10137_s2 + $0x5ac] sm:$0xf]  ;;  %v5122_v54 = vld [vmem:[%s10137_s2 + $0x6b8] sm:$0xf0] }
 0x332   : > { %2112 = vmatmul.bf16.vlgmr.msra.gmra.mxu2 %v8008_v29  ;;  %2126 = vmatmul.bf16.vlgmr.msra.gmra.mxu3 %v8011_v30  ;;  %v6734_v56 = vld [vmem:[%s10137_s2 + $0x7ac] sm:$0xf]  ;;  %v5250_v22 = vld [vmem:[%s10137_s2 + $0x7b8] sm:$0xf0] }
 0x333   : > { %2136 = vmatpush.bf16.msrb.mxu0 %v4833_v24  ;;  %2150 = vmatpush.bf16.msrb.mxu1 %v4961_v61  ;;  %v4882_v24 = vld [vmem:[%s10137_s2 + $0x4d8] sm:$0xf0]  ;;  %v5157_v61 = vor.u32 %v6710_v21, %v5154_v32  ;;  %v6634_v41 = vld [vmem:[%s10137_s2 + $0x48c] sm:$0xf] }
 0x334   : > { %2164 = vmatpush.bf16.msrb.mxu2 %v5089_v50  ;;  %2178 = vmatpush.bf16.msrb.mxu3 %v5217_v53  ;;  %v5285_v50 = vor.u32 %v6742_v62, %v5282_v63  ;;  %v6706_v53 = vld [vmem:[%s10137_s2 + $0x6cc] sm:$0xf]  ;;  %v4885_v49 = vor.u32 %v6642_v33, %v4882_v24  ;;  %v4850_v17 = vld [vmem:[%s10137_s2 + $0x498] sm:$0xf0] }
 0x335   : > { %v6666_v55 = vld [vmem:[%s10137_s2 + $0x58c] sm:$0xf]  ;;  %v4978_v57 = vld [vmem:[%s10137_s2 + $0x598] sm:$0xf0]  ;;  %v4853_v44 = vor.u32 %v6634_v41, %v4850_v17 }
 0x336   : > { %v6698_v3 = vld [vmem:[%s10137_s2 + $0x68c] sm:$0xf]  ;;  %v5234_v7 = vld [vmem:[%s10137_s2 + $0x798] sm:$0xf0]  ;;  %v4981_v46 = vor.u32 %v6666_v55, %v4978_v57 }
 0x337   : > { %2137 = vmatpush.bf16.msrb.mxu0 %v4817_v47  ;;  %2151 = vmatpush.bf16.msrb.mxu1 %v4945_v5  ;;  %v4866_v47 = vld [vmem:[%s10137_s2 + $0x4b8] sm:$0xf0]  ;;  %v5141_v5 = vor.u32 %v6706_v53, %v5138_v40  ;;  %v6630_v9 = vld [vmem:[%s10137_s2 + $0x46c] sm:$0xf] }
 0x338   : > { %2165 = vmatpush.bf16.msrb.mxu2 %v5073_v35  ;;  %2179 = vmatpush.bf16.msrb.mxu3 %v5201_v42  ;;  %v4994_v35 = vld [vmem:[%s10137_s2 + $0x5b8] sm:$0xf0]  ;;  %v6702_v42 = vld [vmem:[%s10137_s2 + $0x6ac] sm:$0xf]  ;;  %v4869_v39 = vor.u32 %v6638_v34, %v4866_v47 }
 0x339   : > { %v4997_v37 = vor.u32 %v6670_v59, %v4994_v35  ;;  %v4834_v11 = vld [vmem:[%s10137_s2 + $0x478] sm:$0xf0]  ;;  %v6662_v20 = vld [vmem:[%s10137_s2 + $0x56c] sm:$0xf] }
 0x33a   : > { %v4962_v21 = vld [vmem:[%s10137_s2 + $0x578] sm:$0xf0]  ;;  %v6726_v32 = vld [vmem:[%s10137_s2 + $0x76c] sm:$0xf]  ;;  %v4837_v63 = vor.u32 %v6630_v9, %v4834_v11 }
 0x33b   : > { %2138 = vmatpush.bf16.msrb.mxu0 %v4801_v10  ;;  %2152 = vmatpush.bf16.msrb.mxu1 %v4929_v48  ;;  %v5125_v10 = vor.u32 %v6702_v42, %v5122_v54  ;;  %v5253_v48 = vor.u32 %v6734_v56, %v5250_v22  ;;  %v5218_v62 = vld [vmem:[%s10137_s2 + $0x778] sm:$0xf0]  ;;  %v6658_v24 = vld [vmem:[%s10137_s2 + $0x54c] sm:$0xf] }
 0x33c   : > { %2166 = vmatpush.bf16.msrb.mxu2 %v5057_v4  ;;  %2180 = vmatpush.bf16.msrb.mxu3 %v5185_v6  ;;  %v5106_v4 = vld [vmem:[%s10137_s2 + $0x698] sm:$0xf0]  ;;  %v6730_v6 = vld [vmem:[%s10137_s2 + $0x78c] sm:$0xf]  ;;  %v5221_v33 = vor.u32 %v6726_v32, %v5218_v62  ;;  %v5384_v62 = vld [vmem:[%s10137_s2 + $0xc0] sm:$0xf] }
 0x33d   : > { %v5109_v12 = vor.u32 %v6698_v3, %v5106_v4  ;;  %v5237_v13 = vor.u32 %v6730_v6, %v5234_v7  ;;  %v5074_v8 = vld [vmem:[%s10137_s2 + $0x658] sm:$0xf0]  ;;  %v6722_v26 = vld [vmem:[%s10137_s2 + $0x74c] sm:$0xf]  ;;  %v5400_v4 = vld [vmem:[%s10137_s2 + $0xe0] sm:$0xf] }
 0x33e   : > { %v5202_v53 = vld [vmem:[%s10137_s2 + $0x758] sm:$0xf0]  ;;  %v6622_v38 = vld [vmem:[%s10137_s2 + $0x42c] sm:$0xf]  ;;  %v6519_v6 = vld [vmem:[%s10137_s2 + $0xec] sm:$0xf0] }
 0x33f   : > { %2139 = vmatpush.bf16.msrb.mxu0 %v4785_v25  ;;  %2153 = vmatpush.bf16.msrb.mxu1 %v4913_v31  ;;  %v6694_v25 = vld [vmem:[%s10137_s2 + $0x66c] sm:$0xf]  ;;  %v5090_v31 = vld [vmem:[%s10137_s2 + $0x678] sm:$0xf0]  ;;  %v5205_v34 = vor.u32 %v6722_v26, %v5202_v53  ;;  %v5528_v7 = vld [vmem:[%s10137_s2 + $0x1e0] sm:$0xf] }
 0x340   : > { %2167 = vmatpush.bf16.msrb.mxu2 %v5041_v0  ;;  %2181 = vmatpush.bf16.msrb.mxu3 %v5169_v60  ;;  %v4965_v0 = vor.u32 %v6662_v20, %v4962_v21  ;;  %v6626_v60 = vld [vmem:[%s10137_s2 + $0x44c] sm:$0xf]  ;;  %v5058_v59 = vld [vmem:[%s10137_s2 + $0x638] sm:$0xf0]  ;;  %v6615_v20 = vld [vmem:[%s10137_s2 + $0x3ec] sm:$0xf0] }
 0x341   : > { %v6654_v47 = vld [vmem:[%s10137_s2 + $0x52c] sm:$0xf]  ;;  %v5186_v42 = vld [vmem:[%s10137_s2 + $0x738] sm:$0xf0]  ;;  %v5368_v53 = vld [vmem:[%s10137_s2 + $0xa0] sm:$0xf] }
 0x342   : > { %2140 = vmatmul.bf16.vlgmr.msrb.gmra.mxu0 %v7991_v16  ;;  %2154 = vmatmul.bf16.vlgmr.msrb.gmra.mxu1 %v7994_v18  ;;  %v6718_v35 = vld [vmem:[%s10137_s2 + $0x72c] sm:$0xf]  ;;  %v4914_v41 = vld [vmem:[%s10137_s2 + $0x518] sm:$0xf0] }
 0x343   : > { %2188 = vmatpush.bf16.msra.mxu0 %v4901_v1  ;;  %2202 = vmatpush.bf16.msra.mxu1 %v5029_v2  ;;  %v4818_v1 = vld [vmem:[%s10137_s2 + $0x458] sm:$0xf0]  ;;  %v5093_v2 = vor.u32 %v6694_v25, %v5090_v31  ;;  %v6618_v54 = vld [vmem:[%s10137_s2 + $0x40c] sm:$0xf]  ;;  %v5401_v31 = vor.u32 %v6519_v6, %v5400_v4  ;;  %v6535_v4 = vld [vmem:[%s10137_s2 + $0x16c] sm:$0xf0] }
 0x344   : > { %2216 = vmatpush.bf16.msra.mxu2 %v5157_v61  ;;  %2230 = vmatpush.bf16.msra.mxu3 %v5285_v50  ;;  %v4946_v61 = vld [vmem:[%s10137_s2 + $0x558] sm:$0xf0]  ;;  %v6690_v50 = vld [vmem:[%s10137_s2 + $0x64c] sm:$0xf]  ;;  %v4821_v40 = vor.u32 %v6626_v60, %v4818_v1  ;;  %v5512_v1 = vld [vmem:[%s10137_s2 + $0x1c0] sm:$0xf] }
 0x345   : > { %2168 = vmatmul.bf16.vlgmr.msrb.gmra.mxu2 %v8008_v29  ;;  %2182 = vmatmul.bf16.vlgmr.msrb.gmra.mxu3 %v8011_v30  ;;  %v4949_v36 = vor.u32 %v6658_v24, %v4946_v61  ;;  %v5042_v55 = vld [vmem:[%s10137_s2 + $0x618] sm:$0xf0]  ;;  %v6714_v57 = vld [vmem:[%s10137_s2 + $0x70c] sm:$0xf]  ;;  %v6579_v24 = vld [vmem:[%s10137_s2 + $0x2cc] sm:$0xf0] }
 0x346   : > { %v5170_v3 = vld [vmem:[%s10137_s2 + $0x718] sm:$0xf0]  ;;  %v5768_v61 = vld [vmem:[%s10137_s2 + $0x3c0] sm:$0xf] }
 0x347   : > { %2189 = vmatpush.bf16.msra.mxu0 %v4885_v49  ;;  %2203 = vmatpush.bf16.msra.mxu1 %v5013_v52  ;;  %v4802_v49 = vld [vmem:[%s10137_s2 + $0x438] sm:$0xf0]  ;;  %v5077_v52 = vor.u32 %v6690_v50, %v5074_v8  ;;  %v5173_v25 = vor.u32 %v6714_v57, %v5170_v3  ;;  %v6611_v50 = vld [vmem:[%s10137_s2 + $0x3cc] sm:$0xf0]  ;;  %v5464_v3 = vld [vmem:[%s10137_s2 + $0x160] sm:$0xf] }
 0x348   : > { %2217 = vmatpush.bf16.msra.mxu2 %v5141_v5  ;;  %2231 = vmatpush.bf16.msra.mxu3 %v5269_v58  ;;  %v4930_v5 = vld [vmem:[%s10137_s2 + $0x538] sm:$0xf0]  ;;  %v6686_v58 = vld [vmem:[%s10137_s2 + $0x62c] sm:$0xf]  ;;  %v4805_v56 = vor.u32 %v6622_v38, %v4802_v49  ;;  %v5769_v38 = vor.u32 %v6611_v50, %v5768_v61  ;;  %v5496_v49 = vld [vmem:[%s10137_s2 + $0x1a0] sm:$0xf] }
 0x349   : > { %v4933_v22 = vor.u32 %v6654_v47, %v4930_v5  ;;  %v5061_v17 = vor.u32 %v6686_v58, %v5058_v59  ;;  %v6575_v47 = vld [vmem:[%s10137_s2 + $0x2ac] sm:$0xf0]  ;;  %v5752_v5 = vld [vmem:[%s10137_s2 + $0x3a0] sm:$0xf] }
 0x34a   : > { %v6607_v58 = vld [vmem:[%s10137_s2 + $0x3ac] sm:$0xf0]  ;;  %v5352_v59 = vld [vmem:[%s10137_s2 + $0x80] sm:$0xf] }
 0x34b   : > { %2190 = vmatpush.bf16.msra.mxu0 %v4869_v39  ;;  %2204 = vmatpush.bf16.msra.mxu1 %v4997_v37  ;;  %v4786_v39 = vld [vmem:[%s10137_s2 + $0x418] sm:$0xf0]  ;;  %v6650_v37 = vld [vmem:[%s10137_s2 + $0x50c] sm:$0xf]  ;;  %v5592_v6 = vld [vmem:[%s10137_s2 + $0x260] sm:$0xf] }
 0x34c   : > { %2218 = vmatpush.bf16.msra.mxu2 %v5125_v10  ;;  %2232 = vmatpush.bf16.msra.mxu3 %v5253_v48  ;;  %v5189_v10 = vor.u32 %v6718_v35, %v5186_v42  ;;  %v6682_v48 = vld [vmem:[%s10137_s2 + $0x60c] sm:$0xf]  ;;  %v4789_v9 = vor.u32 %v6618_v54, %v4786_v39  ;;  %v4917_v11 = vor.u32 %v6650_v37, %v4914_v41  ;;  %v6507_v35 = vld [vmem:[%s10137_s2 + $0x8c] sm:$0xf0]  ;;  %v5736_v39 = vld [vmem:[%s10137_s2 + $0x380] sm:$0xf] }
 0x34d   : > { %v5045_v21 = vor.u32 %v6682_v48, %v5042_v55  ;;  %v5753_v54 = vor.u32 %v6607_v58, %v5752_v5  ;;  %v6603_v37 = vld [vmem:[%s10137_s2 + $0x38c] sm:$0xf0]  ;;  %v5353_v41 = vor.u32 %v6507_v35, %v5352_v59  ;;  %v5432_v50 = vld [vmem:[%s10137_s2 + $0x120] sm:$0xf] }
 0x34e   : > { %v6503_v48 = vld [vmem:[%s10137_s2 + $0x6c] sm:$0xf0]  ;;  %v5737_v57 = vor.u32 %v6603_v37, %v5736_v39  ;;  %v5672_v35 = vld [vmem:[%s10137_s2 + $0x300] sm:$0xf] }
 0x34f   : > { %2191 = vmatpush.bf16.msra.mxu0 %v4853_v44  ;;  %2205 = vmatpush.bf16.msra.mxu1 %v4981_v46  ;;  %v6551_v44 = vld [vmem:[%s10137_s2 + $0x1ec] sm:$0xf0]  ;;  %v5656_v46 = vld [vmem:[%s10137_s2 + $0x2e0] sm:$0xf] }
 0x350   : > { %2219 = vmatpush.bf16.msra.mxu2 %v5109_v12  ;;  %2233 = vmatpush.bf16.msra.mxu3 %v5237_v13  ;;  %v6583_v12 = vld [vmem:[%s10137_s2 + $0x2ec] sm:$0xf0]  ;;  %v5784_v13 = vld [vmem:[%s10137_s2 + $0x3e0] sm:$0xf]  ;;  %v5529_v32 = vor.u32 %v6551_v44, %v5528_v7 }
 0x351   : > { %v5785_v60 = vor.u32 %v6615_v20, %v5784_v13  ;;  %v6567_v7 = vld [vmem:[%s10137_s2 + $0x26c] sm:$0xf0]  ;;  %v5720_v44 = vld [vmem:[%s10137_s2 + $0x360] sm:$0xf] }
 0x352   : > { %v6499_v13 = vld [vmem:[%s10137_s2 + $0x4c] sm:$0xf0]  ;;  %v5593_v20 = vor.u32 %v6567_v7, %v5592_v6  ;;  %v5386_v6 = vld [vmem:[%s10137_s2 + $0xd0] sm:$0xf0] }
 0x353   : > { %2192 = vmatpush.bf16.msra.mxu0 %v4837_v63  ;;  %2206 = vmatpush.bf16.msra.mxu1 %v4965_v0  ;;  %v6515_v63 = vld [vmem:[%s10137_s2 + $0xcc] sm:$0xf0]  ;;  %v5657_v0 = vor.u32 %v6583_v12, %v5656_v46  ;;  %v5320_v12 = vld [vmem:[%s10137_s2 + $0x40] sm:$0xf] }
 0x354   : > { %2220 = vmatpush.bf16.msra.mxu2 %v5093_v2  ;;  %2234 = vmatpush.bf16.msra.mxu3 %v5221_v33  ;;  %v6547_v2 = vld [vmem:[%s10137_s2 + $0x1cc] sm:$0xf0]  ;;  %v5640_v33 = vld [vmem:[%s10137_s2 + $0x2c0] sm:$0xf]  ;;  %v5385_v8 = vor.u32 %v6515_v63, %v5384_v62 }
 0x355   : > { %v5513_v26 = vor.u32 %v6547_v2, %v5512_v1  ;;  %v6599_v46 = vld [vmem:[%s10137_s2 + $0x36c] sm:$0xf0]  ;;  %v5704_v63 = vld [vmem:[%s10137_s2 + $0x340] sm:$0xf] }
 0x356   : > { %v6563_v62 = vld [vmem:[%s10137_s2 + $0x24c] sm:$0xf0]  ;;  %v5304_v2 = vld [vmem:[%s10137_s2 + $0x20] sm:$0xf] }
 0x357   : > { %2193 = vmatpush.bf16.msra.mxu0 %v4821_v40  ;;  %2207 = vmatpush.bf16.msra.mxu1 %v4949_v36  ;;  %v6511_v40 = vld [vmem:[%s10137_s2 + $0xac] sm:$0xf0]  ;;  %v5641_v36 = vor.u32 %v6579_v24, %v5640_v33 }
 0x358   : > { %2221 = vmatpush.bf16.msra.mxu2 %v5077_v52  ;;  %2235 = vmatpush.bf16.msra.mxu3 %v5205_v34  ;;  %v6543_v52 = vld [vmem:[%s10137_s2 + $0x1ac] sm:$0xf0]  ;;  %v5624_v34 = vld [vmem:[%s10137_s2 + $0x2a0] sm:$0xf] }
 0x359   : > { %v5625_v42 = vor.u32 %v6575_v47, %v5624_v34  ;;  %v6495_v33 = vld [vmem:[%s10137_s2 + $0x2c] sm:$0xf0]  ;;  %v5416_v47 = vld [vmem:[%s10137_s2 + $0x100] sm:$0xf] }
 0x35a   : > { %v6491_v34 = vld [vmem:[%s10137_s2 + $0xc] sm:$0xf0] }
 0x35b   : > { %2194 = vmatpush.bf16.msra.mxu0 %v4805_v56  ;;  %2208 = vmatpush.bf16.msra.mxu1 %v4933_v22  ;;  %v5608_v56 = vld [vmem:[%s10137_s2 + $0x280] sm:$0xf]  ;;  %v6571_v22 = vld [vmem:[%s10137_s2 + $0x28c] sm:$0xf0] }
 0x35c   : > { %2222 = vmatpush.bf16.msra.mxu2 %v5061_v17  ;;  %2236 = vmatpush.bf16.msra.mxu3 %v5189_v10  ;;  %v5336_v10 = vld [vmem:[%s10137_s2 + $0x60] sm:$0xf]  ;;  %v5609_v55 = vor.u32 %v6571_v22, %v5608_v56  ;;  %v6523_v5 = vld [vmem:[%s10137_s2 + $0x10c] sm:$0xf0]  ;;  %v5530_v56 = vld [vmem:[%s10137_s2 + $0x1f0] sm:$0xf0] }
 0x35d   : > { %v6555_v59 = vld [vmem:[%s10137_s2 + $0x20c] sm:$0xf0]  ;;  %v6581_v22 = vld [vmem:[%s10137_s2 + $0x2e4] sm:$0xf]  ;;  %v5417_v37 = vor.u32 %v6523_v5, %v5416_v47  ;;  %v5738_v47 = vld [vmem:[%s10137_s2 + $0x390] sm:$0xf0] }
 0x35f   : > { %2195 = vmatpush.bf16.msra.mxu0 %v4789_v9  ;;  %2209 = vmatpush.bf16.msra.mxu1 %v4917_v11  ;;  %v5337_v9 = vor.u32 %v6503_v48, %v5336_v10  ;;  %v5465_v11 = vor.u32 %v6535_v4, %v5464_v3  ;;  %v5786_v10 = vld [vmem:[%s10137_s2 + $0x3f0] sm:$0xf0]  ;;  %v6513_v4 = vld [vmem:[%s10137_s2 + $0xc4] sm:$0xf] }
 0x360   : > { %2223 = vmatpush.bf16.msra.mxu2 %v5045_v21  ;;  %2237 = vmatpush.bf16.msra.mxu3 %v5173_v25  ;;  %v5721_v21 = vor.u32 %v6599_v46, %v5720_v44  ;;  %v5448_v25 = vld [vmem:[%s10137_s2 + $0x140] sm:$0xf]  ;;  %v6545_v46 = vld [vmem:[%s10137_s2 + $0x1c4] sm:$0xf] }
 0x362   : > { %2196 = vmatmul.bf16.vlgmr.msra.gmra.mxu0 %v7991_v16  ;;  %2210 = vmatmul.bf16.vlgmr.msra.gmra.mxu1 %v7994_v18  ;;  %v5369_v16 = vor.u32 %v6511_v40, %v5368_v53  ;;  %v5497_v18 = vor.u32 %v6543_v52, %v5496_v49  ;;  %v6559_v53 = vld [vmem:[%s10137_s2 + $0x22c] sm:$0xf0]  ;;  %v5688_v40 = vld [vmem:[%s10137_s2 + $0x320] sm:$0xf]  ;;  %v5305_v49 = vor.u32 %v6495_v33, %v5304_v2  ;;  %v5626_v2 = vld [vmem:[%s10137_s2 + $0x2b0] sm:$0xf0] }
 0x363   : > { %2888 = vmatpush.bf16.msrb.mxu0 %v5401_v31  ;;  %2902 = vmatpush.bf16.msrb.mxu1 %v5529_v32  ;;  %v6531_v31 = vld [vmem:[%s10137_s2 + $0x14c] sm:$0xf0]  ;;  %v5576_v32 = vld [vmem:[%s10137_s2 + $0x240] sm:$0xf]  ;;  %v6605_v33 = vld [vmem:[%s10137_s2 + $0x3a4] sm:$0xf] }
 0x364   : > { %2916 = vmatpush.bf16.msrb.mxu2 %v5657_v0  ;;  %2930 = vmatpush.bf16.msrb.mxu3 %v5785_v60  ;;  %v6595_v0 = vld [vmem:[%s10137_s2 + $0x34c] sm:$0xf0]  ;;  %v5321_v60 = vor.u32 %v6499_v13, %v5320_v12  ;;  %v5449_v1 = vor.u32 %v6531_v31, %v5448_v25  ;;  %v5577_v24 = vor.u32 %v6563_v62, %v5576_v32  ;;  %v5642_v12 = vld [vmem:[%s10137_s2 + $0x2d0] sm:$0xf0]  ;;  %v6609_v13 = vld [vmem:[%s10137_s2 + $0x3c4] sm:$0xf] }
 0x365   : > { %2224 = vmatmul.bf16.vlgmr.msra.gmra.mxu2 %v8008_v29  ;;  %2238 = vmatmul.bf16.vlgmr.msra.gmra.mxu3 %v8011_v30  ;;  %v5480_v29 = vld [vmem:[%s10137_s2 + $0x180] sm:$0xf]  ;;  %v6539_v30 = vld [vmem:[%s10137_s2 + $0x18c] sm:$0xf0]  ;;  %v5705_v61 = vor.u32 %v6595_v0, %v5704_v63  ;;  %v6509_v31 = vld [vmem:[%s10137_s2 + $0xa4] sm:$0xf] }
 0x366   : > { %v5481_v17 = vor.u32 %v6539_v30, %v5480_v29  ;;  %v5402_v29 = vld [vmem:[%s10137_s2 + $0xf0] sm:$0xf0]  ;;  %v6549_v30 = vld [vmem:[%s10137_s2 + $0x1e4] sm:$0xf] }
 0x367   : > { %2889 = vmatpush.bf16.msrb.mxu0 %v5385_v8  ;;  %2903 = vmatpush.bf16.msrb.mxu1 %v5513_v26  ;;  %v6527_v8 = vld [vmem:[%s10137_s2 + $0x12c] sm:$0xf0]  ;;  %v5560_v26 = vld [vmem:[%s10137_s2 + $0x220] sm:$0xf]  ;;  %v5533_v3 = vor.u32 %v6549_v30, %v5530_v56  ;;  %v5370_v32 = vld [vmem:[%s10137_s2 + $0xb0] sm:$0xf0] }
 0x368   : > { %2917 = vmatpush.bf16.msrb.mxu2 %v5641_v36  ;;  %2931 = vmatpush.bf16.msrb.mxu3 %v5769_v38  ;;  %v6591_v36 = vld [vmem:[%s10137_s2 + $0x32c] sm:$0xf0]  ;;  %v5288_v38 = vld [vmem:[%s10137_s2] sm:$0xf]  ;;  %v5433_v52 = vor.u32 %v6527_v8, %v5432_v50  ;;  %v5561_v58 = vor.u32 %v6559_v53, %v5560_v26  ;;  %v6541_v0 = vld [vmem:[%s10137_s2 + $0x1a4] sm:$0xf] }
 0x369   : > { %v5289_v39 = vor.u32 %v6491_v34, %v5288_v38  ;;  %v6505_v8 = vld [vmem:[%s10137_s2 + $0x84] sm:$0xf]  ;;  %v5354_v26 = vld [vmem:[%s10137_s2 + $0x90] sm:$0xf0] }
 0x36a   : > { %v5482_v38 = vld [vmem:[%s10137_s2 + $0x190] sm:$0xf0]  ;;  %v6601_v34 = vld [vmem:[%s10137_s2 + $0x384] sm:$0xf]  ;;  %v5357_v5 = vor.u32 %v6505_v8, %v5354_v26 }
 0x36b   : > { %2890 = vmatpush.bf16.msrb.mxu0 %v5369_v16  ;;  %2904 = vmatpush.bf16.msrb.mxu1 %v5497_v18  ;;  %v5689_v16 = vor.u32 %v6591_v36, %v5688_v40  ;;  %v5544_v18 = vld [vmem:[%s10137_s2 + $0x200] sm:$0xf]  ;;  %v6537_v36 = vld [vmem:[%s10137_s2 + $0x184] sm:$0xf]  ;;  %v5594_v30 = vld [vmem:[%s10137_s2 + $0x270] sm:$0xf0] }
 0x36c   : > { %2918 = vmatpush.bf16.msrb.mxu2 %v5625_v42  ;;  %2932 = vmatpush.bf16.msrb.mxu3 %v5753_v54  ;;  %v6587_v42 = vld [vmem:[%s10137_s2 + $0x30c] sm:$0xf0]  ;;  %v6517_v54 = vld [vmem:[%s10137_s2 + $0xe4] sm:$0xf]  ;;  %v5545_v48 = vor.u32 %v6555_v59, %v5544_v18  ;;  %v5338_v18 = vld [vmem:[%s10137_s2 + $0x70] sm:$0xf0] }
 0x36d   : > { %v6597_v56 = vld [vmem:[%s10137_s2 + $0x364] sm:$0xf]  ;;  %v5546_v8 = vld [vmem:[%s10137_s2 + $0x210] sm:$0xf0] }
 0x36e   : > { %v6585_v26 = vld [vmem:[%s10137_s2 + $0x304] sm:$0xf] }
 0x36f   : > { %2891 = vmatpush.bf16.msrb.mxu0 %v5353_v41  ;;  %2905 = vmatpush.bf16.msrb.mxu1 %v5481_v17  ;;  %v5658_v41 = vld [vmem:[%s10137_s2 + $0x2f0] sm:$0xf0]  ;;  %v6613_v17 = vld [vmem:[%s10137_s2 + $0x3e4] sm:$0xf] }
 0x370   : > { %2919 = vmatpush.bf16.msrb.mxu2 %v5609_v55  ;;  %2933 = vmatpush.bf16.msrb.mxu3 %v5737_v57  ;;  %v5673_v55 = vor.u32 %v6587_v42, %v5672_v35  ;;  %v5405_v57 = vor.u32 %v6517_v54, %v5402_v29  ;;  %v5661_v7 = vor.u32 %v6581_v22, %v5658_v41  ;;  %v6533_v42 = vld [vmem:[%s10137_s2 + $0x164] sm:$0xf]  ;;  %v5466_v54 = vld [vmem:[%s10137_s2 + $0x170] sm:$0xf0] }
 0x371   : > { %v5789_v44 = vor.u32 %v6613_v17, %v5786_v10  ;;  %v5741_v35 = vor.u32 %v6601_v34, %v5738_v47  ;;  %v6565_v29 = vld [vmem:[%s10137_s2 + $0x264] sm:$0xf]  ;;  %v5722_v22 = vld [vmem:[%s10137_s2 + $0x370] sm:$0xf0] }
 0x372   : > { %v6497_v41 = vld [vmem:[%s10137_s2 + $0x44] sm:$0xf]  ;;  %v5322_v17 = vld [vmem:[%s10137_s2 + $0x50] sm:$0xf0]  ;;  %v5597_v10 = vor.u32 %v6565_v29, %v5594_v30  ;;  %v6516_v29 = vld [vmem:[%s10137_s2 + $0xd4] sm:$0xf0] }
 0x373   : > { %2892 = vmatpush.bf16.msrb.mxu0 %v5337_v9  ;;  %2906 = vmatpush.bf16.msrb.mxu1 %v5465_v11  ;;  %v5514_v9 = vld [vmem:[%s10137_s2 + $0x1d0] sm:$0xf0]  ;;  %v6577_v11 = vld [vmem:[%s10137_s2 + $0x2c4] sm:$0xf] }
 0x374   : > { %2920 = vmatpush.bf16.msrb.mxu2 %v5593_v20  ;;  %2934 = vmatpush.bf16.msrb.mxu3 %v5721_v21  ;;  %v5770_v20 = vld [vmem:[%s10137_s2 + $0x3d0] sm:$0xf0]  ;;  %v5389_v21 = vor.u32 %v6513_v4, %v5386_v6  ;;  %v5517_v25 = vor.u32 %v6545_v46, %v5514_v9  ;;  %v5645_v62 = vor.u32 %v6577_v11, %v5642_v12  ;;  %v6593_v6 = vld [vmem:[%s10137_s2 + $0x344] sm:$0xf] }
 0x375   : > { %v5773_v63 = vor.u32 %v6609_v13, %v5770_v20  ;;  %v5578_v4 = vld [vmem:[%s10137_s2 + $0x250] sm:$0xf0]  ;;  %v6493_v9 = vld [vmem:[%s10137_s2 + $0x24] sm:$0xf] }
 0x376   : > { %v5306_v11 = vld [vmem:[%s10137_s2 + $0x30] sm:$0xf0]  ;;  %v6525_v20 = vld [vmem:[%s10137_s2 + $0x124] sm:$0xf] }
 0x377   : > { %2893 = vmatpush.bf16.msrb.mxu0 %v5321_v60  ;;  %2907 = vmatpush.bf16.msrb.mxu1 %v5449_v1  ;;  %v5498_v60 = vld [vmem:[%s10137_s2 + $0x1b0] sm:$0xf0]  ;;  %v6573_v1 = vld [vmem:[%s10137_s2 + $0x2a4] sm:$0xf] }
 0x378   : > { %2921 = vmatpush.bf16.msrb.mxu2 %v5577_v24  ;;  %2935 = vmatpush.bf16.msrb.mxu3 %v5705_v61  ;;  %v5754_v24 = vld [vmem:[%s10137_s2 + $0x3b0] sm:$0xf0]  ;;  %v5373_v61 = vor.u32 %v6509_v31, %v5370_v32  ;;  %v5501_v50 = vor.u32 %v6541_v0, %v5498_v60  ;;  %v5629_v53 = vor.u32 %v6573_v1, %v5626_v2  ;;  %v6589_v32 = vld [vmem:[%s10137_s2 + $0x324] sm:$0xf] }
 0x379   : > { %v5757_v40 = vor.u32 %v6605_v33, %v5754_v24  ;;  %v5562_v31 = vld [vmem:[%s10137_s2 + $0x230] sm:$0xf0]  ;;  %v5309_v0 = vor.u32 %v6493_v9, %v5306_v11  ;;  %v6521_v2 = vld [vmem:[%s10137_s2 + $0x104] sm:$0xf]  ;;  %v6576_v9 = vld [vmem:[%s10137_s2 + $0x2b4] sm:$0xf0] }
 0x37a   : > { %v5290_v1 = vld [vmem:[%s10137_s2 + $0x10] sm:$0xf0]  ;;  %v5760_v11 = vld [vmem:[%s10137_s2 + $0x3a8] sm:$0xf] }
 0x37b   : > { %2894 = vmatpush.bf16.msrb.mxu0 %v5305_v49  ;;  %2908 = vmatpush.bf16.msrb.mxu1 %v5433_v52  ;;  %v6569_v49 = vld [vmem:[%s10137_s2 + $0x284] sm:$0xf]  ;;  %v5610_v52 = vld [vmem:[%s10137_s2 + $0x290] sm:$0xf0] }
 0x37c   : > { %2922 = vmatpush.bf16.msrb.mxu2 %v5561_v58  ;;  %2936 = vmatpush.bf16.msrb.mxu3 %v5689_v16  ;;  %v5485_v58 = vor.u32 %v6537_v36, %v5482_v38  ;;  %v6501_v16 = vld [vmem:[%s10137_s2 + $0x64] sm:$0xf]  ;;  %v5613_v59 = vor.u32 %v6569_v49, %v5610_v52  ;;  %v5418_v33 = vld [vmem:[%s10137_s2 + $0x110] sm:$0xf0]  ;;  %v6520_v36 = vld [vmem:[%s10137_s2 + $0xf4] sm:$0xf0] }
 0x37d   : > { %v5536_v38 = vld [vmem:[%s10137_s2 + $0x1e8] sm:$0xf]  ;;  %v6552_v49 = vld [vmem:[%s10137_s2 + $0x1f4] sm:$0xf0]  ;;  %v5421_v47 = vor.u32 %v6521_v2, %v5418_v33 }
 0x37e   : > { %v5664_v52 = vld [vmem:[%s10137_s2 + $0x2e8] sm:$0xf]  ;;  %v6572_v33 = vld [vmem:[%s10137_s2 + $0x294] sm:$0xf0] }
 0x37f   : > { %2895 = vmatpush.bf16.msrb.mxu0 %v5289_v39  ;;  %2909 = vmatpush.bf16.msrb.mxu1 %v5417_v37  ;;  %v5341_v39 = vor.u32 %v6501_v16, %v5338_v18  ;;  %v5469_v37 = vor.u32 %v6533_v42, %v5466_v54  ;;  %v6616_v16 = vld [vmem:[%s10137_s2 + $0x3f4] sm:$0xf0]  ;;  %v5537_v42 = vor.u32 %v6552_v49, %v5536_v38  ;;  %v5392_v54 = vld [vmem:[%s10137_s2 + $0xc8] sm:$0xf] }
 0x380   : > { %2923 = vmatpush.bf16.msrb.mxu2 %v5545_v48  ;;  %2937 = vmatpush.bf16.msrb.mxu3 %v5673_v55  ;;  %v5725_v48 = vor.u32 %v6597_v56, %v5722_v22  ;;  %v6529_v55 = vld [vmem:[%s10137_s2 + $0x144] sm:$0xf]  ;;  %v5520_v22 = vld [vmem:[%s10137_s2 + $0x1c8] sm:$0xf]  ;;  %v6536_v49 = vld [vmem:[%s10137_s2 + $0x174] sm:$0xf0] }
 0x381   : > { %v5616_v2 = vld [vmem:[%s10137_s2 + $0x288] sm:$0xf] }
 0x382   : > { %2896 = vmatmul.bf16.vlgmr.msrb.gmra.mxu0 %v7923_v15  ;;  %2910 = vmatmul.bf16.vlgmr.msrb.gmra.mxu1 %v7927_v51  ;;  %v5472_v38 = vld [vmem:[%s10137_s2 + $0x168] sm:$0xf] }
 0x383   : > { %2944 = vmatpush.bf16.msra.mxu0 %v5405_v57  ;;  %2958 = vmatpush.bf16.msra.mxu1 %v5533_v3  ;;  %v5450_v57 = vld [vmem:[%s10137_s2 + $0x150] sm:$0xf0]  ;;  %v6561_v3 = vld [vmem:[%s10137_s2 + $0x244] sm:$0xf] }
 0x384   : > { %2972 = vmatpush.bf16.msra.mxu2 %v5661_v7  ;;  %2986 = vmatpush.bf16.msra.mxu3 %v5789_v44  ;;  %v5706_v7 = vld [vmem:[%s10137_s2 + $0x350] sm:$0xf0]  ;;  %v5325_v44 = vor.u32 %v6497_v41, %v5322_v17  ;;  %v5453_v46 = vor.u32 %v6529_v55, %v5450_v57  ;;  %v5581_v12 = vor.u32 %v6561_v3, %v5578_v4  ;;  %v6580_v41 = vld [vmem:[%s10137_s2 + $0x2d4] sm:$0xf0]  ;;  %v5776_v17 = vld [vmem:[%s10137_s2 + $0x3c8] sm:$0xf] }
 0x385   : > { %2924 = vmatmul.bf16.vlgmr.msrb.gmra.mxu2 %v7931_v27  ;;  %2938 = vmatmul.bf16.vlgmr.msrb.gmra.mxu3 %v7935_v28  ;;  %v5709_v13 = vor.u32 %v6593_v6, %v5706_v7  ;;  %v5376_v57 = vld [vmem:[%s10137_s2 + $0xa8] sm:$0xf]  ;;  %v6512_v3 = vld [vmem:[%s10137_s2 + $0xb4] sm:$0xf0] }
 0x386   : > { %v5504_v7 = vld [vmem:[%s10137_s2 + $0x1a8] sm:$0xf] }
 0x387   : > { %2945 = vmatpush.bf16.msra.mxu0 %v5389_v21  ;;  %2959 = vmatpush.bf16.msra.mxu1 %v5517_v25  ;;  %v5434_v21 = vld [vmem:[%s10137_s2 + $0x130] sm:$0xf0]  ;;  %v6557_v25 = vld [vmem:[%s10137_s2 + $0x224] sm:$0xf] }
 0x388   : > { %2973 = vmatpush.bf16.msra.mxu2 %v5645_v62  ;;  %2987 = vmatpush.bf16.msra.mxu3 %v5773_v63  ;;  %v5690_v62 = vld [vmem:[%s10137_s2 + $0x330] sm:$0xf0]  ;;  %v6489_v63 = vld [vmem:[%s10137_s2 + $0x4] sm:$0xf]  ;;  %v5437_v60 = vor.u32 %v6525_v20, %v5434_v21  ;;  %v5565_v24 = vor.u32 %v6557_v25, %v5562_v31  ;;  %v5377_v21 = vor.u32 %v6512_v3, %v5376_v57  ;;  %v6596_v57 = vld [vmem:[%s10137_s2 + $0x354] sm:$0xf0] }
 0x389   : > { %v5293_v34 = vor.u32 %v6489_v63, %v5290_v1  ;;  %v6540_v1 = vld [vmem:[%s10137_s2 + $0x194] sm:$0xf0] }
 0x38b   : > { %2946 = vmatpush.bf16.msra.mxu0 %v5373_v61  ;;  %2960 = vmatpush.bf16.msra.mxu1 %v5501_v50  ;;  %v5693_v61 = vor.u32 %v6589_v32, %v5690_v62  ;;  %v6553_v50 = vld [vmem:[%s10137_s2 + $0x204] sm:$0xf]  ;;  %v5360_v32 = vld [vmem:[%s10137_s2 + $0x88] sm:$0xf]  ;;  %v6508_v62 = vld [vmem:[%s10137_s2 + $0x94] sm:$0xf0] }
 0x38c   : > { %2974 = vmatpush.bf16.msra.mxu2 %v5629_v53  ;;  %2988 = vmatpush.bf16.msra.mxu3 %v5757_v40  ;;  %v5674_v53 = vld [vmem:[%s10137_s2 + $0x310] sm:$0xf0]  ;;  %v5408_v40 = vld [vmem:[%s10137_s2 + $0xe8] sm:$0xf]  ;;  %v5549_v18 = vor.u32 %v6553_v50, %v5546_v8  ;;  %v5361_v50 = vor.u32 %v6508_v62, %v5360_v32 }
 0x38f   : > { %2947 = vmatpush.bf16.msra.mxu0 %v5357_v5  ;;  %2961 = vmatpush.bf16.msra.mxu1 %v5485_v58  ;;  %v6584_v5 = vld [vmem:[%s10137_s2 + $0x2f4] sm:$0xf0]  ;;  %v5792_v58 = vld [vmem:[%s10137_s2 + $0x3e8] sm:$0xf] }
 0x390   : > { %2975 = vmatpush.bf16.msra.mxu2 %v5613_v59  ;;  %2989 = vmatpush.bf16.msra.mxu3 %v5741_v35  ;;  %v5677_v59 = vor.u32 %v6585_v26, %v5674_v53  ;;  %v5409_v35 = vor.u32 %v6520_v36, %v5408_v40  ;;  %v5665_v30 = vor.u32 %v6584_v5, %v5664_v52  ;;  %v5344_v26 = vld [vmem:[%s10137_s2 + $0x68] sm:$0xf]  ;;  %v6504_v53 = vld [vmem:[%s10137_s2 + $0x74] sm:$0xf0] }
 0x391   : > { %v5793_v56 = vor.u32 %v6616_v16, %v5792_v58  ;;  %v5617_v40 = vor.u32 %v6572_v33, %v5616_v2  ;;  %v5600_v52 = vld [vmem:[%s10137_s2 + $0x268] sm:$0xf]  ;;  %v6568_v5 = vld [vmem:[%s10137_s2 + $0x274] sm:$0xf0] }
 0x392   : > { %v5728_v58 = vld [vmem:[%s10137_s2 + $0x368] sm:$0xf]  ;;  %v6600_v16 = vld [vmem:[%s10137_s2 + $0x374] sm:$0xf0] }
 0x393   : > { %2948 = vmatpush.bf16.msra.mxu0 %v5341_v39  ;;  %2962 = vmatpush.bf16.msra.mxu1 %v5469_v37  ;;  %v6548_v39 = vld [vmem:[%s10137_s2 + $0x1d4] sm:$0xf0]  ;;  %v5648_v37 = vld [vmem:[%s10137_s2 + $0x2c8] sm:$0xf] }
 0x394   : > { %2976 = vmatpush.bf16.msra.mxu2 %v5597_v10  ;;  %2990 = vmatpush.bf16.msra.mxu3 %v5725_v48  ;;  %v6612_v10 = vld [vmem:[%s10137_s2 + $0x3d4] sm:$0xf0]  ;;  %v5393_v48 = vor.u32 %v6516_v29, %v5392_v54  ;;  %v5521_v55 = vor.u32 %v6548_v39, %v5520_v22  ;;  %v5649_v4 = vor.u32 %v6580_v41, %v5648_v37  ;;  %v5456_v41 = vld [vmem:[%s10137_s2 + $0x148] sm:$0xf] }
 0x395   : > { %v5777_v6 = vor.u32 %v6612_v10, %v5776_v17  ;;  %v5473_v54 = vor.u32 %v6536_v49, %v5472_v38  ;;  %v5601_v39 = vor.u32 %v6568_v5, %v5600_v52  ;;  %v5729_v37 = vor.u32 %v6600_v16, %v5728_v58  ;;  %v6532_v17 = vld [vmem:[%s10137_s2 + $0x154] sm:$0xf0]  ;;  %v5584_v10 = vld [vmem:[%s10137_s2 + $0x248] sm:$0xf]  ;;  %v6518_v49 = vld [vmem:[%s10137_s2 + $0xec] sm:$0xf] }
 0x396   : > { %v6492_v33 = vld [vmem:[%s10137_s2 + $0x14] sm:$0xf0]  ;;  %v5410_v52 = vld [vmem:[%s10137_s2 + $0xf8] sm:$0xf0]  ;;  %v6582_v5 = vld [vmem:[%s10137_s2 + $0x2ec] sm:$0xf] }
 0x397   : > { %2949 = vmatpush.bf16.msra.mxu0 %v5325_v44  ;;  %2963 = vmatpush.bf16.msra.mxu1 %v5453_v46  ;;  %v6544_v44 = vld [vmem:[%s10137_s2 + $0x1b4] sm:$0xf0]  ;;  %v5632_v46 = vld [vmem:[%s10137_s2 + $0x2a8] sm:$0xf] }
 0x398   : > { %2977 = vmatpush.bf16.msra.mxu2 %v5581_v12  ;;  %2991 = vmatpush.bf16.msra.mxu3 %v5709_v13  ;;  %v6608_v12 = vld [vmem:[%s10137_s2 + $0x3b4] sm:$0xf0]  ;;  %v5505_v25 = vor.u32 %v6544_v44, %v5504_v7  ;;  %v5633_v63 = vor.u32 %v6576_v9, %v5632_v46  ;;  %v5440_v9 = vld [vmem:[%s10137_s2 + $0x128] sm:$0xf] }
 0x399   : > { %v6496_v7 = vld [vmem:[%s10137_s2 + $0x34] sm:$0xf0] }
 0x39a   : > { %v6588_v38 = vld [vmem:[%s10137_s2 + $0x314] sm:$0xf0] }
 0x39b   : > { %2950 = vmatpush.bf16.msra.mxu0 %v5309_v0  ;;  %2964 = vmatpush.bf16.msra.mxu1 %v5437_v60  ;;  %v5761_v0 = vor.u32 %v6608_v12, %v5760_v11  ;;  %v5488_v60 = vld [vmem:[%s10137_s2 + $0x188] sm:$0xf]  ;;  %v6528_v11 = vld [vmem:[%s10137_s2 + $0x134] sm:$0xf0] }
 0x39c   : > { %2978 = vmatpush.bf16.msra.mxu2 %v5565_v24  ;;  %2992 = vmatpush.bf16.msra.mxu3 %v5693_v61  ;;  %v5744_v24 = vld [vmem:[%s10137_s2 + $0x388] sm:$0xf]  ;;  %v6604_v61 = vld [vmem:[%s10137_s2 + $0x394] sm:$0xf0]  ;;  %v5489_v8 = vor.u32 %v6540_v1, %v5488_v60  ;;  %v5441_v1 = vor.u32 %v6528_v11, %v5440_v9  ;;  %v5778_v9 = vld [vmem:[%s10137_s2 + $0x3d8] sm:$0xf0] }
 0x39d   : > { %v5745_v36 = vor.u32 %v6604_v61, %v5744_v24  ;;  %v5568_v12 = vld [vmem:[%s10137_s2 + $0x228] sm:$0xf]  ;;  %v6524_v61 = vld [vmem:[%s10137_s2 + $0x114] sm:$0xf0] }
 0x39e   : > { %v2029_v13 = vpop.f32.mrf.mxu0  ;;  %v2043_v20 = vpop.f32.mrf.mxu1  ;;  %v5424_v24 = vld [vmem:[%s10137_s2 + $0x108] sm:$0xf] }
 0x39f   : > { %2951 = vmatpush.bf16.msra.mxu0 %v5293_v34  ;;  %2965 = vmatpush.bf16.msra.mxu1 %v5421_v47  ;;  %v2044_v31 = vadd.f32 %v2043_v20, %v2029_v13  ;;  %v5425_v16 = vor.u32 %v6524_v61, %v5424_v24 }
 0x3a0   : > { %2979 = vmatpush.bf16.msra.mxu2 %v5549_v18  ;;  %2993 = vmatpush.bf16.msra.mxu3 %v5677_v59 }
 0x3a2   : > { %2952 = vmatmul.bf16.vlgmr.msra.gmra.mxu0 %v7923_v15  ;;  %2966 = vmatmul.bf16.vlgmr.msra.gmra.mxu1 %v7927_v51 }
 0x3a3   : > { %3000 = vmatpush.bf16.msrb.mxu0 %v5409_v35  ;;  %3014 = vmatpush.bf16.msrb.mxu1 %v5537_v42  ;;  %v5345_v42 = vor.u32 %v6504_v53, %v5344_v26  ;;  %v5552_v53 = vld [vmem:[%s10137_s2 + $0x208] sm:$0xf] }
 0x3a4   : > { %3028 = vmatpush.bf16.msrb.mxu2 %v5665_v30  ;;  %3042 = vmatpush.bf16.msrb.mxu3 %v5793_v56  ;;  %v5328_v30 = vld [vmem:[%s10137_s2 + $0x48] sm:$0xf]  ;;  %v6500_v56 = vld [vmem:[%s10137_s2 + $0x54] sm:$0xf0] }
 0x3a5   : > { %2980 = vmatmul.bf16.vlgmr.msra.gmra.mxu2 %v7931_v27  ;;  %2994 = vmatmul.bf16.vlgmr.msra.gmra.mxu3 %v7935_v28  ;;  %v2057_v34 = vpop.f32.mrf.mxu2  ;;  %v2071_v47 = vpop.f32.mrf.mxu3  ;;  %v5329_v3 = vor.u32 %v6500_v56, %v5328_v30 }
 0x3a6   : > { %v2058_v18 = vadd.f32 %v2057_v34, %v2044_v31  ;;  %v2031_v59 = vpop.f32.mrf.mxu0  ;;  %v2045_v35 = vpop.f32.mrf.mxu1  ;;  %v6592_v31 = vld [vmem:[%s10137_s2 + $0x334] sm:$0xf0]  ;;  %v6550_v34 = vld [vmem:[%s10137_s2 + $0x1ec] sm:$0xf] }
 0x3a7   : > { %3001 = vmatpush.bf16.msrb.mxu0 %v5393_v48  ;;  %3015 = vmatpush.bf16.msrb.mxu1 %v5521_v55  ;;  %v2046_v29 = vadd.f32 %v2045_v35, %v2031_v59  ;;  %v6564_v48 = vld [vmem:[%s10137_s2 + $0x254] sm:$0xf0]  ;;  %v5712_v55 = vld [vmem:[%s10137_s2 + $0x348] sm:$0xf]  ;;  %v6614_v59 = vld [vmem:[%s10137_s2 + $0x3ec] sm:$0xf] }
 0x3a8   : > { %3029 = vmatpush.bf16.msrb.mxu2 %v5649_v4  ;;  %3043 = vmatpush.bf16.msrb.mxu3 %v5777_v6  ;;  %v8914_v22 = vadd.f32 %v2071_v47, %v2058_v18  ;;  %v5457_v4 = vor.u32 %v6532_v17, %v5456_v41  ;;  %v5312_v6 = vld [vmem:[%s10137_s2 + $0x28] sm:$0xf]  ;;  %v5585_v44 = vor.u32 %v6564_v48, %v5584_v10  ;;  %v5538_v47 = vld [vmem:[%s10137_s2 + $0x1f8] sm:$0xf0] }
 0x3a9   : > { %v5713_v46 = vor.u32 %v6596_v57, %v5712_v55  ;;  %v5313_v60 = vor.u32 %v6496_v7, %v5312_v6  ;;  %v5666_v18 = vld [vmem:[%s10137_s2 + $0x2f8] sm:$0xf0]  ;;  %v5541_v30 = vor.u32 %v6550_v34, %v5538_v47  ;;  %v6578_v6 = vld [vmem:[%s10137_s2 + $0x2cc] sm:$0xf] }
 0x3aa   : > { %v5794_v35 = vld [vmem:[%s10137_s2 + $0x3f8] sm:$0xf0]  ;;  %v5669_v17 = vor.u32 %v6582_v5, %v5666_v18  ;;  %v6602_v47 = vld [vmem:[%s10137_s2 + $0x38c] sm:$0xf] }
 0x3ab   : > { %3002 = vmatpush.bf16.msrb.mxu0 %v5377_v21  ;;  %3016 = vmatpush.bf16.msrb.mxu1 %v5505_v25  ;;  %v6560_v21 = vld [vmem:[%s10137_s2 + $0x234] sm:$0xf0]  ;;  %v5696_v25 = vld [vmem:[%s10137_s2 + $0x328] sm:$0xf]  ;;  %v5394_v41 = vld [vmem:[%s10137_s2 + $0xd8] sm:$0xf0]  ;;  %v5797_v10 = vor.u32 %v6614_v59, %v5794_v35 }
 0x3ac   : > { %3030 = vmatpush.bf16.msrb.mxu2 %v5633_v63  ;;  %3044 = vmatpush.bf16.msrb.mxu3 %v5761_v0  ;;  %v5296_v0 = vld [vmem:[%s10137_s2 + $0x8] sm:$0xf]  ;;  %v5697_v26 = vor.u32 %v6592_v31, %v5696_v25  ;;  %v5618_v34 = vld [vmem:[%s10137_s2 + $0x298] sm:$0xf0] }
 0x3ad   : > { %v2059_v13 = vpop.f32.mrf.mxu2  ;;  %v2073_v20 = vpop.f32.mrf.mxu3  ;;  %v5297_v58 = vor.u32 %v6492_v33, %v5296_v0  ;;  %v5634_v0 = vld [vmem:[%s10137_s2 + $0x2b8] sm:$0xf0] }
 0x3ae   : > { %v2060_v32 = vadd.f32 %v2059_v13, %v2046_v29  ;;  %v2085_v62 = vpop.f32.mrf.mxu0  ;;  %v2099_v63 = vpop.f32.mrf.mxu1  ;;  %v5413_v29 = vor.u32 %v6518_v49, %v5410_v52  ;;  %v5490_v49 = vld [vmem:[%s10137_s2 + $0x198] sm:$0xf0]  ;;  %v6570_v52 = vld [vmem:[%s10137_s2 + $0x28c] sm:$0xf] }
 0x3af   : > { %3003 = vmatpush.bf16.msrb.mxu0 %v5361_v50  ;;  %3017 = vmatpush.bf16.msrb.mxu1 %v5489_v8  ;;  %v2100_v2 = vadd.f32 %v2099_v63, %v2085_v62  ;;  %v5569_v8 = vor.u32 %v6560_v21, %v5568_v12  ;;  %v5378_v21 = vld [vmem:[%s10137_s2 + $0xb8] sm:$0xf0]  ;;  %v6574_v63 = vld [vmem:[%s10137_s2 + $0x2ac] sm:$0xf] }
 0x3b0   : > { %3031 = vmatpush.bf16.msrb.mxu2 %v5617_v40  ;;  %3045 = vmatpush.bf16.msrb.mxu3 %v5745_v36  ;;  %v8970_v50 = vadd.f32 %v2073_v20, %v2060_v32  ;;  %v6556_v40 = vld [vmem:[%s10137_s2 + $0x214] sm:$0xf0]  ;;  %v5680_v36 = vld [vmem:[%s10137_s2 + $0x308] sm:$0xf]  ;;  %v6510_v20 = vld [vmem:[%s10137_s2 + $0xac] sm:$0xf] }
 0x3b1   : > { %v6542_v32 = vld [vmem:[%s10137_s2 + $0x1ac] sm:$0xf]  ;;  %v5506_v62 = vld [vmem:[%s10137_s2 + $0x1b8] sm:$0xf0] }
 0x3b2   : > { %v5509_v33 = vor.u32 %v6542_v32, %v5506_v62  ;;  %v5746_v5 = vld [vmem:[%s10137_s2 + $0x398] sm:$0xf0] }
 0x3b3   : > { %3004 = vmatpush.bf16.msrb.mxu0 %v5345_v42  ;;  %3018 = vmatpush.bf16.msrb.mxu1 %v5473_v54  ;;  %v5553_v42 = vor.u32 %v6556_v40, %v5552_v53  ;;  %v5681_v54 = vor.u32 %v6588_v38, %v5680_v36  ;;  %v5637_v53 = vor.u32 %v6574_v63, %v5634_v0  ;;  %v6538_v38 = vld [vmem:[%s10137_s2 + $0x18c] sm:$0xf] }
 0x3b4   : > { %3032 = vmatpush.bf16.msrb.mxu2 %v5601_v39  ;;  %3046 = vmatpush.bf16.msrb.mxu3 %v5729_v37  ;;  %v6514_v37 = vld [vmem:[%s10137_s2 + $0xcc] sm:$0xf] }
 0x3b5   : > { %v2113_v56 = vpop.f32.mrf.mxu2  ;;  %v2127_v39 = vpop.f32.mrf.mxu3  ;;  %v5397_v12 = vor.u32 %v6514_v37, %v5394_v41  ;;  %v5474_v37 = vld [vmem:[%s10137_s2 + $0x178] sm:$0xf0]  ;;  %v6566_v41 = vld [vmem:[%s10137_s2 + $0x26c] sm:$0xf] }
 0x3b6   : > { %v2114_v48 = vadd.f32 %v2113_v56, %v2100_v2  ;;  %v2087_v55 = vpop.f32.mrf.mxu0  ;;  %v2101_v57 = vpop.f32.mrf.mxu1  ;;  %v5381_v2 = vor.u32 %v6510_v20, %v5378_v21  ;;  %v5749_v56 = vor.u32 %v6602_v47, %v5746_v5  ;;  %v5586_v20 = vld [vmem:[%s10137_s2 + $0x258] sm:$0xf0]  ;;  %v6594_v21 = vld [vmem:[%s10137_s2 + $0x34c] sm:$0xf] }
 0x3b7   : > { %3005 = vmatpush.bf16.msrb.mxu0 %v5329_v3  ;;  %3019 = vmatpush.bf16.msrb.mxu1 %v5457_v4  ;;  %v6546_v3 = vld [vmem:[%s10137_s2 + $0x1cc] sm:$0xf]  ;;  %v5522_v4 = vld [vmem:[%s10137_s2 + $0x1d8] sm:$0xf0]  ;;  %v2102_v7 = vadd.f32 %v2101_v57, %v2087_v55 }
 0x3b8   : > { %3033 = vmatpush.bf16.msrb.mxu2 %v5585_v44  ;;  %3047 = vmatpush.bf16.msrb.mxu3 %v5713_v46  ;;  %v5650_v44 = vld [vmem:[%s10137_s2 + $0x2d8] sm:$0xf0]  ;;  %v6610_v46 = vld [vmem:[%s10137_s2 + $0x3cc] sm:$0xf]  ;;  %v9032_v11 = vadd.f32 %v2127_v39, %v2114_v48  ;;  %v5525_v13 = vor.u32 %v6546_v3, %v5522_v4 }
 0x3b9   : > { %v5653_v25 = vor.u32 %v6578_v6, %v5650_v44  ;;  %v5781_v31 = vor.u32 %v6610_v46, %v5778_v9  ;;  %v6534_v39 = vld [vmem:[%s10137_s2 + $0x16c] sm:$0xf]  ;;  %v5730_v48 = vld [vmem:[%s10137_s2 + $0x378] sm:$0xf0] }
 0x3ba   : > { %v5477_v57 = vor.u32 %v6534_v39, %v5474_v37  ;;  %v6498_v3 = vld [vmem:[%s10137_s2 + $0x4c] sm:$0xf]  ;;  %v5330_v4 = vld [vmem:[%s10137_s2 + $0x58] sm:$0xf0]  ;;  %v6775_v39 = vld [vmem:[%s10137_s2 + $0x8ec] sm:$0xf0] }
 0x3bb   : > { %3006 = vmatpush.bf16.msrb.mxu0 %v5313_v60  ;;  %3020 = vmatpush.bf16.msrb.mxu1 %v5441_v1  ;;  %v6606_v60 = vld [vmem:[%s10137_s2 + $0x3ac] sm:$0xf]  ;;  %v5762_v1 = vld [vmem:[%s10137_s2 + $0x3b8] sm:$0xf0]  ;;  %v5333_v0 = vor.u32 %v6498_v3, %v5330_v4  ;;  %v6839_v3 = vld [vmem:[%s10137_s2 + $0xaec] sm:$0xf0] }
 0x3bc   : > { %3034 = vmatpush.bf16.msrb.mxu2 %v5569_v8  ;;  %3048 = vmatpush.bf16.msrb.mxu3 %v5697_v26  ;;  %v6506_v8 = vld [vmem:[%s10137_s2 + $0x8c] sm:$0xf]  ;;  %v5362_v26 = vld [vmem:[%s10137_s2 + $0x98] sm:$0xf0]  ;;  %v5765_v40 = vor.u32 %v6606_v60, %v5762_v1  ;;  %v6424_v4 = vld [vmem:[%s10137_s2 + $0xbe0] sm:$0xf] }
 0x3bd   : > { %v2115_v24 = vpop.f32.mrf.mxu2  ;;  %v2129_v61 = vpop.f32.mrf.mxu3  ;;  %v5365_v35 = vor.u32 %v6506_v8, %v5362_v26  ;;  %v6530_v44 = vld [vmem:[%s10137_s2 + $0x14c] sm:$0xf]  ;;  %v5458_v46 = vld [vmem:[%s10137_s2 + $0x158] sm:$0xf0] }
 0x3be   : > { %v2116_v36 = vadd.f32 %v2115_v24, %v2102_v7  ;;  %v6562_v9 = vld [vmem:[%s10137_s2 + $0x24c] sm:$0xf]  ;;  %v5461_v60 = vor.u32 %v6530_v44, %v5458_v46  ;;  %v5442_v26 = vld [vmem:[%s10137_s2 + $0x138] sm:$0xf0] }
 0x3bf   : > { %3007 = vmatpush.bf16.msrb.mxu0 %v5297_v58  ;;  %3021 = vmatpush.bf16.msrb.mxu1 %v5425_v16  ;;  %v2141_v16 = vpop.f32.mrf.mxu0  ;;  %v2155_v18 = vpop.f32.mrf.mxu1  ;;  %v6494_v1 = vld [vmem:[%s10137_s2 + $0x2c] sm:$0xf]  ;;  %v5589_v24 = vor.u32 %v6562_v9, %v5586_v20  ;;  %v5298_v47 = vld [vmem:[%s10137_s2 + $0x18] sm:$0xf0]  ;;  %v6771_v20 = vld [vmem:[%s10137_s2 + $0x8cc] sm:$0xf0] }
 0x3c0   : > { %3035 = vmatpush.bf16.msrb.mxu2 %v5553_v42  ;;  %3049 = vmatpush.bf16.msrb.mxu3 %v5681_v54  ;;  %v9086_v58 = vadd.f32 %v2129_v61, %v2116_v36  ;;  %v2156_v59 = vadd.f32 %v2155_v18, %v2141_v16  ;;  %v5493_v42 = vor.u32 %v6538_v38, %v5490_v49  ;;  %v6502_v54 = vld [vmem:[%s10137_s2 + $0x6c] sm:$0xf]  ;;  %v5698_v38 = vld [vmem:[%s10137_s2 + $0x338] sm:$0xf0] }
 0x3c1   : > { %v6526_v8 = vld [vmem:[%s10137_s2 + $0x12c] sm:$0xf]  ;;  %v5426_v16 = vld [vmem:[%s10137_s2 + $0x118] sm:$0xf0] }
 0x3c2   : > { %3008 = vmatmul.bf16.vlgmr.msrb.gmra.mxu0 %v7923_v15  ;;  %3022 = vmatmul.bf16.vlgmr.msrb.gmra.mxu1 %v7927_v51  ;;  %v6590_v36 = vld [vmem:[%s10137_s2 + $0x32c] sm:$0xf] }
 0x3c3   : > { %3056 = vmatpush.bf16.msra.mxu0 %v5413_v29  ;;  %3070 = vmatpush.bf16.msra.mxu1 %v5541_v30  ;;  %v5346_v29 = vld [vmem:[%s10137_s2 + $0x78] sm:$0xf0]  ;;  %v5621_v30 = vor.u32 %v6570_v52, %v5618_v34  ;;  %v6490_v49 = vld [vmem:[%s10137_s2 + $0xc] sm:$0xf]  ;;  %v5445_v34 = vor.u32 %v6526_v8, %v5442_v26 }
 0x3c4   : > { %3084 = vmatpush.bf16.msra.mxu2 %v5669_v17  ;;  %3098 = vmatpush.bf16.msra.mxu3 %v5797_v10  ;;  %v5602_v17 = vld [vmem:[%s10137_s2 + $0x278] sm:$0xf0]  ;;  %v6598_v10 = vld [vmem:[%s10137_s2 + $0x36c] sm:$0xf]  ;;  %v5349_v55 = vor.u32 %v6502_v54, %v5346_v29 }
 0x3c5   : > { %3036 = vmatmul.bf16.vlgmr.msrb.gmra.mxu2 %v7931_v27  ;;  %3050 = vmatmul.bf16.vlgmr.msrb.gmra.mxu3 %v7935_v28  ;;  %v5605_v6 = vor.u32 %v6566_v41, %v5602_v17  ;;  %v5733_v7 = vor.u32 %v6598_v10, %v5730_v48  ;;  %v6522_v5 = vld [vmem:[%s10137_s2 + $0x10c] sm:$0xf]  ;;  %v6168_v41 = vld [vmem:[%s10137_s2 + $0x9e0] sm:$0xf]  ;;  %v6807_v17 = vld [vmem:[%s10137_s2 + $0x9ec] sm:$0xf0] }
 0x3c6   : > { %v6586_v54 = vld [vmem:[%s10137_s2 + $0x30c] sm:$0xf]  ;;  %v6296_v10 = vld [vmem:[%s10137_s2 + $0xae0] sm:$0xf] }
 0x3c7   : > { %3057 = vmatpush.bf16.msra.mxu0 %v5397_v12  ;;  %3071 = vmatpush.bf16.msra.mxu1 %v5525_v13  ;;  %v2143_v32 = vpop.f32.mrf.mxu0  ;;  %v2157_v62 = vpop.f32.mrf.mxu1 }
 0x3c8   : > { %3085 = vmatpush.bf16.msra.mxu2 %v5653_v25  ;;  %3099 = vmatpush.bf16.msra.mxu3 %v5781_v31  ;;  %v2169_v12 = vpop.f32.mrf.mxu2  ;;  %v2183_v13 = vpop.f32.mrf.mxu3  ;;  %v5714_v25 = vld [vmem:[%s10137_s2 + $0x358] sm:$0xf0]  ;;  %v2158_v63 = vadd.f32 %v2157_v62, %v2143_v32  ;;  %v6803_v32 = vld [vmem:[%s10137_s2 + $0x9cc] sm:$0xf0]  ;;  %v6280_v62 = vld [vmem:[%s10137_s2 + $0xac0] sm:$0xf] }
 0x3c9   : > { %v2170_v31 = vadd.f32 %v2169_v12, %v2156_v59  ;;  %v5717_v61 = vor.u32 %v6594_v21, %v5714_v25  ;;  %v5701_v59 = vor.u32 %v6590_v36, %v5698_v38  ;;  %v6169_v12 = vor.u32 %v6807_v17, %v6168_v41  ;;  %v6264_v36 = vld [vmem:[%s10137_s2 + $0xaa0] sm:$0xf]  ;;  %v6831_v38 = vld [vmem:[%s10137_s2 + $0xaac] sm:$0xf0] }
 0x3ca   : > { %v6297_v21 = vor.u32 %v6839_v3, %v6296_v10  ;;  %v6759_v41 = vld [vmem:[%s10137_s2 + $0x86c] sm:$0xf0] }
 0x3cb   : > { %3058 = vmatpush.bf16.msra.mxu0 %v5381_v2  ;;  %3072 = vmatpush.bf16.msra.mxu1 %v5509_v33  ;;  %v5314_v2 = vld [vmem:[%s10137_s2 + $0x38] sm:$0xf0]  ;;  %v9142_v33 = vadd.f32 %v2183_v13, %v2170_v31  ;;  %v6024_v13 = vld [vmem:[%s10137_s2 + $0x8c0] sm:$0xf]  ;;  %v6823_v3 = vld [vmem:[%s10137_s2 + $0xa6c] sm:$0xf0] }
 0x3cc   : > { %3086 = vmatpush.bf16.msra.mxu2 %v5637_v53  ;;  %3100 = vmatpush.bf16.msra.mxu3 %v5765_v40  ;;  %v6558_v53 = vld [vmem:[%s10137_s2 + $0x22c] sm:$0xf]  ;;  %v5570_v40 = vld [vmem:[%s10137_s2 + $0x238] sm:$0xf0]  ;;  %v5317_v52 = vor.u32 %v6494_v1, %v5314_v2  ;;  %v6152_v31 = vld [vmem:[%s10137_s2 + $0x9c0] sm:$0xf]  ;;  %v6025_v1 = vor.u32 %v6771_v20, %v6024_v13 }
 0x3cd   : > { %v5573_v18 = vor.u32 %v6558_v53, %v5570_v40  ;;  %v6153_v2 = vor.u32 %v6803_v32, %v6152_v31  ;;  %v6136_v53 = vld [vmem:[%s10137_s2 + $0x9a0] sm:$0xf]  ;;  %v6799_v40 = vld [vmem:[%s10137_s2 + $0x9ac] sm:$0xf0] }
 0x3ce   : > { %v6216_v31 = vld [vmem:[%s10137_s2 + $0xa40] sm:$0xf] }
 0x3cf   : > { %3059 = vmatpush.bf16.msra.mxu0 %v5365_v35  ;;  %3073 = vmatpush.bf16.msra.mxu1 %v5493_v42  ;;  %v6554_v35 = vld [vmem:[%s10137_s2 + $0x20c] sm:$0xf]  ;;  %v5554_v42 = vld [vmem:[%s10137_s2 + $0x218] sm:$0xf0] }
 0x3d0   : > { %3087 = vmatpush.bf16.msra.mxu2 %v5621_v30  ;;  %3101 = vmatpush.bf16.msra.mxu3 %v5749_v56  ;;  %v2171_v29 = vpop.f32.mrf.mxu2  ;;  %v5682_v30 = vld [vmem:[%s10137_s2 + $0x318] sm:$0xf0]  ;;  %v6040_v56 = vld [vmem:[%s10137_s2 + $0x8e0] sm:$0xf]  ;;  %v2185_v48 = vpop.f32.mrf.mxu3  ;;  %v5557_v44 = vor.u32 %v6554_v35, %v5554_v42  ;;  %v6859_v42 = vld [vmem:[%s10137_s2 + $0xb8c] sm:$0xf0] }
 0x3d1   : > { %v2172_v37 = vadd.f32 %v2171_v29, %v2158_v63  ;;  %v5685_v46 = vor.u32 %v6586_v54, %v5682_v30  ;;  %v6041_v9 = vor.u32 %v6775_v39, %v6040_v56  ;;  %v6835_v63 = vld [vmem:[%s10137_s2 + $0xacc] sm:$0xf0]  ;;  %v6376_v35 = vld [vmem:[%s10137_s2 + $0xb80] sm:$0xf] }
 0x3d2   : > { %v6281_v8 = vor.u32 %v6835_v63, %v6280_v62  ;;  %v6377_v10 = vor.u32 %v6859_v42, %v6376_v35  ;;  %v6819_v63 = vld [vmem:[%s10137_s2 + $0xa4c] sm:$0xf0] }
 0x3d3   : > { %3060 = vmatpush.bf16.msra.mxu0 %v5349_v55  ;;  %3074 = vmatpush.bf16.msra.mxu1 %v5477_v57  ;;  %v5301_v55 = vor.u32 %v6490_v49, %v5298_v47  ;;  %v5429_v57 = vor.u32 %v6522_v5, %v5426_v16  ;;  %v6392_v49 = vld [vmem:[%s10137_s2 + $0xba0] sm:$0xf]  ;;  %v6763_v47 = vld [vmem:[%s10137_s2 + $0x88c] sm:$0xf0]  ;;  %v6265_v5 = vor.u32 %v6831_v38, %v6264_v36 }
 0x3d4   : > { %3088 = vmatpush.bf16.msra.mxu2 %v5605_v6  ;;  %3102 = vmatpush.bf16.msra.mxu3 %v5733_v7  ;;  %v6871_v6 = vld [vmem:[%s10137_s2 + $0xbec] sm:$0xf0]  ;;  %v9210_v7 = vadd.f32 %v2185_v48, %v2172_v37  ;;  %v5976_v37 = vld [vmem:[%s10137_s2 + $0x860] sm:$0xf]  ;;  %v6217_v38 = vor.u32 %v6819_v63, %v6216_v31  ;;  %v6769_v31 = vld [vmem:[%s10137_s2 + $0x8c4] sm:$0xf] }
 0x3d5   : > { %v6425_v25 = vor.u32 %v6871_v6, %v6424_v4  ;;  %v6104_v48 = vld [vmem:[%s10137_s2 + $0x960] sm:$0xf]  ;;  %v6855_v6 = vld [vmem:[%s10137_s2 + $0xb6c] sm:$0xf0] }
 0x3d6   : > { %v6360_v4 = vld [vmem:[%s10137_s2 + $0xb60] sm:$0xf]  ;;  %v6779_v35 = vld [vmem:[%s10137_s2 + $0x90c] sm:$0xf0] }
 0x3d7   : > { %3061 = vmatpush.bf16.msra.mxu0 %v5333_v0  ;;  %3075 = vmatpush.bf16.msra.mxu1 %v5461_v60  ;;  %v6408_v0 = vld [vmem:[%s10137_s2 + $0xbc0] sm:$0xf]  ;;  %v6867_v60 = vld [vmem:[%s10137_s2 + $0xbcc] sm:$0xf0]  ;;  %v6361_v20 = vor.u32 %v6855_v6, %v6360_v4 }
 0x3d8   : > { %3089 = vmatpush.bf16.msra.mxu2 %v5589_v24  ;;  %3103 = vmatpush.bf16.msra.mxu3 %v5717_v61  ;;  %v6008_v24 = vld [vmem:[%s10137_s2 + $0x8a0] sm:$0xf]  ;;  %v6767_v61 = vld [vmem:[%s10137_s2 + $0x8ac] sm:$0xf0]  ;;  %v6409_v26 = vor.u32 %v6867_v60, %v6408_v0 }
 0x3d9   : > { %v6344_v0 = vld [vmem:[%s10137_s2 + $0xb40] sm:$0xf]  ;;  %v6851_v60 = vld [vmem:[%s10137_s2 + $0xb4c] sm:$0xf0] }
 0x3db   : > { %3062 = vmatpush.bf16.msra.mxu0 %v5317_v52  ;;  %3076 = vmatpush.bf16.msra.mxu1 %v5445_v34  ;;  %v6863_v52 = vld [vmem:[%s10137_s2 + $0xbac] sm:$0xf0]  ;;  %v5992_v34 = vld [vmem:[%s10137_s2 + $0x880] sm:$0xf] }
 0x3dc   : > { %3090 = vmatpush.bf16.msra.mxu2 %v5573_v18  ;;  %3104 = vmatpush.bf16.msra.mxu3 %v5701_v59  ;;  %v6393_v16 = vor.u32 %v6863_v52, %v6392_v49  ;;  %v6248_v18 = vld [vmem:[%s10137_s2 + $0xa80] sm:$0xf]  ;;  %v6827_v59 = vld [vmem:[%s10137_s2 + $0xa8c] sm:$0xf0]  ;;  %v5993_v56 = vor.u32 %v6763_v47, %v5992_v34  ;;  %v6345_v49 = vor.u32 %v6851_v60, %v6344_v0  ;;  %v6801_v0 = vld [vmem:[%s10137_s2 + $0x9c4] sm:$0xf] }
 0x3dd   : > { %v6249_v17 = vor.u32 %v6827_v59, %v6248_v18  ;;  %v6072_v52 = vld [vmem:[%s10137_s2 + $0x920] sm:$0xf]  ;;  %v6815_v34 = vld [vmem:[%s10137_s2 + $0xa2c] sm:$0xf0]  ;;  %v6154_v60 = vld [vmem:[%s10137_s2 + $0x9d0] sm:$0xf0] }
 0x3de   : > { %v6328_v47 = vld [vmem:[%s10137_s2 + $0xb20] sm:$0xf]  ;;  %v6747_v18 = vld [vmem:[%s10137_s2 + $0x80c] sm:$0xf0] }
 0x3df   : > { %3063 = vmatpush.bf16.msra.mxu0 %v5301_v55  ;;  %3077 = vmatpush.bf16.msra.mxu1 %v5429_v57  ;;  %v2197_v54 = vpop.f32.mrf.mxu0  ;;  %v2211_v29 = vpop.f32.mrf.mxu1  ;;  %v6791_v55 = vld [vmem:[%s10137_s2 + $0x96c] sm:$0xf0]  ;;  %v6232_v57 = vld [vmem:[%s10137_s2 + $0xa60] sm:$0xf] }
 0x3e0   : > { %3091 = vmatpush.bf16.msra.mxu2 %v5557_v44  ;;  %3105 = vmatpush.bf16.msra.mxu3 %v5685_v46  ;;  %v2212_v30 = vadd.f32 %v2211_v29, %v2197_v54  ;;  %v5977_v44 = vor.u32 %v6759_v41, %v5976_v37  ;;  %v6105_v46 = vor.u32 %v6791_v55, %v6104_v48  ;;  %v6056_v59 = vld [vmem:[%s10137_s2 + $0x900] sm:$0xf]  ;;  %v6843_v37 = vld [vmem:[%s10137_s2 + $0xb0c] sm:$0xf0]  ;;  %v6773_v41 = vld [vmem:[%s10137_s2 + $0x8e4] sm:$0xf] }
 0x3e1   : > { %v6233_v13 = vor.u32 %v6823_v3, %v6232_v57  ;;  %v6184_v29 = vld [vmem:[%s10137_s2 + $0xa00] sm:$0xf]  ;;  %v6805_v48 = vld [vmem:[%s10137_s2 + $0x9e4] sm:$0xf]  ;;  %v6170_v55 = vld [vmem:[%s10137_s2 + $0x9f0] sm:$0xf0]  ;;  %v6057_v6 = vor.u32 %v6779_v35, %v6056_v59 }
 0x3e2   : > { %3064 = vmatmul.bf16.vlgmr.msra.gmra.mxu0 %v7923_v15  ;;  %3078 = vmatmul.bf16.vlgmr.msra.gmra.mxu1 %v7927_v51  ;;  %v6009_v15 = vor.u32 %v6767_v61, %v6008_v24  ;;  %v6137_v51 = vor.u32 %v6799_v40, %v6136_v53  ;;  %v5944_v53 = vld [vmem:[%s10137_s2 + $0x820] sm:$0xf]  ;;  %v6751_v40 = vld [vmem:[%s10137_s2 + $0x82c] sm:$0xf0]  ;;  %v6837_v57 = vld [vmem:[%s10137_s2 + $0xae4] sm:$0xf] }
 0x3e3   : > { %3909 = vmatpush.bf16.msrb.mxu0 %v6041_v9  ;;  %3923 = vmatpush.bf16.msrb.mxu1 %v6169_v12  ;;  %v5960_v9 = vld [vmem:[%s10137_s2 + $0x840] sm:$0xf]  ;;  %v6755_v12 = vld [vmem:[%s10137_s2 + $0x84c] sm:$0xf0] }
 0x3e4   : > { %3937 = vmatpush.bf16.msrb.mxu2 %v6297_v21  ;;  %3951 = vmatpush.bf16.msrb.mxu3 %v6425_v25  ;;  %v6088_v21 = vld [vmem:[%s10137_s2 + $0x940] sm:$0xf]  ;;  %v6787_v25 = vld [vmem:[%s10137_s2 + $0x94c] sm:$0xf0] }
 0x3e5   : > { %3092 = vmatmul.bf16.vlgmr.msra.gmra.mxu2 %v7931_v27  ;;  %3106 = vmatmul.bf16.vlgmr.msra.gmra.mxu3 %v7935_v28  ;;  %v6120_v27 = vld [vmem:[%s10137_s2 + $0x980] sm:$0xf]  ;;  %v6795_v28 = vld [vmem:[%s10137_s2 + $0x98c] sm:$0xf0] }
 0x3e6   : > { %v6121_v39 = vor.u32 %v6795_v28, %v6120_v27  ;;  %v5945_v27 = vor.u32 %v6751_v40, %v5944_v53  ;;  %v6765_v53 = vld [vmem:[%s10137_s2 + $0x8a4] sm:$0xf]  ;;  %v6010_v40 = vld [vmem:[%s10137_s2 + $0x8b0] sm:$0xf0] }
 0x3e7   : > { %3910 = vmatpush.bf16.msrb.mxu0 %v6025_v1  ;;  %3924 = vmatpush.bf16.msrb.mxu1 %v6153_v2  ;;  %v2199_v2 = vpop.f32.mrf.mxu0  ;;  %v2213_v24 = vpop.f32.mrf.mxu1 }
 0x3e8   : > { %3938 = vmatpush.bf16.msrb.mxu2 %v6281_v8  ;;  %3952 = vmatpush.bf16.msrb.mxu3 %v6409_v26  ;;  %v2225_v32 = vpop.f32.mrf.mxu2  ;;  %v2239_v62 = vpop.f32.mrf.mxu3  ;;  %v2214_v61 = vadd.f32 %v2213_v24, %v2199_v2  ;;  %v5961_v8 = vor.u32 %v6755_v12, %v5960_v9  ;;  %v6089_v26 = vor.u32 %v6787_v25, %v6088_v21  ;;  %v6426_v9 = vld [vmem:[%s10137_s2 + $0xbf0] sm:$0xf0]  ;;  %v6865_v24 = vld [vmem:[%s10137_s2 + $0xbc4] sm:$0xf] }
 0x3e9   : > { %v2226_v1 = vadd.f32 %v2225_v32, %v2212_v30  ;;  %v6811_v30 = vld [vmem:[%s10137_s2 + $0xa0c] sm:$0xf0]  ;;  %v6173_v25 = vor.u32 %v6805_v48, %v6170_v55  ;;  %v6026_v32 = vld [vmem:[%s10137_s2 + $0x8d0] sm:$0xf0]  ;;  %v6757_v55 = vld [vmem:[%s10137_s2 + $0x864] sm:$0xf] }
 0x3ea   : > { %v6282_v2 = vld [vmem:[%s10137_s2 + $0xad0] sm:$0xf0] }
 0x3eb   : > { %3911 = vmatpush.bf16.msrb.mxu0 %v6009_v15  ;;  %3925 = vmatpush.bf16.msrb.mxu1 %v6137_v51  ;;  %v9342_v36 = vadd.f32 %v2239_v62, %v2226_v1  ;;  %v6783_v15 = vld [vmem:[%s10137_s2 + $0x92c] sm:$0xf0]  ;;  %v6200_v51 = vld [vmem:[%s10137_s2 + $0xa20] sm:$0xf]  ;;  %v6833_v1 = vld [vmem:[%s10137_s2 + $0xac4] sm:$0xf] }
 0x3ec   : > { %3939 = vmatpush.bf16.msrb.mxu2 %v6265_v5  ;;  %3953 = vmatpush.bf16.msrb.mxu3 %v6393_v16  ;;  %v6847_v5 = vld [vmem:[%s10137_s2 + $0xb2c] sm:$0xf0]  ;;  %v5928_v16 = vld [vmem:[%s10137_s2 + $0x800] sm:$0xf]  ;;  %v6073_v28 = vor.u32 %v6783_v15, %v6072_v52  ;;  %v6201_v42 = vor.u32 %v6815_v34, %v6200_v51  ;;  %v6797_v52 = vld [vmem:[%s10137_s2 + $0x9a4] sm:$0xf] }
 0x3ed   : > { %v6329_v54 = vor.u32 %v6847_v5, %v6328_v47  ;;  %v5929_v4 = vor.u32 %v6747_v18, %v5928_v16  ;;  %v6138_v15 = vld [vmem:[%s10137_s2 + $0x9b0] sm:$0xf0]  ;;  %v6829_v51 = vld [vmem:[%s10137_s2 + $0xaa4] sm:$0xf]  ;;  %v6013_v16 = vor.u32 %v6765_v53, %v6010_v40 }
 0x3ee   : > { %v6266_v34 = vld [vmem:[%s10137_s2 + $0xab0] sm:$0xf0]  ;;  %v6861_v47 = vld [vmem:[%s10137_s2 + $0xba4] sm:$0xf] }
 0x3ef   : > { %3912 = vmatpush.bf16.msrb.mxu0 %v5993_v56  ;;  %3926 = vmatpush.bf16.msrb.mxu1 %v6121_v39  ;;  %v6312_v56 = vld [vmem:[%s10137_s2 + $0xb00] sm:$0xf]  ;;  %v6394_v5 = vld [vmem:[%s10137_s2 + $0xbb0] sm:$0xf0]  ;;  %v6269_v59 = vor.u32 %v6829_v51, %v6266_v34 }
 0x3f0   : > { %3940 = vmatpush.bf16.msrb.mxu2 %v6249_v17  ;;  %3954 = vmatpush.bf16.msrb.mxu3 %v6377_v10  ;;  %v2227_v39 = vpop.f32.mrf.mxu2  ;;  %v6042_v17 = vld [vmem:[%s10137_s2 + $0x8f0] sm:$0xf0]  ;;  %v2241_v3 = vpop.f32.mrf.mxu3  ;;  %v6397_v35 = vor.u32 %v6861_v47, %v6394_v5 }
 0x3f1   : > { %v2228_v10 = vadd.f32 %v2227_v39, %v2214_v61  ;;  %v6045_v21 = vor.u32 %v6773_v41, %v6042_v17  ;;  %v6410_v61 = vld [vmem:[%s10137_s2 + $0xbd0] sm:$0xf0] }
 0x3f2   : > { %v5994_v18 = vld [vmem:[%s10137_s2 + $0x890] sm:$0xf0] }
 0x3f3   : > { %3913 = vmatpush.bf16.msrb.mxu0 %v5977_v44  ;;  %3927 = vmatpush.bf16.msrb.mxu1 %v6105_v46  ;;  %v6298_v44 = vld [vmem:[%s10137_s2 + $0xaf0] sm:$0xf0]  ;;  %v6869_v46 = vld [vmem:[%s10137_s2 + $0xbe4] sm:$0xf]  ;;  %v9410_v12 = vadd.f32 %v2241_v3, %v2228_v10 }
 0x3f4   : > { %3941 = vmatpush.bf16.msrb.mxu2 %v6233_v13  ;;  %3955 = vmatpush.bf16.msrb.mxu3 %v6361_v20  ;;  %v6185_v13 = vor.u32 %v6811_v30, %v6184_v29  ;;  %v6313_v20 = vor.u32 %v6843_v37, %v6312_v56  ;;  %v6301_v62 = vor.u32 %v6837_v57, %v6298_v44  ;;  %v6825_v29 = vld [vmem:[%s10137_s2 + $0xa84] sm:$0xf]  ;;  %v6250_v30 = vld [vmem:[%s10137_s2 + $0xa90] sm:$0xf0] }
 0x3f5   : > { %v6429_v63 = vor.u32 %v6869_v46, %v6426_v9  ;;  %v6857_v56 = vld [vmem:[%s10137_s2 + $0xb84] sm:$0xf]  ;;  %v6378_v39 = vld [vmem:[%s10137_s2 + $0xb90] sm:$0xf0]  ;;  %v6253_v3 = vor.u32 %v6825_v29, %v6250_v30 }
 0x3f6   : > { %v5978_v57 = vld [vmem:[%s10137_s2 + $0x870] sm:$0xf0]  ;;  %v6821_v44 = vld [vmem:[%s10137_s2 + $0xa64] sm:$0xf] }
 0x3f7   : > { %3914 = vmatpush.bf16.msrb.mxu0 %v5961_v8  ;;  %3928 = vmatpush.bf16.msrb.mxu1 %v6089_v26  ;;  %v6029_v8 = vor.u32 %v6769_v31, %v6026_v32  ;;  %v6157_v26 = vor.u32 %v6801_v0, %v6154_v60  ;;  %v6234_v9 = vld [vmem:[%s10137_s2 + $0xa70] sm:$0xf0]  ;;  %v6753_v31 = vld [vmem:[%s10137_s2 + $0x844] sm:$0xf] }
 0x3f8   : > { %3942 = vmatpush.bf16.msrb.mxu2 %v6217_v38  ;;  %3956 = vmatpush.bf16.msrb.mxu3 %v6345_v49  ;;  %v6285_v38 = vor.u32 %v6833_v1, %v6282_v2  ;;  %v6413_v49 = vor.u32 %v6865_v24, %v6410_v61  ;;  %v5962_v32 = vld [vmem:[%s10137_s2 + $0x850] sm:$0xf0]  ;;  %v6785_v0 = vld [vmem:[%s10137_s2 + $0x944] sm:$0xf] }
 0x3f9   : > { %v6090_v60 = vld [vmem:[%s10137_s2 + $0x950] sm:$0xf0]  ;;  %v6817_v1 = vld [vmem:[%s10137_s2 + $0xa44] sm:$0xf] }
 0x3fa   : > { %v6218_v61 = vld [vmem:[%s10137_s2 + $0xa50] sm:$0xf0] }
 0x3fb   : > { %3915 = vmatpush.bf16.msrb.mxu0 %v5945_v27  ;;  %3929 = vmatpush.bf16.msrb.mxu1 %v6073_v28  ;;  %v6141_v27 = vor.u32 %v6797_v52, %v6138_v15  ;;  %v6761_v28 = vld [vmem:[%s10137_s2 + $0x884] sm:$0xf]  ;;  %v6093_v52 = vor.u32 %v6785_v0, %v6090_v60  ;;  %v5946_v51 = vld [vmem:[%s10137_s2 + $0x830] sm:$0xf0]  ;;  %v6221_v5 = vor.u32 %v6817_v1, %v6218_v61 }
 0x3fc   : > { %3943 = vmatpush.bf16.msrb.mxu2 %v6201_v42  ;;  %3957 = vmatpush.bf16.msrb.mxu3 %v6329_v54  ;;  %v6793_v42 = vld [vmem:[%s10137_s2 + $0x984] sm:$0xf]  ;;  %v6122_v54 = vld [vmem:[%s10137_s2 + $0x990] sm:$0xf0]  ;;  %v5997_v10 = vor.u32 %v6761_v28, %v5994_v18 }
 0x3fd   : > { %v6125_v48 = vor.u32 %v6793_v42, %v6122_v54  ;;  %v6749_v15 = vld [vmem:[%s10137_s2 + $0x824] sm:$0xf]  ;;  %v6330_v42 = vld [vmem:[%s10137_s2 + $0xb30] sm:$0xf0] }
 0x3fe   : > { %v6813_v28 = vld [vmem:[%s10137_s2 + $0xa24] sm:$0xf]  ;;  %v5949_v29 = vor.u32 %v6749_v15, %v5946_v51 }
 0x3ff   : > { %3916 = vmatpush.bf16.msrb.mxu0 %v5929_v4  ;;  %3930 = vmatpush.bf16.msrb.mxu1 %v6057_v6  ;;  %v2897_v37 = vpop.f32.mrf.mxu0  ;;  %v2911_v41 = vpop.f32.mrf.mxu1  ;;  %v6381_v4 = vor.u32 %v6857_v56, %v6378_v39  ;;  %v6789_v6 = vld [vmem:[%s10137_s2 + $0x964] sm:$0xf]  ;;  %v5930_v56 = vld [vmem:[%s10137_s2 + $0x810] sm:$0xf0] }
 0x400   : > { %3944 = vmatpush.bf16.msrb.mxu2 %v6185_v13  ;;  %3958 = vmatpush.bf16.msrb.mxu3 %v6313_v20  ;;  %v2898_v17 = vadd.f32 %v2897_v37, %v8914_v22  ;;  %v6106_v22 = vld [vmem:[%s10137_s2 + $0x970] sm:$0xf0]  ;;  %v6853_v13 = vld [vmem:[%s10137_s2 + $0xb64] sm:$0xf] }
 0x401   : > { %v6362_v20 = vld [vmem:[%s10137_s2 + $0xb70] sm:$0xf0]  ;;  %v6745_v54 = vld [vmem:[%s10137_s2 + $0x804] sm:$0xf] }
 0x402   : > { %3917 = vmatmul.bf16.vlgmr.msrb.gmra.mxu0 %v8091_v14  ;;  %3931 = vmatmul.bf16.vlgmr.msrb.gmra.mxu1 %v8094_v23  ;;  %v2912_v46 = vadd.f32 %v2911_v41, %v2898_v17  ;;  %v6777_v39 = vld [vmem:[%s10137_s2 + $0x904] sm:$0xf]  ;;  %v6058_v37 = vld [vmem:[%s10137_s2 + $0x910] sm:$0xf0] }
 0x403   : > { %3965 = vmatpush.bf16.msra.mxu0 %v6045_v21  ;;  %3979 = vmatpush.bf16.msra.mxu1 %v6173_v25  ;;  %v5981_v21 = vor.u32 %v6757_v55, %v5978_v57  ;;  %v6109_v25 = vor.u32 %v6789_v6, %v6106_v22  ;;  %v6841_v55 = vld [vmem:[%s10137_s2 + $0xb04] sm:$0xf]  ;;  %v6776_v6 = vld [vmem:[%s10137_s2 + $0x8f4] sm:$0xf0] }
 0x404   : > { %3993 = vmatpush.bf16.msra.mxu2 %v6301_v62  ;;  %4007 = vmatpush.bf16.msra.mxu3 %v6429_v63  ;;  %v6237_v62 = vor.u32 %v6821_v44, %v6234_v9  ;;  %v6365_v63 = vor.u32 %v6853_v13, %v6362_v20  ;;  %v6176_v44 = vld [vmem:[%s10137_s2 + $0x9e8] sm:$0xf]  ;;  %v5933_v20 = vor.u32 %v6745_v54, %v5930_v56  ;;  %v6764_v56 = vld [vmem:[%s10137_s2 + $0x894] sm:$0xf0] }
 0x405   : > { %3945 = vmatmul.bf16.vlgmr.msrb.gmra.mxu2 %v8130_v43  ;;  %3959 = vmatmul.bf16.vlgmr.msrb.gmra.mxu3 %v8133_v45  ;;  %v6304_v9 = vld [vmem:[%s10137_s2 + $0xae8] sm:$0xf] }
 0x407   : > { %3966 = vmatpush.bf16.msra.mxu0 %v6029_v8  ;;  %3980 = vmatpush.bf16.msra.mxu1 %v6157_v26  ;;  %v6849_v8 = vld [vmem:[%s10137_s2 + $0xb44] sm:$0xf]  ;;  %v6346_v26 = vld [vmem:[%s10137_s2 + $0xb50] sm:$0xf0]  ;;  %v2899_v40 = vpop.f32.mrf.mxu0  ;;  %v2913_v47 = vpop.f32.mrf.mxu1 }
 0x408   : > { %3994 = vmatpush.bf16.msra.mxu2 %v6285_v38  ;;  %4008 = vmatpush.bf16.msra.mxu3 %v6413_v49  ;;  %v2925_v2 = vpop.f32.mrf.mxu2  ;;  %v2939_v24 = vpop.f32.mrf.mxu3  ;;  %v2900_v38 = vadd.f32 %v2899_v40, %v8970_v50  ;;  %v5965_v49 = vor.u32 %v6753_v31, %v5962_v32  ;;  %v6781_v50 = vld [vmem:[%s10137_s2 + $0x924] sm:$0xf]  ;;  %v6432_v31 = vld [vmem:[%s10137_s2 + $0xbe8] sm:$0xf]  ;;  %v6872_v32 = vld [vmem:[%s10137_s2 + $0xbf4] sm:$0xf0] }
 0x409   : > { %v2926_v53 = vadd.f32 %v2925_v2, %v2912_v46  ;;  %v6808_v46 = vld [vmem:[%s10137_s2 + $0x9f4] sm:$0xf0]  ;;  %v6032_v2 = vld [vmem:[%s10137_s2 + $0x8c8] sm:$0xf] }
 0x40a   : > { %v2914_v18 = vadd.f32 %v2913_v47, %v2900_v38  ;;  %v6177_v1 = vor.u32 %v6808_v46, %v6176_v44  ;;  %v6288_v40 = vld [vmem:[%s10137_s2 + $0xac8] sm:$0xf]  ;;  %v6836_v38 = vld [vmem:[%s10137_s2 + $0xad4] sm:$0xf0] }
 0x40b   : > { %3967 = vmatpush.bf16.msra.mxu0 %v6013_v16  ;;  %3981 = vmatpush.bf16.msra.mxu1 %v6141_v27  ;;  %v9544_v34 = vadd.f32 %v2939_v24, %v2926_v53  ;;  %v6349_v16 = vor.u32 %v6849_v8, %v6346_v26  ;;  %v6074_v27 = vld [vmem:[%s10137_s2 + $0x930] sm:$0xf0]  ;;  %v6772_v24 = vld [vmem:[%s10137_s2 + $0x8d4] sm:$0xf0]  ;;  %v6433_v8 = vor.u32 %v6872_v32, %v6432_v31  ;;  %v6160_v26 = vld [vmem:[%s10137_s2 + $0x9c8] sm:$0xf] }
 0x40c   : > { %3995 = vmatpush.bf16.msra.mxu2 %v6269_v59  ;;  %4009 = vmatpush.bf16.msra.mxu3 %v6397_v35  ;;  %v6202_v59 = vld [vmem:[%s10137_s2 + $0xa30] sm:$0xf0]  ;;  %v6845_v35 = vld [vmem:[%s10137_s2 + $0xb24] sm:$0xf]  ;;  %v6077_v30 = vor.u32 %v6781_v50, %v6074_v27  ;;  %v6804_v53 = vld [vmem:[%s10137_s2 + $0x9d4] sm:$0xf0]  ;;  %v6033_v15 = vor.u32 %v6772_v24, %v6032_v2 }
 0x40d   : > { %v6205_v41 = vor.u32 %v6813_v28, %v6202_v59  ;;  %v6333_v17 = vor.u32 %v6845_v35, %v6330_v42  ;;  %v6161_v51 = vor.u32 %v6804_v53, %v6160_v26  ;;  %v6016_v47 = vld [vmem:[%s10137_s2 + $0x8a8] sm:$0xf]  ;;  %v6800_v28 = vld [vmem:[%s10137_s2 + $0x9b4] sm:$0xf0] }
 0x40e   : > { %v6144_v27 = vld [vmem:[%s10137_s2 + $0x9a8] sm:$0xf]  ;;  %v6832_v59 = vld [vmem:[%s10137_s2 + $0xab4] sm:$0xf0] }
 0x40f   : > { %3968 = vmatpush.bf16.msra.mxu0 %v5997_v10  ;;  %3982 = vmatpush.bf16.msra.mxu1 %v6125_v48  ;;  %v6809_v10 = vld [vmem:[%s10137_s2 + $0xa04] sm:$0xf]  ;;  %v6186_v48 = vld [vmem:[%s10137_s2 + $0xa10] sm:$0xf0]  ;;  %v6400_v35 = vld [vmem:[%s10137_s2 + $0xba8] sm:$0xf] }
 0x410   : > { %3996 = vmatpush.bf16.msra.mxu2 %v6253_v3  ;;  %4010 = vmatpush.bf16.msra.mxu3 %v6381_v4  ;;  %v2927_v57 = vpop.f32.mrf.mxu2  ;;  %v6314_v3 = vld [vmem:[%s10137_s2 + $0xb10] sm:$0xf0]  ;;  %v6048_v4 = vld [vmem:[%s10137_s2 + $0x8e8] sm:$0xf]  ;;  %v2941_v13 = vpop.f32.mrf.mxu3  ;;  %v6864_v42 = vld [vmem:[%s10137_s2 + $0xbb4] sm:$0xf0] }
 0x411   : > { %v2928_v22 = vadd.f32 %v2927_v57, %v2914_v18  ;;  %v6317_v0 = vor.u32 %v6841_v55, %v6314_v3  ;;  %v6049_v60 = vor.u32 %v6776_v6, %v6048_v4  ;;  %v6272_v18 = vld [vmem:[%s10137_s2 + $0xaa8] sm:$0xf]  ;;  %v6860_v57 = vld [vmem:[%s10137_s2 + $0xb94] sm:$0xf0] }
 0x412   : > { %v6384_v55 = vld [vmem:[%s10137_s2 + $0xb88] sm:$0xf]  ;;  %v6824_v32 = vld [vmem:[%s10137_s2 + $0xa74] sm:$0xf0] }
 0x413   : > { %3969 = vmatpush.bf16.msra.mxu0 %v5981_v21  ;;  %3983 = vmatpush.bf16.msra.mxu1 %v6109_v25  ;;  %v6061_v21 = vor.u32 %v6777_v39, %v6058_v37  ;;  %v6840_v25 = vld [vmem:[%s10137_s2 + $0xaf4] sm:$0xf0]  ;;  %v6273_v39 = vor.u32 %v6832_v59, %v6272_v18  ;;  %v6401_v37 = vor.u32 %v6864_v42, %v6400_v35  ;;  %v5984_v46 = vld [vmem:[%s10137_s2 + $0x868] sm:$0xf] }
 0x414   : > { %3997 = vmatpush.bf16.msra.mxu2 %v6237_v62  ;;  %4011 = vmatpush.bf16.msra.mxu3 %v6365_v63  ;;  %v9612_v62 = vadd.f32 %v2941_v13, %v2928_v22  ;;  %v6189_v63 = vor.u32 %v6809_v10, %v6186_v48  ;;  %v6305_v61 = vor.u32 %v6840_v25, %v6304_v9  ;;  %v6256_v10 = vld [vmem:[%s10137_s2 + $0xa88] sm:$0xf]  ;;  %v6828_v48 = vld [vmem:[%s10137_s2 + $0xa94] sm:$0xf0] }
 0x415   : > { %v6760_v9 = vld [vmem:[%s10137_s2 + $0x874] sm:$0xf0]  ;;  %v6257_v13 = vor.u32 %v6828_v48, %v6256_v10  ;;  %v6240_v25 = vld [vmem:[%s10137_s2 + $0xa68] sm:$0xf] }
 0x416   : > { %v5968_v2 = vld [vmem:[%s10137_s2 + $0x848] sm:$0xf]  ;;  %v6756_v24 = vld [vmem:[%s10137_s2 + $0x854] sm:$0xf0] }
 0x417   : > { %3970 = vmatpush.bf16.msra.mxu0 %v5965_v49  ;;  %3984 = vmatpush.bf16.msra.mxu1 %v6093_v52  ;;  %v6416_v49 = vld [vmem:[%s10137_s2 + $0xbc8] sm:$0xf]  ;;  %v6868_v52 = vld [vmem:[%s10137_s2 + $0xbd4] sm:$0xf0] }
 0x418   : > { %3998 = vmatpush.bf16.msra.mxu2 %v6221_v5  ;;  %4012 = vmatpush.bf16.msra.mxu3 %v6349_v16  ;;  %v6768_v5 = vld [vmem:[%s10137_s2 + $0x8b4] sm:$0xf0]  ;;  %v6289_v16 = vor.u32 %v6836_v38, %v6288_v40  ;;  %v6417_v50 = vor.u32 %v6868_v52, %v6416_v49  ;;  %v6096_v26 = vld [vmem:[%s10137_s2 + $0x948] sm:$0xf] }
 0x419   : > { %v6017_v54 = vor.u32 %v6768_v5, %v6016_v47  ;;  %v6788_v53 = vld [vmem:[%s10137_s2 + $0x954] sm:$0xf0]  ;;  %v6224_v40 = vld [vmem:[%s10137_s2 + $0xa48] sm:$0xf] }
 0x41a   : > { %v6820_v52 = vld [vmem:[%s10137_s2 + $0xa54] sm:$0xf0] }
 0x41b   : > { %3971 = vmatpush.bf16.msra.mxu0 %v5949_v29  ;;  %3985 = vmatpush.bf16.msra.mxu1 %v6077_v30  ;;  %v6145_v29 = vor.u32 %v6800_v28, %v6144_v27  ;;  %v6000_v30 = vld [vmem:[%s10137_s2 + $0x888] sm:$0xf]  ;;  %v6097_v27 = vor.u32 %v6788_v53, %v6096_v26  ;;  %v6752_v18 = vld [vmem:[%s10137_s2 + $0x834] sm:$0xf0]  ;;  %v6225_v42 = vor.u32 %v6820_v52, %v6224_v40 }
 0x41c   : > { %3999 = vmatpush.bf16.msra.mxu2 %v6205_v41  ;;  %4013 = vmatpush.bf16.msra.mxu3 %v6333_v17  ;;  %v6128_v41 = vld [vmem:[%s10137_s2 + $0x988] sm:$0xf]  ;;  %v6796_v17 = vld [vmem:[%s10137_s2 + $0x994] sm:$0xf0]  ;;  %v6001_v22 = vor.u32 %v6764_v56, %v6000_v30 }
 0x41d   : > { %v6129_v44 = vor.u32 %v6796_v17, %v6128_v41  ;;  %v5952_v28 = vld [vmem:[%s10137_s2 + $0x828] sm:$0xf]  ;;  %v6848_v41 = vld [vmem:[%s10137_s2 + $0xb34] sm:$0xf0] }
 0x41e   : > { %v6208_v30 = vld [vmem:[%s10137_s2 + $0xa28] sm:$0xf]  ;;  %v5953_v10 = vor.u32 %v6752_v18, %v5952_v28 }
 0x41f   : > { %3972 = vmatpush.bf16.msra.mxu0 %v5933_v20  ;;  %3986 = vmatpush.bf16.msra.mxu1 %v6061_v21  ;;  %v2953_v3 = vpop.f32.mrf.mxu0  ;;  %v2967_v4 = vpop.f32.mrf.mxu1  ;;  %v6385_v20 = vor.u32 %v6860_v57, %v6384_v55  ;;  %v6112_v21 = vld [vmem:[%s10137_s2 + $0x968] sm:$0xf]  ;;  %v6748_v55 = vld [vmem:[%s10137_s2 + $0x814] sm:$0xf0] }
 0x420   : > { %4000 = vmatpush.bf16.msra.mxu2 %v6189_v63  ;;  %4014 = vmatpush.bf16.msra.mxu3 %v6317_v0  ;;  %v2954_v6 = vadd.f32 %v2953_v3, %v9032_v11  ;;  %v6792_v11 = vld [vmem:[%s10137_s2 + $0x974] sm:$0xf0]  ;;  %v6368_v63 = vld [vmem:[%s10137_s2 + $0xb68] sm:$0xf] }
 0x421   : > { %v6856_v0 = vld [vmem:[%s10137_s2 + $0xb74] sm:$0xf0]  ;;  %v5936_v17 = vld [vmem:[%s10137_s2 + $0x808] sm:$0xf] }
 0x422   : > { %3973 = vmatmul.bf16.vlgmr.msra.gmra.mxu0 %v8091_v14  ;;  %3987 = vmatmul.bf16.vlgmr.msra.gmra.mxu1 %v8094_v23  ;;  %v2968_v31 = vadd.f32 %v2967_v4, %v2954_v6  ;;  %v6064_v57 = vld [vmem:[%s10137_s2 + $0x908] sm:$0xf]  ;;  %v6780_v3 = vld [vmem:[%s10137_s2 + $0x914] sm:$0xf0] }
 0x423   : > { %4021 = vmatpush.bf16.msrb.mxu0 %v6049_v60  ;;  %4035 = vmatpush.bf16.msrb.mxu1 %v6177_v1  ;;  %v5985_v60 = vor.u32 %v6760_v9, %v5984_v46  ;;  %v6113_v1 = vor.u32 %v6792_v11, %v6112_v21  ;;  %v6320_v46 = vld [vmem:[%s10137_s2 + $0xb08] sm:$0xf]  ;;  %v6050_v21 = vld [vmem:[%s10137_s2 + $0x8f8] sm:$0xf0] }
 0x424   : > { %4049 = vmatpush.bf16.msrb.mxu2 %v6305_v61  ;;  %4063 = vmatpush.bf16.msrb.mxu3 %v6433_v8  ;;  %v6241_v61 = vor.u32 %v6824_v32, %v6240_v25  ;;  %v6369_v8 = vor.u32 %v6856_v0, %v6368_v63  ;;  %v6806_v25 = vld [vmem:[%s10137_s2 + $0x9ec] sm:$0xf]  ;;  %v5937_v0 = vor.u32 %v6748_v55, %v5936_v17  ;;  %v6002_v55 = vld [vmem:[%s10137_s2 + $0x898] sm:$0xf0] }
 0x425   : > { %4001 = vmatmul.bf16.vlgmr.msra.gmra.mxu2 %v8130_v43  ;;  %4015 = vmatmul.bf16.vlgmr.msra.gmra.mxu3 %v8133_v45  ;;  %v6838_v32 = vld [vmem:[%s10137_s2 + $0xaec] sm:$0xf] }
 0x427   : > { %4022 = vmatpush.bf16.msrb.mxu0 %v6033_v15  ;;  %4036 = vmatpush.bf16.msrb.mxu1 %v6161_v51  ;;  %v6352_v15 = vld [vmem:[%s10137_s2 + $0xb48] sm:$0xf]  ;;  %v6852_v51 = vld [vmem:[%s10137_s2 + $0xb54] sm:$0xf0]  ;;  %v2955_v5 = vpop.f32.mrf.mxu0  ;;  %v2969_v35 = vpop.f32.mrf.mxu1 }
 0x428   : > { %4050 = vmatpush.bf16.msrb.mxu2 %v6289_v16  ;;  %4064 = vmatpush.bf16.msrb.mxu3 %v6417_v50  ;;  %v2981_v38 = vpop.f32.mrf.mxu2  ;;  %v2995_v49 = vpop.f32.mrf.mxu3  ;;  %v2956_v16 = vadd.f32 %v2955_v5, %v9086_v58  ;;  %v5969_v50 = vor.u32 %v6756_v24, %v5968_v2  ;;  %v6080_v58 = vld [vmem:[%s10137_s2 + $0x928] sm:$0xf]  ;;  %v6870_v2 = vld [vmem:[%s10137_s2 + $0xbec] sm:$0xf]  ;;  %v6434_v24 = vld [vmem:[%s10137_s2 + $0xbf8] sm:$0xf0] }
 0x429   : > { %v2982_v47 = vadd.f32 %v2981_v38, %v2968_v31  ;;  %v6178_v31 = vld [vmem:[%s10137_s2 + $0x9f8] sm:$0xf0]  ;;  %v6770_v38 = vld [vmem:[%s10137_s2 + $0x8cc] sm:$0xf] }
 0x42a   : > { %v2970_v56 = vadd.f32 %v2969_v35, %v2956_v16  ;;  %v6181_v40 = vor.u32 %v6806_v25, %v6178_v31  ;;  %v6834_v5 = vld [vmem:[%s10137_s2 + $0xacc] sm:$0xf]  ;;  %v6290_v16 = vld [vmem:[%s10137_s2 + $0xad8] sm:$0xf0] }
 0x42b   : > { %4023 = vmatpush.bf16.msrb.mxu0 %v6017_v54  ;;  %4037 = vmatpush.bf16.msrb.mxu1 %v6145_v29  ;;  %v9746_v59 = vadd.f32 %v2995_v49, %v2982_v47  ;;  %v6353_v54 = vor.u32 %v6852_v51, %v6352_v15  ;;  %v6784_v29 = vld [vmem:[%s10137_s2 + $0x934] sm:$0xf0]  ;;  %v6034_v49 = vld [vmem:[%s10137_s2 + $0x8d8] sm:$0xf0]  ;;  %v6437_v15 = vor.u32 %v6870_v2, %v6434_v24  ;;  %v6802_v51 = vld [vmem:[%s10137_s2 + $0x9cc] sm:$0xf] }
 0x42c   : > { %4051 = vmatpush.bf16.msrb.mxu2 %v6273_v39  ;;  %4065 = vmatpush.bf16.msrb.mxu3 %v6401_v37  ;;  %v6816_v39 = vld [vmem:[%s10137_s2 + $0xa34] sm:$0xf0]  ;;  %v6336_v37 = vld [vmem:[%s10137_s2 + $0xb28] sm:$0xf]  ;;  %v6081_v48 = vor.u32 %v6784_v29, %v6080_v58  ;;  %v6162_v47 = vld [vmem:[%s10137_s2 + $0x9d8] sm:$0xf0]  ;;  %v6037_v28 = vor.u32 %v6770_v38, %v6034_v49 }
 0x42d   : > { %v6209_v4 = vor.u32 %v6816_v39, %v6208_v30  ;;  %v6337_v6 = vor.u32 %v6848_v41, %v6336_v37  ;;  %v6165_v18 = vor.u32 %v6802_v51, %v6162_v47  ;;  %v6766_v35 = vld [vmem:[%s10137_s2 + $0x8ac] sm:$0xf]  ;;  %v6146_v30 = vld [vmem:[%s10137_s2 + $0x9b8] sm:$0xf0] }
 0x42e   : > { %v6798_v29 = vld [vmem:[%s10137_s2 + $0x9ac] sm:$0xf]  ;;  %v6274_v39 = vld [vmem:[%s10137_s2 + $0xab8] sm:$0xf0] }
 0x42f   : > { %4024 = vmatpush.bf16.msrb.mxu0 %v6001_v22  ;;  %4038 = vmatpush.bf16.msrb.mxu1 %v6129_v44  ;;  %v6192_v22 = vld [vmem:[%s10137_s2 + $0xa08] sm:$0xf]  ;;  %v6812_v44 = vld [vmem:[%s10137_s2 + $0xa14] sm:$0xf0]  ;;  %v6862_v37 = vld [vmem:[%s10137_s2 + $0xbac] sm:$0xf] }
 0x430   : > { %4052 = vmatpush.bf16.msrb.mxu2 %v6257_v13  ;;  %4066 = vmatpush.bf16.msrb.mxu3 %v6385_v20  ;;  %v2983_v9 = vpop.f32.mrf.mxu2  ;;  %v6844_v13 = vld [vmem:[%s10137_s2 + $0xb14] sm:$0xf0]  ;;  %v6774_v20 = vld [vmem:[%s10137_s2 + $0x8ec] sm:$0xf]  ;;  %v2997_v63 = vpop.f32.mrf.mxu3  ;;  %v6402_v41 = vld [vmem:[%s10137_s2 + $0xbb8] sm:$0xf0] }
 0x431   : > { %v2984_v11 = vadd.f32 %v2983_v9, %v2970_v56  ;;  %v6321_v26 = vor.u32 %v6844_v13, %v6320_v46  ;;  %v6053_v53 = vor.u32 %v6774_v20, %v6050_v21  ;;  %v6830_v56 = vld [vmem:[%s10137_s2 + $0xaac] sm:$0xf]  ;;  %v6386_v9 = vld [vmem:[%s10137_s2 + $0xb98] sm:$0xf0] }
 0x432   : > { %v6858_v46 = vld [vmem:[%s10137_s2 + $0xb8c] sm:$0xf]  ;;  %v6242_v24 = vld [vmem:[%s10137_s2 + $0xa78] sm:$0xf0] }
 0x433   : > { %4025 = vmatpush.bf16.msrb.mxu0 %v5985_v60  ;;  %4039 = vmatpush.bf16.msrb.mxu1 %v6113_v1  ;;  %v6065_v60 = vor.u32 %v6780_v3, %v6064_v57  ;;  %v6306_v1 = vld [vmem:[%s10137_s2 + $0xaf8] sm:$0xf0]  ;;  %v6277_v57 = vor.u32 %v6830_v56, %v6274_v39  ;;  %v6405_v3 = vor.u32 %v6862_v37, %v6402_v41  ;;  %v6758_v31 = vld [vmem:[%s10137_s2 + $0x86c] sm:$0xf] }
 0x434   : > { %4053 = vmatpush.bf16.msrb.mxu2 %v6241_v61  ;;  %4067 = vmatpush.bf16.msrb.mxu3 %v6369_v8  ;;  %v9814_v61 = vadd.f32 %v2997_v63, %v2984_v11  ;;  %v6193_v8 = vor.u32 %v6812_v44, %v6192_v22  ;;  %v6309_v52 = vor.u32 %v6838_v32, %v6306_v1  ;;  %v6826_v22 = vld [vmem:[%s10137_s2 + $0xa8c] sm:$0xf]  ;;  %v6258_v44 = vld [vmem:[%s10137_s2 + $0xa98] sm:$0xf0] }
 0x435   : > { %v5986_v32 = vld [vmem:[%s10137_s2 + $0x878] sm:$0xf0]  ;;  %v6261_v63 = vor.u32 %v6826_v22, %v6258_v44  ;;  %v6822_v1 = vld [vmem:[%s10137_s2 + $0xa6c] sm:$0xf] }
 0x436   : > { %v6754_v38 = vld [vmem:[%s10137_s2 + $0x84c] sm:$0xf]  ;;  %v5970_v49 = vld [vmem:[%s10137_s2 + $0x858] sm:$0xf0] }
 0x437   : > { %4026 = vmatpush.bf16.msrb.mxu0 %v5969_v50  ;;  %4040 = vmatpush.bf16.msrb.mxu1 %v6097_v27  ;;  %v6866_v50 = vld [vmem:[%s10137_s2 + $0xbcc] sm:$0xf]  ;;  %v6418_v27 = vld [vmem:[%s10137_s2 + $0xbd8] sm:$0xf0] }
 0x438   : > { %4054 = vmatpush.bf16.msrb.mxu2 %v6225_v42  ;;  %4068 = vmatpush.bf16.msrb.mxu3 %v6353_v54  ;;  %v6018_v42 = vld [vmem:[%s10137_s2 + $0x8b8] sm:$0xf0]  ;;  %v6293_v54 = vor.u32 %v6834_v5, %v6290_v16  ;;  %v6421_v58 = vor.u32 %v6866_v50, %v6418_v27  ;;  %v6786_v51 = vld [vmem:[%s10137_s2 + $0x94c] sm:$0xf] }
 0x439   : > { %v6021_v17 = vor.u32 %v6766_v35, %v6018_v42  ;;  %v6098_v47 = vld [vmem:[%s10137_s2 + $0x958] sm:$0xf0]  ;;  %v6818_v5 = vld [vmem:[%s10137_s2 + $0xa4c] sm:$0xf] }
 0x43a   : > { %v6226_v27 = vld [vmem:[%s10137_s2 + $0xa58] sm:$0xf0]  ;;  %v6746_v44 = vld [vmem:[%s10137_s2 + $0x80c] sm:$0xf] }
 0x43b   : > { %4027 = vmatpush.bf16.msrb.mxu0 %v5953_v10  ;;  %4041 = vmatpush.bf16.msrb.mxu1 %v6081_v48  ;;  %v6149_v10 = vor.u32 %v6798_v29, %v6146_v30  ;;  %v6762_v48 = vld [vmem:[%s10137_s2 + $0x88c] sm:$0xf]  ;;  %v6101_v29 = vor.u32 %v6786_v51, %v6098_v47  ;;  %v5954_v56 = vld [vmem:[%s10137_s2 + $0x838] sm:$0xf0]  ;;  %v6229_v41 = vor.u32 %v6818_v5, %v6226_v27 }
 0x43c   : > { %4055 = vmatpush.bf16.msrb.mxu2 %v6209_v4  ;;  %4069 = vmatpush.bf16.msrb.mxu3 %v6337_v6  ;;  %v6794_v4 = vld [vmem:[%s10137_s2 + $0x98c] sm:$0xf]  ;;  %v6130_v6 = vld [vmem:[%s10137_s2 + $0x998] sm:$0xf0]  ;;  %v6005_v11 = vor.u32 %v6762_v48, %v6002_v55 }
 0x43d   : > { %v6133_v25 = vor.u32 %v6794_v4, %v6130_v6  ;;  %v6750_v30 = vld [vmem:[%s10137_s2 + $0x82c] sm:$0xf]  ;;  %v6338_v4 = vld [vmem:[%s10137_s2 + $0xb38] sm:$0xf0] }
 0x43e   : > { %v6814_v48 = vld [vmem:[%s10137_s2 + $0xa2c] sm:$0xf]  ;;  %v5957_v6 = vor.u32 %v6750_v30, %v5954_v56 }
 0x43f   : > { %4028 = vmatpush.bf16.msrb.mxu0 %v5937_v0  ;;  %4042 = vmatpush.bf16.msrb.mxu1 %v6065_v60  ;;  %v3009_v13 = vpop.f32.mrf.mxu0  ;;  %v3023_v20 = vpop.f32.mrf.mxu1  ;;  %v6389_v0 = vor.u32 %v6858_v46, %v6386_v9  ;;  %v6790_v60 = vld [vmem:[%s10137_s2 + $0x96c] sm:$0xf]  ;;  %v5938_v46 = vld [vmem:[%s10137_s2 + $0x818] sm:$0xf0] }
 0x440   : > { %4056 = vmatpush.bf16.msrb.mxu2 %v6193_v8  ;;  %4070 = vmatpush.bf16.msrb.mxu3 %v6321_v26  ;;  %v3010_v21 = vadd.f32 %v3009_v13, %v9142_v33  ;;  %v6114_v33 = vld [vmem:[%s10137_s2 + $0x978] sm:$0xf0]  ;;  %v6854_v8 = vld [vmem:[%s10137_s2 + $0xb6c] sm:$0xf] }
 0x441   : > { %v6370_v26 = vld [vmem:[%s10137_s2 + $0xb78] sm:$0xf0] }
 0x442   : > { %4029 = vmatmul.bf16.vlgmr.msrb.gmra.mxu0 %v8091_v14  ;;  %4043 = vmatmul.bf16.vlgmr.msrb.gmra.mxu1 %v8094_v23  ;;  %v3024_v2 = vadd.f32 %v3023_v20, %v3010_v21  ;;  %v6778_v20 = vld [vmem:[%s10137_s2 + $0x90c] sm:$0xf]  ;;  %v6066_v21 = vld [vmem:[%s10137_s2 + $0x918] sm:$0xf0] }
 0x443   : > { %4077 = vmatpush.bf16.msra.mxu0 %v6053_v53  ;;  %4091 = vmatpush.bf16.msra.mxu1 %v6181_v40  ;;  %v5989_v53 = vor.u32 %v6758_v31, %v5986_v32  ;;  %v6117_v40 = vor.u32 %v6790_v60, %v6114_v33  ;;  %v6194_v31 = vld [vmem:[%s10137_s2 + $0xa18] sm:$0xf0]  ;;  %v6842_v32 = vld [vmem:[%s10137_s2 + $0xb0c] sm:$0xf]  ;;  %v5941_v33 = vor.u32 %v6746_v44, %v5938_v46 }
 0x444   : > { %4105 = vmatpush.bf16.msra.mxu2 %v6309_v52  ;;  %4119 = vmatpush.bf16.msra.mxu3 %v6437_v15  ;;  %v6245_v52 = vor.u32 %v6822_v1, %v6242_v24  ;;  %v6373_v15 = vor.u32 %v6854_v8, %v6370_v26  ;;  %v6069_v1 = vor.u32 %v6778_v20, %v6066_v21 }
 0x445   : > { %4057 = vmatmul.bf16.vlgmr.msrb.gmra.mxu2 %v8130_v43  ;;  %4071 = vmatmul.bf16.vlgmr.msrb.gmra.mxu3 %v8133_v45 }
 0x447   : > { %4078 = vmatpush.bf16.msra.mxu0 %v6037_v28  ;;  %4092 = vmatpush.bf16.msra.mxu1 %v6165_v18  ;;  %v6850_v28 = vld [vmem:[%s10137_s2 + $0xb4c] sm:$0xf]  ;;  %v6354_v18 = vld [vmem:[%s10137_s2 + $0xb58] sm:$0xf0]  ;;  %v3011_v42 = vpop.f32.mrf.mxu0  ;;  %v3025_v37 = vpop.f32.mrf.mxu1 }
 0x448   : > { %4106 = vmatpush.bf16.msra.mxu2 %v6293_v54  ;;  %4120 = vmatpush.bf16.msra.mxu3 %v6421_v58  ;;  %v3037_v16 = vpop.f32.mrf.mxu2  ;;  %v3051_v50 = vpop.f32.mrf.mxu3  ;;  %v3012_v54 = vadd.f32 %v3011_v42, %v9210_v7  ;;  %v5973_v58 = vor.u32 %v6754_v38, %v5970_v49  ;;  %v6782_v7 = vld [vmem:[%s10137_s2 + $0x92c] sm:$0xf] }
 0x449   : > { %v3038_v35 = vadd.f32 %v3037_v16, %v3024_v2 }
 0x44a   : > { %v3026_v55 = vadd.f32 %v3025_v37, %v3012_v54 }
 0x44b   : > { %4079 = vmatpush.bf16.msra.mxu0 %v6021_v17  ;;  %4093 = vmatpush.bf16.msra.mxu1 %v6149_v10  ;;  %v9948_v39 = vadd.f32 %v3051_v50, %v3038_v35  ;;  %v6357_v17 = vor.u32 %v6850_v28, %v6354_v18  ;;  %v6082_v10 = vld [vmem:[%s10137_s2 + $0x938] sm:$0xf0] }
 0x44c   : > { %4107 = vmatpush.bf16.msra.mxu2 %v6277_v57  ;;  %4121 = vmatpush.bf16.msra.mxu3 %v6405_v3  ;;  %v6210_v57 = vld [vmem:[%s10137_s2 + $0xa38] sm:$0xf0]  ;;  %v6846_v3 = vld [vmem:[%s10137_s2 + $0xb2c] sm:$0xf]  ;;  %v6085_v22 = vor.u32 %v6782_v7, %v6082_v10 }
 0x44d   : > { %v6213_v9 = vor.u32 %v6814_v48, %v6210_v57  ;;  %v6341_v13 = vor.u32 %v6846_v3, %v6338_v4 }
 0x44f   : > { %4080 = vmatpush.bf16.msra.mxu0 %v6005_v11  ;;  %4094 = vmatpush.bf16.msra.mxu1 %v6133_v25  ;;  %v6810_v11 = vld [vmem:[%s10137_s2 + $0xa0c] sm:$0xf] }
 0x450   : > { %4108 = vmatpush.bf16.msra.mxu2 %v6261_v63  ;;  %4122 = vmatpush.bf16.msra.mxu3 %v6389_v0  ;;  %v3039_v25 = vpop.f32.mrf.mxu2  ;;  %v6322_v63 = vld [vmem:[%s10137_s2 + $0xb18] sm:$0xf0]  ;;  %v3053_v60 = vpop.f32.mrf.mxu3  ;;  %v6197_v24 = vor.u32 %v6810_v11, %v6194_v31 }
 0x451   : > { %v3040_v0 = vadd.f32 %v3039_v25, %v3026_v55  ;;  %v6325_v8 = vor.u32 %v6842_v32, %v6322_v63 }
 0x453   : > { %4081 = vmatpush.bf16.msra.mxu0 %v5989_v53  ;;  %4095 = vmatpush.bf16.msra.mxu1 %v6117_v40  ;;  %v9992_v2 = vadd.f32 %v3053_v60, %v3040_v0 }
 0x454   : > { %4109 = vmatpush.bf16.msra.mxu2 %v6245_v52  ;;  %4123 = vmatpush.bf16.msra.mxu3 %v6373_v15 }
 0x457   : > { %4082 = vmatpush.bf16.msra.mxu0 %v5973_v58  ;;  %4096 = vmatpush.bf16.msra.mxu1 %v6101_v29 }
 0x458   : > { %4110 = vmatpush.bf16.msra.mxu2 %v6229_v41  ;;  %4124 = vmatpush.bf16.msra.mxu3 %v6357_v17 }
 0x45b   : > { %4083 = vmatpush.bf16.msra.mxu0 %v5957_v6  ;;  %4097 = vmatpush.bf16.msra.mxu1 %v6085_v22 }
 0x45c   : > { %4111 = vmatpush.bf16.msra.mxu2 %v6213_v9  ;;  %4125 = vmatpush.bf16.msra.mxu3 %v6341_v13 }
 0x45f   : > { %4084 = vmatpush.bf16.msra.mxu0 %v5941_v33  ;;  %4098 = vmatpush.bf16.msra.mxu1 %v6069_v1  ;;  %v3065_v26 = vpop.f32.mrf.mxu0  ;;  %v3079_v53 = vpop.f32.mrf.mxu1 }
 0x460   : > { %4112 = vmatpush.bf16.msra.mxu2 %v6197_v24  ;;  %4126 = vmatpush.bf16.msra.mxu3 %v6325_v8  ;;  %v3066_v40 = vadd.f32 %v3065_v26, %v9342_v36 }
 0x462   : > { %4085 = vmatmul.bf16.vlgmr.msra.gmra.mxu0 %v8091_v14  ;;  %4099 = vmatmul.bf16.vlgmr.msra.gmra.mxu1 %v8094_v23  ;;  %v3080_v38 = vadd.f32 %v3079_v53, %v3066_v40 }
 0x463   : > { %4113 = vmatmul.bf16.vlgmr.msra.gmra.mxu2 %v8130_v43  ;;  %4127 = vmatmul.bf16.vlgmr.msra.gmra.mxu3 %v8133_v45 }
 0x467   : > { %v3067_v51 = vpop.f32.mrf.mxu0  ;;  %v3081_v14 = vpop.f32.mrf.mxu1 }
 0x468   : > { %v3093_v49 = vpop.f32.mrf.mxu2  ;;  %v3107_v52 = vpop.f32.mrf.mxu3  ;;  %v3068_v47 = vadd.f32 %v3067_v51, %v9410_v12 }
 0x469   : > { %v3094_v15 = vadd.f32 %v3093_v49, %v3080_v38 }
 0x46a   : > { %v3082_v16 = vadd.f32 %v3081_v14, %v3068_v47 }
 0x46b   : > { %v10000_v5 = vadd.f32 %v3107_v52, %v3094_v15 }
 0x470   : > { %v3095_v23 = vpop.f32.mrf.mxu2  ;;  %v3109_v43 = vpop.f32.mrf.mxu3 }
 0x471   : > { %v3096_v50 = vadd.f32 %v3095_v23, %v3082_v16 }
 0x473   : > { %v10002_v27 = vadd.f32 %v3109_v43, %v3096_v50 }
 0x47f   : > { %v3918_v45 = vpop.f32.mrf.mxu0  ;;  %v3932_v28 = vpop.f32.mrf.mxu1 }
 0x480   : > { %v3933_v35 = vadd.f32 %v3932_v28, %v3918_v45 }
 0x487   : > { %v3920_v42 = vpop.f32.mrf.mxu0  ;;  %v3934_v54 = vpop.f32.mrf.mxu1 }
 0x488   : > { %v3946_v18 = vpop.f32.mrf.mxu2  ;;  %v3960_v36 = vpop.f32.mrf.mxu3  ;;  %v3935_v29 = vadd.f32 %v3934_v54, %v3920_v42 }
 0x489   : > { %v3947_v58 = vadd.f32 %v3946_v18, %v3933_v35 }
 0x48b   : > { %v3961_v12 = vadd.f32 %v3960_v36, %v3947_v58 }
 0x48d   : > { %v10005_v17 = vadd.f32 %v3961_v12, %v9544_v34 }
 0x490   : > { %v3948_v30 = vpop.f32.mrf.mxu2  ;;  %v3962_v37 = vpop.f32.mrf.mxu3 }
 0x491   : > { %v3949_v56 = vadd.f32 %v3948_v30, %v3935_v29 }
 0x493   : > { %v3963_v41 = vadd.f32 %v3962_v37, %v3949_v56 }
 0x495   : > { %v10008_v7 = vadd.f32 %v3963_v41, %v9612_v62 }
 0x497   : > { %v4141_v10 = vadd.f32 %v10008_v7, %v10005_v17 }
 0x499   : > { %v4142_v48 = vrot.slane %v4141_v10, 4 }
 0x49b   : > { %v4143_v55 = vadd.f32 %v4142_v48, %v4141_v10 }
 0x49d   : > { %v4144_v57 = vrot.slane %v4143_v55, 2 }
 0x49f   : > { %v4145_v3 = vadd.f32 %v4144_v57, %v4143_v55  ;;  %v3974_v4 = vpop.f32.mrf.mxu0  ;;  %v3988_v6 = vpop.f32.mrf.mxu1 }
 0x4a0   : > { %v3989_v9 = vadd.f32 %v3988_v6, %v3974_v4 }
 0x4a1   : > { %v4146_v22 = vrot.slane %v4145_v3, 1 }
 0x4a3   : > { %v10012_v44 = vadd.f32 %v4146_v22, %v4145_v3 }
 0x4a5   : > { %4169 = vrot.lane.b32.xlu1 %v10012_v44, %s6907_s27 }
 0x4a7   : > { %v3976_v62 = vpop.f32.mrf.mxu0  ;;  %v3990_v13 = vpop.f32.mrf.mxu1 }
 0x4a8   : > { %v4002_v34 = vpop.f32.mrf.mxu2  ;;  %v4016_v46 = vpop.f32.mrf.mxu3  ;;  %v3991_v21 = vadd.f32 %v3990_v13, %v3976_v62 }
 0x4a9   : > { %v4003_v20 = vadd.f32 %v4002_v34, %v3989_v9 }
 0x4ab   : > { %v4017_v25 = vadd.f32 %v4016_v46, %v4003_v20 }
 0x4ad   : > { %v10017_v0 = vadd.f32 %v4017_v25, %v9746_v59 }
 0x4b0   : > { %v4004_v11 = vpop.f32.mrf.mxu2  ;;  %v4018_v32 = vpop.f32.mrf.mxu3 }
 0x4b1   : > { %v4005_v31 = vadd.f32 %v4004_v11, %v3991_v21 }
 0x4b3   : > { %v4019_v63 = vadd.f32 %v4018_v32, %v4005_v31 }
 0x4b5   : > { %v10020_v60 = vadd.f32 %v4019_v63, %v9814_v61 }
 0x4b7   : > { %v4148_v33 = vadd.f32 %v10020_v60, %v10017_v0 }
 0x4b9   : > { %v4149_v1 = vrot.slane %v4148_v33, 4 }
 0x4bb   : > { %v4150_v24 = vadd.f32 %v4149_v1, %v4148_v33 }
 0x4bd   : > { %v4151_v8 = vrot.slane %v4150_v24, 2 }
 0x4bf   : > { %v4152_v26 = vadd.f32 %v4151_v8, %v4150_v24  ;;  %v4030_v53 = vpop.f32.mrf.mxu0  ;;  %v4044_v40 = vpop.f32.mrf.mxu1 }
 0x4c0   : > { %v4045_v59 = vadd.f32 %v4044_v40, %v4030_v53 }
 0x4c1   : > { %v4153_v38 = vrot.slane %v4152_v26, 1 }
 0x4c3   : > { %v4154_v49 = vadd.f32 %v4153_v38, %v4152_v26 }
 0x4c5   : > { %4171 = vrot.lane.b32.xlu2 %v4154_v49, %s6907_s27 }
 0x4c7   : > { %v4032_v51 = vpop.f32.mrf.mxu0  ;;  %v4046_v47 = vpop.f32.mrf.mxu1 }
 0x4c8   : > { %v4058_v52 = vpop.f32.mrf.mxu2  ;;  %v4072_v15 = vpop.f32.mrf.mxu3  ;;  %v4047_v14 = vadd.f32 %v4046_v47, %v4032_v51 }
 0x4c9   : > { %v4059_v61 = vadd.f32 %v4058_v52, %v4045_v59 }
 0x4cb   : > { %v4073_v23 = vadd.f32 %v4072_v15, %v4059_v61 }
 0x4cd   : > { %v10026_v28 = vadd.f32 %v4073_v23, %v9948_v39 }
 0x4d0   : > { %v4060_v16 = vpop.f32.mrf.mxu2  ;;  %v4074_v43 = vpop.f32.mrf.mxu3 }
 0x4d1   : > { %v4061_v50 = vadd.f32 %v4060_v16, %v4047_v14 }
 0x4d3   : > { %v4075_v45 = vadd.f32 %v4074_v43, %v4061_v50 }
 0x4d5   : > { %v10029_v18 = vadd.f32 %v4075_v45, %v9992_v2 }
 0x4d7   : > { %v4155_v36 = vadd.f32 %v10029_v18, %v10026_v28 }
 0x4d9   : > { %v4156_v35 = vrot.slane %v4155_v36, 4 }
 0x4db   : > { %v4157_v42 = vadd.f32 %v4156_v35, %v4155_v36 }
 0x4dd   : > { %v4158_v54 = vrot.slane %v4157_v42, 2 }
 0x4df   : > { %v4086_v58 = vpop.f32.mrf.mxu0  ;;  %v4100_v29 = vpop.f32.mrf.mxu1  ;;  %v4159_v30 = vadd.f32 %v4158_v54, %v4157_v42 }
 0x4e0   : > { %v4101_v39 = vadd.f32 %v4100_v29, %v4086_v58 }
 0x4e1   : > { %v4160_v12 = vrot.slane %v4159_v30, 1 }
 0x4e3   : > { %v4161_v56 = vadd.f32 %v4160_v12, %v4159_v30 }
 0x4e5   : > { %4173 = vrot.lane.b32.xlu0 %v4161_v56, %s6907_s27 }
 0x4e6   : > { %v4114_v37 = vpop.f32.mrf.mxu2  ;;  %v4128_v41 = vpop.f32.mrf.mxu3 }
 0x4e7   : > { %v4088_v10 = vpop.f32.mrf.mxu0  ;;  %v4102_v48 = vpop.f32.mrf.mxu1  ;;  %v4115_v2 = vadd.f32 %v4114_v37, %v4101_v39 }
 0x4e8   : > { %v4103_v55 = vadd.f32 %v4102_v48, %v4088_v10 }
 0x4e9   : > { %v4129_v3 = vadd.f32 %v4128_v41, %v4115_v2 }
 0x4eb   : > { %v4136_v34 = vadd.f32 %v4129_v3, %v10000_v5 }
 0x4ee   : > { %v4116_v57 = vpop.f32.mrf.mxu2  ;;  %v4130_v6 = vpop.f32.mrf.mxu3 }
 0x4ef   : > { %v4117_v4 = vadd.f32 %v4116_v57, %v4103_v55 }
 0x4f1   : > { %v4131_v22 = vadd.f32 %v4130_v6, %v4117_v4 }
 0x4f3   : > { %v4140_v46 = vadd.f32 %v4131_v22, %v10002_v27 }
 0x4f5   : > { %v4162_v9 = vadd.f32 %v4140_v46, %v4136_v34 }
 0x4f7   : > { %v4163_v62 = vrot.slane %v4162_v9, 4 }
 0x4f9   : > { %v4164_v13 = vadd.f32 %v4163_v62, %v4162_v9 }
 0x4fb   : > { %v4165_v20 = vrot.slane %v4164_v13, 2 }
 0x4fd   : > { %v4166_v21 = vadd.f32 %v4165_v20, %v4164_v13 }
 0x4ff   : > { %v4167_v11 = vrot.slane %v4166_v21, 1 }
 0x501   : > { %v4168_v25 = vadd.f32 %v4167_v11, %v4166_v21 }
 0x503   : > { %4175 = vrot.lane.b32.xlu1 %v4168_v25, %s6907_s27 }
 0x517   : > { %v4170_v31 = vpop.permute.xlu1 %4169 }
 0x51f   : > { %v4172_v32 = vpop.permute.xlu2 %4171 }
 0x520   : > { %v4179_v63 = vsel %vm814_vm4, %v4170_v31, %v4172_v32 }
 0x521   : > { %v4182_v33 = vadd.f32 %v4179_v63, %v4154_v49 }
 0x523   : > { %4187 = vrot.lane.b32.xlu0 %v4182_v33, %s6908_s28 }
 0x557   : > { %v4174_v5 = vpop.permute.xlu0 %4173 }
 0x558   : > { %v4178_v27 = vsel %vm814_vm4, %v4172_v32, %v4174_v5 }
 0x559   : > { %v4183_v1 = vadd.f32 %v4178_v27, %v4161_v56 }
 0x55b   : > { %4189 = vrot.lane.b32.xlu1 %v4183_v1, %s6908_s28 }
 0x575   : > { %v4176_v24 = vpop.permute.xlu1 %4175 }
 0x576   : > { %v4180_v8 = vsel %vm814_vm4, %v4176_v24, %v4170_v31  ;;  %v4177_v53 = vsel %vm814_vm4, %v4174_v5, %v4176_v24 }
 0x577   : > { %v4181_v26 = vadd.f32 %v4180_v8, %v10012_v44  ;;  %v4184_v40 = vadd.f32 %v4177_v53, %v4168_v25 }
 0x579   : > { %4185 = vrot.lane.b32.xlu2 %v4181_v26, %s6908_s28 }
 0x581   : > { %4191 = vrot.lane.b32.xlu2 %v4184_v40, %s6908_s28 }
 0x595   : > { %v4188_v49 = vpop.permute.xlu0 %4187 }
 0x5cd   : > { %v4190_v52 = vpop.permute.xlu1 %4189 }
 0x5ce   : > { %v4194_v59 = vsel %vm831_vm5, %v4188_v49, %v4190_v52 }
 0x5cf   : > { %v4199_v14 = vadd.f32 %v4194_v59, %v4183_v1 }
 0x5d3   : > { %v4186_v38 = vpop.permute.xlu2 %4185 }
 0x5d4   : > { %v4195_v15 = vsel %vm831_vm5, %v4186_v38, %v4188_v49 }
 0x5d5   : > { %v4198_v51 = vadd.f32 %v4195_v15, %v4182_v33 }
 0x5d7   : > { %v4203_v50 = vadd.f32 %v4199_v14, %v4198_v51 }
 0x5db   : > { %v4192_v47 = vpop.permute.xlu2 %4191 }
 0x5dc   : > { %v4193_v44 = vsel %vm831_vm5, %v4190_v52, %v4192_v47  ;;  %v4196_v61 = vsel %vm831_vm5, %v4192_v47, %v4186_v38 }
 0x5dd   : > { %v4197_v16 = vadd.f32 %v4196_v61, %v4181_v26  ;;  %v4200_v23 = vadd.f32 %v4193_v44, %v4184_v40 }
 0x5df   : > { %v4201_v43 = vadd.f32 %v4200_v23, %v4197_v16  ;;  %v4202_v45 = vadd.f32 %v4198_v51, %v4197_v16  ;;  %v4204_v36 = vadd.f32 %v4200_v23, %v4199_v14 }
 0x5e1   : > { %v4205_v35 = vadd.f32 %v4203_v50, %v4201_v43  ;;  %v4206_v42 = vadd.f32 %v4204_v36, %v4202_v45 }
 0x5e3   : > { %v4207_v54 = vmul.f32 0.00390625, %v4205_v35  ;;  %v4208_v58 = vmul.f32 0.00390625, %v4206_v42 }
 0x5e5   : > { %v4209_v29 = vperm.slane %v4207_v54, 0  ;;  %v4210_v30 = vperm.slane %v4208_v58, 0 }
 0x5e7   : > { %v10059_v12 = vsub.f32 %v10017_v0, %v4210_v30  ;;  %v10062_v56 = vsub.f32 %v10020_v60, %v4210_v30  ;;  %v10065_v37 = vsub.f32 %v10026_v28, %v4209_v29  ;;  %v10068_v41 = vsub.f32 %v10029_v18, %v4209_v29 }
 0x5e8   : > { %v10071_v39 = vsub.f32 %v10005_v17, %v4209_v29  ;;  %v10074_v10 = vsub.f32 %v10008_v7, %v4209_v29  ;;  %v10076_v48 = vsub.f32 %v4136_v34, %v4210_v30  ;;  %v10078_v2 = vsub.f32 %v4140_v46, %v4210_v30 }
 0x5e9   : > { %v4220_v0 = vmul.f32 %v10059_v12, %v10059_v12  ;;  %v4224_v60 = vmul.f32 %v10062_v56, %v10062_v56  ;;  %v4221_v28 = vmul.f32 %v10065_v37, %v10065_v37  ;;  %v4225_v17 = vmul.f32 %v10068_v41, %v10068_v41 }
 0x5ea   : > { %v4219_v7 = vmul.f32 %v10071_v39, %v10071_v39  ;;  %v4223_v18 = vmul.f32 %v10074_v10, %v10074_v10  ;;  %v4222_v55 = vmul.f32 %v10076_v48, %v10076_v48  ;;  %v4226_v57 = vmul.f32 %v10078_v2, %v10078_v2 }
 0x5eb   : > { %v4234_v3 = vadd.f32 %v4224_v60, %v4220_v0  ;;  %v4241_v4 = vadd.f32 %v4225_v17, %v4221_v28 }
 0x5ec   : > { %v4227_v6 = vadd.f32 %v4223_v18, %v4219_v7  ;;  %v4248_v22 = vadd.f32 %v4226_v57, %v4222_v55 }
 0x5ed   : > { %v4235_v34 = vrot.slane %v4234_v3, 4  ;;  %v4242_v46 = vrot.slane %v4241_v4, 4 }
 0x5ee   : > { %v4228_v9 = vrot.slane %v4227_v6, 4  ;;  %v4249_v62 = vrot.slane %v4248_v22, 4 }
 0x5ef   : > { %v4236_v13 = vadd.f32 %v4235_v34, %v4234_v3  ;;  %v4243_v20 = vadd.f32 %v4242_v46, %v4241_v4 }
 0x5f0   : > { %v4229_v21 = vadd.f32 %v4228_v9, %v4227_v6  ;;  %v4250_v11 = vadd.f32 %v4249_v62, %v4248_v22 }
 0x5f1   : > { %v4237_v25 = vrot.slane %v4236_v13, 2  ;;  %v4244_v31 = vrot.slane %v4243_v20, 2 }
 0x5f2   : > { %v4230_v32 = vrot.slane %v4229_v21, 2  ;;  %v4251_v27 = vrot.slane %v4250_v11, 2 }
 0x5f3   : > { %v4238_v63 = vadd.f32 %v4237_v25, %v4236_v13  ;;  %v4245_v33 = vadd.f32 %v4244_v31, %v4243_v20 }
 0x5f4   : > { %v4231_v5 = vadd.f32 %v4230_v32, %v4229_v21  ;;  %v4252_v38 = vadd.f32 %v4251_v27, %v4250_v11 }
 0x5f5   : > { %v4239_v1 = vrot.slane %v4238_v63, 1  ;;  %v4246_v24 = vrot.slane %v4245_v33, 1 }
 0x5f6   : > { %v4232_v8 = vrot.slane %v4231_v5, 1  ;;  %v4253_v49 = vrot.slane %v4252_v38, 1 }
 0x5f7   : > { %v4240_v26 = vadd.f32 %v4239_v1, %v4238_v63  ;;  %v4247_v53 = vadd.f32 %v4246_v24, %v4245_v33 }
 0x5f8   : > { %v4233_v40 = vadd.f32 %v4232_v8, %v4231_v5  ;;  %v4254_v52 = vadd.f32 %v4253_v49, %v4252_v38 }
 0x5f9   : > { %4257 = vrot.lane.b32.xlu1 %v4240_v26, %s6907_s27  ;;  %4259 = vrot.lane.b32.xlu2 %v4247_v53, %s6907_s27 }
 0x5fa   : > { %4255 = vrot.lane.b32.xlu0 %v4233_v40, %s6907_s27 }
 0x602   : > { %4261 = vrot.lane.b32.xlu0 %v4254_v52, %s6907_s27  ;;  %s6440_s27 = sshll.u32 %s10151_s13, 6 }
 0x603   : > { %s170_s24 = scalar_lea.vmem %s10138_s3, %s6440_s27 }
 0x653   : > { %v4260_v15 = vpop.permute.xlu2 %4259 }
 0x66b   : > { %v4258_v59 = vpop.permute.xlu1 %4257 }
 0x66c   : > { %v4264_v51 = vsel %vm814_vm4, %v4258_v59, %v4260_v15  ;;  %v4256_v47 = vpop.permute.xlu0 %4255 }
 0x66d   : > { %v4269_v44 = vadd.f32 %v4264_v51, %v4247_v53  ;;  %v4265_v61 = vsel %vm814_vm4, %v4256_v47, %v4258_v59 }
 0x66e   : > { %v4268_v14 = vadd.f32 %v4265_v61, %v4240_v26 }
 0x66f   : > { %4275 = vrot.lane.b32.xlu0 %v4269_v44, %s6908_s28 }
 0x670   : > { %4273 = vrot.lane.b32.xlu2 %v4268_v14, %s6908_s28 }
 0x674   : > { %v4262_v16 = vpop.permute.xlu0 %4261 }
 0x675   : > { %v4266_v23 = vsel %vm814_vm4, %v4262_v16, %v4256_v47  ;;  %v4263_v43 = vsel %vm814_vm4, %v4260_v15, %v4262_v16 }
 0x676   : > { %v4267_v50 = vadd.f32 %v4266_v23, %v4233_v40  ;;  %v4270_v45 = vadd.f32 %v4263_v43, %v4254_v52 }
 0x678   : > { %4271 = vrot.lane.b32.xlu1 %v4267_v50, %s6908_s28 }
 0x680   : > { %4277 = vrot.lane.b32.xlu1 %v4270_v45, %s6908_s28 }
 0x6ca   : > { %v4274_v35 = vpop.permute.xlu2 %4273 }
 0x6e1   : > { %v4276_v42 = vpop.permute.xlu0 %4275 }
 0x6e2   : > { %v4280_v58 = vsel %vm831_vm5, %v4274_v35, %v4276_v42 }
 0x6e3   : > { %v4285_v28 = vadd.f32 %v4280_v58, %v4269_v44 }
 0x6ea   : > { %v4272_v36 = vpop.permute.xlu1 %4271 }
 0x6eb   : > { %v4281_v54 = vsel %vm831_vm5, %v4272_v36, %v4274_v35 }
 0x6ec   : > { %v4284_v29 = vadd.f32 %v4281_v54, %v4268_v14 }
 0x6ee   : > { %v4289_v18 = vadd.f32 %v4285_v28, %v4284_v29 }
 0x6f2   : > { %v4278_v30 = vpop.permute.xlu1 %4277 }
 0x6f3   : > { %v4279_v0 = vsel %vm831_vm5, %v4276_v42, %v4278_v30  ;;  %v4282_v60 = vsel %vm831_vm5, %v4278_v30, %v4272_v36 }
 0x6f4   : > { %v4283_v17 = vadd.f32 %v4282_v60, %v4267_v50  ;;  %v4286_v7 = vadd.f32 %v4279_v0, %v4270_v45 }
 0x6f6   : > { %v4287_v55 = vadd.f32 %v4286_v7, %v4283_v17  ;;  %v4288_v57 = vadd.f32 %v4284_v29, %v4283_v17  ;;  %v4290_v3 = vadd.f32 %v4286_v7, %v4285_v28 }
 0x6f8   : > { %v4291_v4 = vadd.f32 %v4289_v18, %v4287_v55  ;;  %v4292_v6 = vadd.f32 %v4290_v3, %v4288_v57 }
 0x6fa   : > { %v4293_v22 = vmul.f32 0.00390625, %v4291_v4  ;;  %v4294_v34 = vmul.f32 0.00390625, %v4292_v6 }
 0x6fc   : > { %v4295_v46 = vadd.f32 1e-05, %v4293_v22  ;;  %v4296_v9 = vadd.f32 1e-05, %v4294_v34 }
 0x6fe   : > { %6895 = vrsqrt.f32 %v4295_v46  ;;  %vm4303_vm4 = vweird.f32 %v4295_v46  ;;  %vm4313_vm7 = vweird.f32 %v4296_v9 }
 0x6ff   : > { %6897 = vrsqrt.f32 %v4296_v9 }
 0x704   : > { %v6896_v62 = vpop.eup %6895 }
 0x705   : > { %v6898_v13 = vpop.eup %6897  ;;  %v4298_v20 = vmul.f32 %v6896_v62, %v4295_v46  ;;  %vm4304_vm1 = vweird.f32 %v6896_v62 }
 0x706   : > { %v4308_v19 = vmul.f32 %v6898_v13, %v4296_v9  ;;  %vm4314_vm3 = vweird.f32 %v6898_v13  ;;  %vm4305_vm5 = vmor %vm4303_vm4, %vm4304_vm1 }
 0x707   : > { %v4299_v21 = vmul.f32 %v6896_v62, %v4298_v20  ;;  %vm4315_vm14 = vmor %vm4313_vm7, %vm4314_vm3 }
 0x708   : > { %v4309_v11 = vmul.f32 %v6898_v13, %v4308_v19 }
 0x709   : > { %v4300_v25 = vmul.f32 0.5, %v4299_v21 }
 0x70a   : > { %v4310_v31 = vmul.f32 0.5, %v4309_v11 }
 0x70b   : > { %v4301_v32 = vsub.f32 1.5, %v4300_v25 }
 0x70c   : > { %v4311_v63 = vsub.f32 1.5, %v4310_v31 }
 0x70d   : > { %v4302_v33 = vmul.f32 %v6896_v62, %v4301_v32 }
 0x70e   : > { %v4312_v5 = vmul.f32 %v6898_v13, %v4311_v63 }
 0x70f   : > { %v4306_v27 = vsel %vm4305_vm5, %v6896_v62, %v4302_v33 }
 0x710   : > { %v4316_v1 = vsel %vm4315_vm14, %v6898_v13, %v4312_v5  ;;  %v4317_v24 = vperm.slane %v4306_v27, 0 }
 0x711   : > { %v4318_v8 = vperm.slane %v4316_v1, 0 }
 0x712   : > { %v4319_v26 = vmul.f32 %v4317_v24, %v10071_v39  ;;  %v4321_v53 = vmul.f32 %v4317_v24, %v10065_v37  ;;  %v4323_v40 = vmul.f32 %v4317_v24, %v10074_v10  ;;  %v4325_v15 = vmul.f32 %v4317_v24, %v10068_v41 }
 0x713   : > { %v4320_v38 = vmul.f32 %v4318_v8, %v10059_v12  ;;  %v4322_v49 = vmul.f32 %v4318_v8, %v10076_v48  ;;  %v4324_v52 = vmul.f32 %v4318_v8, %v10062_v56  ;;  %v4326_v39 = vmul.f32 %v4318_v8, %v10078_v2 }
 0x714   : > { %v4327_v59 = vmax.f32 %v4319_v26, 0.0  ;;  %v4329_v51 = vmax.f32 %v4321_v53, 0.0  ;;  %v4331_v44 = vmax.f32 %v4323_v40, 0.0  ;;  %v4333_v61 = vmax.f32 %v4325_v15, 0.0 }
 0x715   : > { %v4328_v47 = vmax.f32 %v4320_v38, 0.0  ;;  %v4330_v37 = vmax.f32 %v4322_v49, 0.0  ;;  %v4332_v10 = vmax.f32 %v4324_v52, 0.0  ;;  %v4334_v14 = vmax.f32 %v4326_v39, 0.0 }
 0x716   : > { %4335 = vst [vmem:[%s170_s24] sm:$0xff] %v4327_v59 }
 0x717   : > { %4336 = vst [vmem:[%s170_s24 + $0x8] sm:$0xff] %v4328_v47 }
 0x718   : > { %4337 = vst [vmem:[%s170_s24 + $0x10] sm:$0xff] %v4329_v51 }
 0x719   : > { %4338 = vst [vmem:[%s170_s24 + $0x18] sm:$0xff] %v4330_v37 }
 0x71a   : > { %4339 = vst [vmem:[%s170_s24 + $0x20] sm:$0xff] %v4331_v44 }
 0x71b   : > { %4340 = vst [vmem:[%s170_s24 + $0x28] sm:$0xff] %v4332_v10 }
 0x71c   : > { %4341 = vst [vmem:[%s170_s24 + $0x30] sm:$0xff] %v4333_v61 }
 0x71d   : > { %4342 = vst [vmem:[%s170_s24 + $0x38] sm:$0xff] %v4334_v14 }
 0x71e PF: > { %s13_s12 = sadd.s32 1, %s6905_s12  }
 0x71f   : > { %p10_p4 = scmp.ge.s32.totalorder %s13_s12, 4  }
 0x721   :  { %12 = sbr.rel (!%p10_p4) target bundleno = 1 (0x1), region = 66 }

</bundles_post_ra>
